<compile_context>
chip_gen: v7x
topology: tpu7x:2x2x1
jax: 0.10.0
libtpu: 0.0.40
codegen_flags: <defaults>
</compile_context>

<pallas_src>
import jax
import jax.numpy as jnp
from jax.experimental import pallas as pl
from jax.experimental.pallas import tpu as pltpu


def _round_up(x, m):
    return (x + m - 1) // m * m


# ----------------------------------------------------------------------------
# Kernel 1: conv-as-GEMM (+ bias), batch folded into M, weights resident
# ----------------------------------------------------------------------------
def _conv_matmul_kernel(x_ref, w_ref, b_ref, o_ref):
    # x_ref: (TM, K) bf16   w_ref: (K, Cout) bf16   b_ref: (1, Cout) f32
    # o_ref: (TM, Cout) bf16
    y = jnp.dot(x_ref[...], w_ref[...], preferred_element_type=jnp.float32)
    o_ref[...] = (y + b_ref[...]).astype(o_ref.dtype)


def _matmul_bias(cols, wmat, b, tm_max=1024):
    """cols:(M,K) bf16, wmat:(K,Cout) bf16, b:(1,Cout) f32 -> (M,Cout) bf16."""
    m, k = cols.shape
    c_out = wmat.shape[1]
    g = -(-m // tm_max)                      # number of M tiles
    tm = _round_up(-(-m // g), 16)           # rows per tile (sublane multiple)
    m_pad = tm * g
    if m_pad != m:
        cols = jnp.pad(cols, ((0, m_pad - m), (0, 0)))
    out = pl.pallas_call(
        _conv_matmul_kernel,
        out_shape=jax.ShapeDtypeStruct((m_pad, c_out), jnp.bfloat16),
        grid=(g,),
        in_specs=[
            pl.BlockSpec((tm, k), lambda i: (i, 0)),      # M-tile of patches
            pl.BlockSpec((k, c_out), lambda i: (0, 0)),   # resident weight
            pl.BlockSpec((1, c_out), lambda i: (0, 0)),   # resident bias
        ],
        out_specs=pl.BlockSpec((tm, c_out), lambda i: (i, 0)),
        compiler_params=pltpu.CompilerParams(
            dimension_semantics=("parallel",),
            vmem_limit_bytes=32 * 1024 * 1024),
        cost_estimate=pl.CostEstimate(
            flops=2 * m_pad * k * c_out,
            transcendentals=0,
            bytes_accessed=(m_pad * k * 2 + k * c_out * 2 + c_out * 4
                            + m_pad * c_out * 2)),
    )(cols, wmat, b)
    return out[:m] if m_pad != m else out


# ----------------------------------------------------------------------------
# Conv2d (valid padding) = NHWC im2col (XLA glue) + batched-M Pallas GEMM
# ----------------------------------------------------------------------------
def conv2d_nhwc(x, wmat, b, kh, kw, stride):
    """x:(N,H,W,C) bf16, wmat:(kh*kw*C,Cout) bf16, b:(1,Cout) f32 -> (N,oh,ow,Cout) bf16."""
    n, h, w, c = x.shape
    oh = (h - kh) // stride + 1
    ow = (w - kw) // stride + 1
    taps = []
    for i in range(kh):
        for j in range(kw):
            taps.append(x[:, i:i + stride * (oh - 1) + 1:stride,
                             j:j + stride * (ow - 1) + 1:stride, :])
    patches = jnp.stack(taps, axis=3)                       # (N, oh, ow, kh*kw, C)
    cols = patches.reshape(n * oh * ow, kh * kw * c).astype(jnp.bfloat16)
    out = _matmul_bias(cols, wmat, b)                       # (N*oh*ow, Cout)
    return out.reshape(n, oh, ow, wmat.shape[1])


# ----------------------------------------------------------------------------
# Kernel 2: fused conv4 + fc1 + ReLU + fc2 + sigmoid (one pallas_call)
# ----------------------------------------------------------------------------
def _conv4_fc_kernel(p_ref, w4_ref, b4_ref, w1_ref, b1_ref, w2_ref, b2_ref, o_ref):
    # p_ref : (9, TB, 576) bf16  -- conv4 im2col patches, q(=out_h*3+out_w) major
    # w4_ref: (576, 64) bf16     -- conv4 weight, rows ordered (kh, kw, cin)
    # b4_ref: (1, 64)  f32
    # w1_ref: (576, 64) bf16     -- fc1 weight, rows ordered (h, w, c) == (q, c)
    # b1_ref: (1, 64)  f32
    # w2_ref: (1, 64)  f32       -- fc2 weight
    # b2_ref: (1, 1)   f32 SMEM  -- fc2 bias (scalar)
    # o_ref : (TB, 1)  f32
    tb = o_ref.shape[0]
    w4 = w4_ref[...]
    b4 = b4_ref[...]
    # fc1 pre-activation accumulator, seeded with the fc1 bias (hoisted broadcast).
    h1 = jnp.zeros((tb, 64), jnp.float32) + b1_ref[...]
    for q in range(9):                       # conv4 output position (h*3 + w)
        a4q = jnp.dot(p_ref[q], w4, preferred_element_type=jnp.float32) + b4
        h1 = h1 + jnp.dot(a4q.astype(jnp.bfloat16),
                          w1_ref[q * 64:(q + 1) * 64, :],
                          preferred_element_type=jnp.float32)
    h1 = jnp.maximum(h1, 0.0)                                    # ReLU (fc1)
    y = jnp.sum(h1 * w2_ref[...], axis=-1, keepdims=True) + b2_ref[0, 0]
    o_ref[...] = 1.0 / (1.0 + jnp.exp(-y))                       # exact sigmoid


def conv4_fc_fused(a3, w4, b4, w1, b1, w2, b2, tb_max=128):
    """a3:(N,5,5,64) bf16 -> sigmoid(fc2(relu(fc1(flatten(conv4(a3)))))) : (N,1) f32."""
    n = a3.shape[0]
    # conv4 im2col, laid out q-major / batch-minor so the kernel consumes one
    # (TB, 576) slab per conv4 output position q.
    taps = [a3[:, i:i + 3, j:j + 3, :] for i in range(3) for j in range(3)]
    p = jnp.stack(taps, axis=3)                          # (N, 3, 3, 9, 64)
    p = p.transpose(1, 2, 0, 3, 4).reshape(9, n, 576)    # (q, b, (kh,kw,cin))
    g = -(-n // tb_max)
    tb = _round_up(-(-n // g), 16)
    n_pad = tb * g
    if n_pad != n:
        p = jnp.pad(p, ((0, 0), (0, n_pad - n), (0, 0)))
    p = p.astype(jnp.bfloat16)
    out = pl.pallas_call(
        _conv4_fc_kernel,
        out_shape=jax.ShapeDtypeStruct((n_pad, 1), jnp.float32),
        grid=(g,),
        in_specs=[
            pl.BlockSpec((9, tb, 576), lambda i: (0, i, 0)),    # batch tile of patches
            pl.BlockSpec((576, 64), lambda i: (0, 0)),          # conv4 weight (resident)
            pl.BlockSpec((1, 64), lambda i: (0, 0)),            # conv4 bias
            pl.BlockSpec((576, 64), lambda i: (0, 0)),          # fc1 weight (resident)
            pl.BlockSpec((1, 64), lambda i: (0, 0)),            # fc1 bias
            pl.BlockSpec((1, 64), lambda i: (0, 0)),            # fc2 weight
            pl.BlockSpec(memory_space=pltpu.MemorySpace.SMEM),  # fc2 bias scalar
        ],
        out_specs=pl.BlockSpec((tb, 1), lambda i: (i, 0)),
        compiler_params=pltpu.CompilerParams(
            dimension_semantics=("parallel",),
            vmem_limit_bytes=32 * 1024 * 1024),
        cost_estimate=pl.CostEstimate(
            flops=(2 * n_pad * 9 * 576 * 64 + 2 * n_pad * 9 * 64 * 64
                   + 2 * n_pad * 64),
            transcendentals=n_pad,
            bytes_accessed=(9 * n_pad * 576 * 2 + 2 * 576 * 64 * 2
                            + 3 * 64 * 4 + 4 + n_pad * 4)),
    )(p, w4, b4, w1, b1, w2, b2)
    return out[:n] if n_pad != n else out


# ----------------------------------------------------------------------------
# Parameters: PyTorch layout at init, preprocessed ONCE for the kernels
# ----------------------------------------------------------------------------
def init_params(key):
    """Parameters in the original PyTorch layout (f32, OIHW / (out, in))."""
    def winit(k, shape, scale=0.05):
        return scale * jax.random.normal(k, shape, dtype=jnp.float32)

    ks = jax.random.split(key, 12)
    return {
        "conv1_w": winit(ks[0], (16, 3, 5, 5)),
        "conv1_b": winit(ks[1], (16,)),
        "conv2_w": winit(ks[2], (32, 16, 3, 3)),
        "conv2_b": winit(ks[3], (32,)),
        "conv3_w": winit(ks[4], (64, 32, 3, 3)),
        "conv3_b": winit(ks[5], (64,)),
        "conv4_w": winit(ks[6], (64, 64, 3, 3)),
        "conv4_b": winit(ks[7], (64,)),
        "fc1_w":   winit(ks[8], (64, 576)),   # PyTorch Linear: (out, in)
        "fc1_b":   winit(ks[9], (64,)),
        "fc2_w":   winit(ks[10], (1, 64)),
        "fc2_b":   winit(ks[11], (1,)),
    }


def prepare_params(params):
    """One-time preprocessing: patch-ordered conv weights + bf16 cast + fc1 permute."""
    def conv_wmat(w):                 # (Cout, Cin, kh, kw) -> (kh*kw*Cin, Cout)
        c_out, c_in, kh, kw = w.shape
        return (w.transpose(2, 3, 1, 0)
                 .reshape(kh * kw * c_in, c_out)
                 .astype(jnp.bfloat16))

    # PyTorch flattens conv4's output in (c, h, w) order; our activations are
    # channels-last (h, w, c), so permute fc1's input rows once here.
    fc1_w = params["fc1_w"].reshape(64, 64, 3, 3)          # (out, c, h, w)
    fc1_w = (fc1_w.transpose(2, 3, 1, 0)                   # (h, w, c, out)
                  .reshape(576, 64).astype(jnp.bfloat16))

    return {
        "conv1_w": conv_wmat(params["conv1_w"]),
        "conv1_b": params["conv1_b"].reshape(1, -1).astype(jnp.float32),
        "conv2_w": conv_wmat(params["conv2_w"]),
        "conv2_b": params["conv2_b"].reshape(1, -1).astype(jnp.float32),
        "conv3_w": conv_wmat(params["conv3_w"]),
        "conv3_b": params["conv3_b"].reshape(1, -1).astype(jnp.float32),
        "conv4_w": conv_wmat(params["conv4_w"]),
        "conv4_b": params["conv4_b"].reshape(1, -1).astype(jnp.float32),
        "fc1_w": fc1_w,
        "fc1_b": params["fc1_b"].reshape(1, -1).astype(jnp.float32),
        "fc2_w": params["fc2_w"].astype(jnp.float32),        # (1, 64), VPU path
        "fc2_b": params["fc2_b"].reshape(1, 1).astype(jnp.float32),
    }


# ----------------------------------------------------------------------------
# BreastCancerNet forward (NCHW interface, matches the PyTorch module)
# ----------------------------------------------------------------------------
def breast_cancer_net_forward(prep, x):
    """x: (N, 3, 50, 50) f32 NCHW -> (N, 1) f32."""
    x = x.transpose(0, 2, 3, 1).astype(jnp.bfloat16)                # NHWC bf16
    x = conv2d_nhwc(x, prep["conv1_w"], prep["conv1_b"], 5, 5, 2)   # (N,23,23,16)
    x = conv2d_nhwc(x, prep["conv2_w"], prep["conv2_b"], 3, 3, 2)   # (N,11,11,32)
    x = conv2d_nhwc(x, prep["conv3_w"], prep["conv3_b"], 3, 3, 2)   # (N, 5, 5,64)
    return conv4_fc_fused(x, prep["conv4_w"], prep["conv4_b"],
                          prep["fc1_w"], prep["fc1_b"],
                          prep["fc2_w"], prep["fc2_b"])             # (N, 1) f32


# ----------------------------------------------------------------------------
# Pure-JAX f32 reference (sanity check only)
# ----------------------------------------------------------------------------
def reference_forward(params, x):
    def conv_ref(x, w, b, stride):
        y = jax.lax.conv_general_dilated(
            x, w, window_strides=(stride, stride), padding="VALID",
            dimension_numbers=("NCHW", "OIHW", "NCHW"))
        return y + b[None, :, None, None]

    x = conv_ref(x, params["conv1_w"], params["conv1_b"], 2)
    x = conv_ref(x, params["conv2_w"], params["conv2_b"], 2)
    x = conv_ref(x, params["conv3_w"], params["conv3_b"], 2)
    x = conv_ref(x, params["conv4_w"], params["conv4_b"], 1)
    x = x.reshape(-1, 576)
    x = jax.nn.relu(x @ params["fc1_w"].T + params["fc1_b"])
    x = jax.nn.sigmoid(x @ params["fc2_w"].T + params["fc2_b"])
    return x


if __name__ == "__main__":
    key = jax.random.PRNGKey(0)
    pkey, xkey = jax.random.split(key)
    params = init_params(pkey)
    prep = prepare_params(params)                 # one-time weight preprocessing
    x = jax.random.normal(xkey, (2, 3, 50, 50), dtype=jnp.float32)

    fwd = jax.jit(breast_cancer_net_forward)      # whole forward under one jit
    out = jax.block_until_ready(fwd(prep, x))
    assert out.shape == (2, 1) and out.dtype == jnp.float32, (out.shape, out.dtype)

    ref = jax.block_until_ready(reference_forward(params, x))
    # bf16 activations/weights with f32 accumulation (precision choice): a few
    # percent relative on tiny logits -> well under 2e-2 at the sigmoid output.
    assert jnp.allclose(out, ref, atol=2e-2, rtol=2e-2), (out, ref)

    print("KERNEL_OK")
</pallas_src>

<mosaic_0001>
module attributes {stable_mosaic.version = 11 : i64} {
  func.func @_conv_matmul_kernel(%arg0: i32, %arg1: memref<544x75xbf16, #tpu.memory_space<vmem>>, %arg2: memref<75x16xbf16, #tpu.memory_space<vmem>>, %arg3: memref<1x16xf32, #tpu.memory_space<vmem>>, %arg4: memref<544x16xbf16, #tpu.memory_space<vmem>>) attributes {dimension_semantics = [#tpu.dimension_semantics<parallel>], iteration_bounds = array<i64: 2>, scalar_prefetch = 0 : i64, scratch_operands = 0 : i64, tpu.core_type = #tpu.core_type<tc>, window_params = [{transform_indices = @transform_0, window_bounds = array<i64: 544, 75>}, {pipeline_mode = #tpu.pipeline_mode<synchronous>, transform_indices = @transform_1, window_bounds = array<i64: 75, 16>}, {pipeline_mode = #tpu.pipeline_mode<synchronous>, transform_indices = @transform_2, window_bounds = array<i64: 1, 16>}, {transform_indices = @transform_3, window_bounds = array<i64: 544, 16>}]} {
    %c0 = arith.constant 0 : index
    %c0_0 = arith.constant 0 : index
    %0 = vector.load %arg1[%c0, %c0_0] : memref<544x75xbf16, #tpu.memory_space<vmem>>, vector<544x75xbf16>
    %c0_1 = arith.constant 0 : index
    %c0_2 = arith.constant 0 : index
    %1 = vector.load %arg2[%c0_1, %c0_2] : memref<75x16xbf16, #tpu.memory_space<vmem>>, vector<75x16xbf16>
    %cst = arith.constant dense<0.000000e+00> : vector<544x16xf32>
    %2 = tpu.matmul %0, %1, %cst {dimension_numbers = #tpu.dot_dimension_numbers<[1], [0], [0], [1], [0, 0, 1, 1], [], []>} : vector<544x75xbf16>, vector<75x16xbf16>, vector<544x16xf32> -> vector<544x16xf32>
    %c0_3 = arith.constant 0 : index
    %c0_4 = arith.constant 0 : index
    %3 = vector.load %arg3[%c0_3, %c0_4] : memref<1x16xf32, #tpu.memory_space<vmem>>, vector<1x16xf32>
    %4 = vector.broadcast %3 : vector<1x16xf32> to vector<544x16xf32>
    %5 = arith.addf %2, %4 : vector<544x16xf32>
    %6 = arith.truncf %5 : vector<544x16xf32> to vector<544x16xbf16>
    %c0_5 = arith.constant 0 : index
    %c0_6 = arith.constant 0 : index
    %7 = vector.load %arg4[%c0_5, %c0_6] : memref<544x16xbf16, #tpu.memory_space<vmem>>, vector<544x16xbf16>
    tpu.vector_store %arg4[%c0_5, %c0_6], %6 {strides = array<i32>} : memref<544x16xbf16, #tpu.memory_space<vmem>>, vector<544x16xbf16>,
    return
  }
  func.func @transform_0(%arg0: i32) -> (i32, i32) {
    %c0_i32 = arith.constant 0 : i32
    %c0_i32_0 = arith.constant 0 : i32
    return %arg0, %c0_i32 : i32, i32
  }
  func.func @transform_1(%arg0: i32) -> (i32, i32) {
    %c0_i32 = arith.constant 0 : i32
    %c0_i32_0 = arith.constant 0 : i32
    %c0_i32_1 = arith.constant 0 : i32
    return %c0_i32, %c0_i32_0 : i32, i32
  }
  func.func @transform_2(%arg0: i32) -> (i32, i32) {
    %c0_i32 = arith.constant 0 : i32
    %c0_i32_0 = arith.constant 0 : i32
    %c0_i32_1 = arith.constant 0 : i32
    return %c0_i32, %c0_i32_0 : i32, i32
  }
  func.func @transform_3(%arg0: i32) -> (i32, i32) {
    %c0_i32 = arith.constant 0 : i32
    %c0_i32_0 = arith.constant 0 : i32
    return %arg0, %c0_i32 : i32, i32
  }
}

module attributes {stable_mosaic.version = 11 : i64} {
  func.func @_conv_matmul_kernel(%arg0: i32, %arg1: memref<256x144xbf16, #tpu.memory_space<vmem>>, %arg2: memref<144x32xbf16, #tpu.memory_space<vmem>>, %arg3: memref<1x32xf32, #tpu.memory_space<vmem>>, %arg4: memref<256x32xbf16, #tpu.memory_space<vmem>>) attributes {dimension_semantics = [#tpu.dimension_semantics<parallel>], iteration_bounds = array<i64: 1>, scalar_prefetch = 0 : i64, scratch_operands = 0 : i64, tpu.core_type = #tpu.core_type<tc>, window_params = [{transform_indices = @transform_0, window_bounds = array<i64: 256, 144>}, {pipeline_mode = #tpu.pipeline_mode<synchronous>, transform_indices = @transform_1, window_bounds = array<i64: 144, 32>}, {pipeline_mode = #tpu.pipeline_mode<synchronous>, transform_indices = @transform_2, window_bounds = array<i64: 1, 32>}, {transform_indices = @transform_3, window_bounds = array<i64: 256, 32>}]} {
    %c0 = arith.constant 0 : index
    %c0_0 = arith.constant 0 : index
    %0 = vector.load %arg1[%c0, %c0_0] : memref<256x144xbf16, #tpu.memory_space<vmem>>, vector<256x144xbf16>
    %c0_1 = arith.constant 0 : index
    %c0_2 = arith.constant 0 : index
    %1 = vector.load %arg2[%c0_1, %c0_2] : memref<144x32xbf16, #tpu.memory_space<vmem>>, vector<144x32xbf16>
    %cst = arith.constant dense<0.000000e+00> : vector<256x32xf32>
    %2 = tpu.matmul %0, %1, %cst {dimension_numbers = #tpu.dot_dimension_numbers<[1], [0], [0], [1], [0, 0, 1, 1], [], []>} : vector<256x144xbf16>, vector<144x32xbf16>, vector<256x32xf32> -> vector<256x32xf32>
    %c0_3 = arith.constant 0 : index
    %c0_4 = arith.constant 0 : index
    %3 = vector.load %arg3[%c0_3, %c0_4] : memref<1x32xf32, #tpu.memory_space<vmem>>, vector<1x32xf32>
    %4 = vector.broadcast %3 : vector<1x32xf32> to vector<256x32xf32>
    %5 = arith.addf %2, %4 : vector<256x32xf32>
    %6 = arith.truncf %5 : vector<256x32xf32> to vector<256x32xbf16>
    %c0_5 = arith.constant 0 : index
    %c0_6 = arith.constant 0 : index
    %7 = vector.load %arg4[%c0_5, %c0_6] : memref<256x32xbf16, #tpu.memory_space<vmem>>, vector<256x32xbf16>
    tpu.vector_store %arg4[%c0_5, %c0_6], %6 {strides = array<i32>} : memref<256x32xbf16, #tpu.memory_space<vmem>>, vector<256x32xbf16>,
    return
  }
  func.func @transform_0(%arg0: i32) -> (i32, i32) {
    %c0_i32 = arith.constant 0 : i32
    %c0_i32_0 = arith.constant 0 : i32
    return %arg0, %c0_i32 : i32, i32
  }
  func.func @transform_1(%arg0: i32) -> (i32, i32) {
    %c0_i32 = arith.constant 0 : i32
    %c0_i32_0 = arith.constant 0 : i32
    %c0_i32_1 = arith.constant 0 : i32
    return %c0_i32, %c0_i32_0 : i32, i32
  }
  func.func @transform_2(%arg0: i32) -> (i32, i32) {
    %c0_i32 = arith.constant 0 : i32
    %c0_i32_0 = arith.constant 0 : i32
    %c0_i32_1 = arith.constant 0 : i32
    return %c0_i32, %c0_i32_0 : i32, i32
  }
  func.func @transform_3(%arg0: i32) -> (i32, i32) {
    %c0_i32 = arith.constant 0 : i32
    %c0_i32_0 = arith.constant 0 : i32
    return %arg0, %c0_i32 : i32, i32
  }
}

module attributes {stable_mosaic.version = 11 : i64} {
  func.func @_conv_matmul_kernel(%arg0: i32, %arg1: memref<64x288xbf16, #tpu.memory_space<vmem>>, %arg2: memref<288x64xbf16, #tpu.memory_space<vmem>>, %arg3: memref<1x64xf32, #tpu.memory_space<vmem>>, %arg4: memref<64x64xbf16, #tpu.memory_space<vmem>>) attributes {dimension_semantics = [#tpu.dimension_semantics<parallel>], iteration_bounds = array<i64: 1>, scalar_prefetch = 0 : i64, scratch_operands = 0 : i64, tpu.core_type = #tpu.core_type<tc>, window_params = [{transform_indices = @transform_0, window_bounds = array<i64: 64, 288>}, {pipeline_mode = #tpu.pipeline_mode<synchronous>, transform_indices = @transform_1, window_bounds = array<i64: 288, 64>}, {pipeline_mode = #tpu.pipeline_mode<synchronous>, transform_indices = @transform_2, window_bounds = array<i64: 1, 64>}, {transform_indices = @transform_3, window_bounds = array<i64: 64, 64>}]} {
    %c0 = arith.constant 0 : index
    %c0_0 = arith.constant 0 : index
    %0 = vector.load %arg1[%c0, %c0_0] : memref<64x288xbf16, #tpu.memory_space<vmem>>, vector<64x288xbf16>
    %c0_1 = arith.constant 0 : index
    %c0_2 = arith.constant 0 : index
    %1 = vector.load %arg2[%c0_1, %c0_2] : memref<288x64xbf16, #tpu.memory_space<vmem>>, vector<288x64xbf16>
    %cst = arith.constant dense<0.000000e+00> : vector<64x64xf32>
    %2 = tpu.matmul %0, %1, %cst {dimension_numbers = #tpu.dot_dimension_numbers<[1], [0], [0], [1], [0, 0, 1, 1], [], []>} : vector<64x288xbf16>, vector<288x64xbf16>, vector<64x64xf32> -> vector<64x64xf32>
    %c0_3 = arith.constant 0 : index
    %c0_4 = arith.constant 0 : index
    %3 = vector.load %arg3[%c0_3, %c0_4] : memref<1x64xf32, #tpu.memory_space<vmem>>, vector<1x64xf32>
    %4 = vector.broadcast %3 : vector<1x64xf32> to vector<64x64xf32>
    %5 = arith.addf %2, %4 : vector<64x64xf32>
    %6 = arith.truncf %5 : vector<64x64xf32> to vector<64x64xbf16>
    %c0_5 = arith.constant 0 : index
    %c0_6 = arith.constant 0 : index
    %7 = vector.load %arg4[%c0_5, %c0_6] : memref<64x64xbf16, #tpu.memory_space<vmem>>, vector<64x64xbf16>
    tpu.vector_store %arg4[%c0_5, %c0_6], %6 {strides = array<i32>} : memref<64x64xbf16, #tpu.memory_space<vmem>>, vector<64x64xbf16>,
    return
  }
  func.func @transform_0(%arg0: i32) -> (i32, i32) {
    %c0_i32 = arith.constant 0 : i32
    %c0_i32_0 = arith.constant 0 : i32
    return %arg0, %c0_i32 : i32, i32
  }
  func.func @transform_1(%arg0: i32) -> (i32, i32) {
    %c0_i32 = arith.constant 0 : i32
    %c0_i32_0 = arith.constant 0 : i32
    %c0_i32_1 = arith.constant 0 : i32
    return %c0_i32, %c0_i32_0 : i32, i32
  }
  func.func @transform_2(%arg0: i32) -> (i32, i32) {
    %c0_i32 = arith.constant 0 : i32
    %c0_i32_0 = arith.constant 0 : i32
    %c0_i32_1 = arith.constant 0 : i32
    return %c0_i32, %c0_i32_0 : i32, i32
  }
  func.func @transform_3(%arg0: i32) -> (i32, i32) {
    %c0_i32 = arith.constant 0 : i32
    %c0_i32_0 = arith.constant 0 : i32
    return %arg0, %c0_i32 : i32, i32
  }
}

module attributes {stable_mosaic.version = 11 : i64} {
  func.func @_conv4_fc_kernel(%arg0: i32, %arg1: memref<9x16x576xbf16, #tpu.memory_space<vmem>>, %arg2: memref<576x64xbf16, #tpu.memory_space<vmem>>, %arg3: memref<1x64xf32, #tpu.memory_space<vmem>>, %arg4: memref<576x64xbf16, #tpu.memory_space<vmem>>, %arg5: memref<1x64xf32, #tpu.memory_space<vmem>>, %arg6: memref<1x64xf32, #tpu.memory_space<vmem>>, %arg7: memref<1x1xf32, #tpu.memory_space<smem>>, %arg8: memref<16x1xf32, #tpu.memory_space<vmem>>) attributes {dimension_semantics = [#tpu.dimension_semantics<parallel>], iteration_bounds = array<i64: 1>, scalar_prefetch = 0 : i64, scratch_operands = 0 : i64, tpu.core_type = #tpu.core_type<tc>, window_params = [{transform_indices = @transform_0, window_bounds = array<i64: 9, 16, 576>}, {pipeline_mode = #tpu.pipeline_mode<synchronous>, transform_indices = @transform_1, window_bounds = array<i64: 576, 64>}, {pipeline_mode = #tpu.pipeline_mode<synchronous>, transform_indices = @transform_2, window_bounds = array<i64: 1, 64>}, {pipeline_mode = #tpu.pipeline_mode<synchronous>, transform_indices = @transform_3, window_bounds = array<i64: 576, 64>}, {pipeline_mode = #tpu.pipeline_mode<synchronous>, transform_indices = @transform_4, window_bounds = array<i64: 1, 64>}, {pipeline_mode = #tpu.pipeline_mode<synchronous>, transform_indices = @transform_5, window_bounds = array<i64: 1, 64>}, {transform_indices = @transform_6, window_bounds = array<i64: 1, 1>}, {transform_indices = @transform_7, window_bounds = array<i64: 16, 1>}]} {
    %c0 = arith.constant 0 : index
    %c0_0 = arith.constant 0 : index
    %0 = vector.load %arg2[%c0, %c0_0] : memref<576x64xbf16, #tpu.memory_space<vmem>>, vector<576x64xbf16>
    %c0_1 = arith.constant 0 : index
    %c0_2 = arith.constant 0 : index
    %1 = vector.load %arg3[%c0_1, %c0_2] : memref<1x64xf32, #tpu.memory_space<vmem>>, vector<1x64xf32>
    %cst = arith.constant 0.000000e+00 : f32
    %2 = vector.broadcast %cst : f32 to vector<16x64xf32>
    %c0_3 = arith.constant 0 : index
    %c0_4 = arith.constant 0 : index
    %3 = vector.load %arg5[%c0_3, %c0_4] : memref<1x64xf32, #tpu.memory_space<vmem>>, vector<1x64xf32>
    %4 = vector.broadcast %3 : vector<1x64xf32> to vector<16x64xf32>
    %5 = arith.addf %2, %4 : vector<16x64xf32>
    %c0_5 = arith.constant 0 : index
    %c0_6 = arith.constant 0 : index
    %c0_7 = arith.constant 0 : index
    %6 = vector.load %arg1[%c0_5, %c0_6, %c0_7] : memref<9x16x576xbf16, #tpu.memory_space<vmem>>, vector<1x16x576xbf16>
    %7 = vector.shape_cast %6 : vector<1x16x576xbf16> to vector<16x576xbf16>
    %cst_8 = arith.constant dense<0.000000e+00> : vector<16x64xf32>
    %8 = tpu.matmul %7, %0, %cst_8 {dimension_numbers = #tpu.dot_dimension_numbers<[1], [0], [0], [1], [0, 0, 1, 1], [], []>} : vector<16x576xbf16>, vector<576x64xbf16>, vector<16x64xf32> -> vector<16x64xf32>
    %9 = vector.broadcast %1 : vector<1x64xf32> to vector<16x64xf32>
    %10 = arith.addf %8, %9 : vector<16x64xf32>
    %11 = arith.truncf %10 : vector<16x64xf32> to vector<16x64xbf16>
    %c0_9 = arith.constant 0 : index
    %c0_10 = arith.constant 0 : index
    %12 = vector.load %arg4[%c0_9, %c0_10] : memref<576x64xbf16, #tpu.memory_space<vmem>>, vector<64x64xbf16>
    %cst_11 = arith.constant dense<0.000000e+00> : vector<16x64xf32>
    %13 = tpu.matmul %11, %12, %cst_11 {dimension_numbers = #tpu.dot_dimension_numbers<[1], [0], [0], [1], [0, 0, 1, 1], [], []>} : vector<16x64xbf16>, vector<64x64xbf16>, vector<16x64xf32> -> vector<16x64xf32>
    %14 = arith.addf %5, %13 : vector<16x64xf32>
    %c1 = arith.constant 1 : index
    %c0_12 = arith.constant 0 : index
    %c0_13 = arith.constant 0 : index
    %15 = vector.load %arg1[%c1, %c0_12, %c0_13] : memref<9x16x576xbf16, #tpu.memory_space<vmem>>, vector<1x16x576xbf16>
    %16 = vector.shape_cast %15 : vector<1x16x576xbf16> to vector<16x576xbf16>
    %cst_14 = arith.constant dense<0.000000e+00> : vector<16x64xf32>
    %17 = tpu.matmul %16, %0, %cst_14 {dimension_numbers = #tpu.dot_dimension_numbers<[1], [0], [0], [1], [0, 0, 1, 1], [], []>} : vector<16x576xbf16>, vector<576x64xbf16>, vector<16x64xf32> -> vector<16x64xf32>
    %18 = vector.broadcast %1 : vector<1x64xf32> to vector<16x64xf32>
    %19 = arith.addf %17, %18 : vector<16x64xf32>
    %20 = arith.truncf %19 : vector<16x64xf32> to vector<16x64xbf16>
    %c64 = arith.constant 64 : index
    %c0_15 = arith.constant 0 : index
    %21 = vector.load %arg4[%c64, %c0_15] : memref<576x64xbf16, #tpu.memory_space<vmem>>, vector<64x64xbf16>
    %cst_16 = arith.constant dense<0.000000e+00> : vector<16x64xf32>
    %22 = tpu.matmul %20, %21, %cst_16 {dimension_numbers = #tpu.dot_dimension_numbers<[1], [0], [0], [1], [0, 0, 1, 1], [], []>} : vector<16x64xbf16>, vector<64x64xbf16>, vector<16x64xf32> -> vector<16x64xf32>
    %23 = arith.addf %14, %22 : vector<16x64xf32>
    %c2 = arith.constant 2 : index
    %c0_17 = arith.constant 0 : index
    %c0_18 = arith.constant 0 : index
    %24 = vector.load %arg1[%c2, %c0_17, %c0_18] : memref<9x16x576xbf16, #tpu.memory_space<vmem>>, vector<1x16x576xbf16>
    %25 = vector.shape_cast %24 : vector<1x16x576xbf16> to vector<16x576xbf16>
    %cst_19 = arith.constant dense<0.000000e+00> : vector<16x64xf32>
    %26 = tpu.matmul %25, %0, %cst_19 {dimension_numbers = #tpu.dot_dimension_numbers<[1], [0], [0], [1], [0, 0, 1, 1], [], []>} : vector<16x576xbf16>, vector<576x64xbf16>, vector<16x64xf32> -> vector<16x64xf32>
    %27 = vector.broadcast %1 : vector<1x64xf32> to vector<16x64xf32>
    %28 = arith.addf %26, %27 : vector<16x64xf32>
    %29 = arith.truncf %28 : vector<16x64xf32> to vector<16x64xbf16>
    %c128 = arith.constant 128 : index
    %c0_20 = arith.constant 0 : index
    %30 = vector.load %arg4[%c128, %c0_20] : memref<576x64xbf16, #tpu.memory_space<vmem>>, vector<64x64xbf16>
    %cst_21 = arith.constant dense<0.000000e+00> : vector<16x64xf32>
    %31 = tpu.matmul %29, %30, %cst_21 {dimension_numbers = #tpu.dot_dimension_numbers<[1], [0], [0], [1], [0, 0, 1, 1], [], []>} : vector<16x64xbf16>, vector<64x64xbf16>, vector<16x64xf32> -> vector<16x64xf32>
    %32 = arith.addf %23, %31 : vector<16x64xf32>
    %c3 = arith.constant 3 : index
    %c0_22 = arith.constant 0 : index
    %c0_23 = arith.constant 0 : index
    %33 = vector.load %arg1[%c3, %c0_22, %c0_23] : memref<9x16x576xbf16, #tpu.memory_space<vmem>>, vector<1x16x576xbf16>
    %34 = vector.shape_cast %33 : vector<1x16x576xbf16> to vector<16x576xbf16>
    %cst_24 = arith.constant dense<0.000000e+00> : vector<16x64xf32>
    %35 = tpu.matmul %34, %0, %cst_24 {dimension_numbers = #tpu.dot_dimension_numbers<[1], [0], [0], [1], [0, 0, 1, 1], [], []>} : vector<16x576xbf16>, vector<576x64xbf16>, vector<16x64xf32> -> vector<16x64xf32>
    %36 = vector.broadcast %1 : vector<1x64xf32> to vector<16x64xf32>
    %37 = arith.addf %35, %36 : vector<16x64xf32>
    %38 = arith.truncf %37 : vector<16x64xf32> to vector<16x64xbf16>
    %c192 = arith.constant 192 : index
    %c0_25 = arith.constant 0 : index
    %39 = vector.load %arg4[%c192, %c0_25] : memref<576x64xbf16, #tpu.memory_space<vmem>>, vector<64x64xbf16>
    %cst_26 = arith.constant dense<0.000000e+00> : vector<16x64xf32>
    %40 = tpu.matmul %38, %39, %cst_26 {dimension_numbers = #tpu.dot_dimension_numbers<[1], [0], [0], [1], [0, 0, 1, 1], [], []>} : vector<16x64xbf16>, vector<64x64xbf16>, vector<16x64xf32> -> vector<16x64xf32>
    %41 = arith.addf %32, %40 : vector<16x64xf32>
    %c4 = arith.constant 4 : index
    %c0_27 = arith.constant 0 : index
    %c0_28 = arith.constant 0 : index
    %42 = vector.load %arg1[%c4, %c0_27, %c0_28] : memref<9x16x576xbf16, #tpu.memory_space<vmem>>, vector<1x16x576xbf16>
    %43 = vector.shape_cast %42 : vector<1x16x576xbf16> to vector<16x576xbf16>
    %cst_29 = arith.constant dense<0.000000e+00> : vector<16x64xf32>
    %44 = tpu.matmul %43, %0, %cst_29 {dimension_numbers = #tpu.dot_dimension_numbers<[1], [0], [0], [1], [0, 0, 1, 1], [], []>} : vector<16x576xbf16>, vector<576x64xbf16>, vector<16x64xf32> -> vector<16x64xf32>
    %45 = vector.broadcast %1 : vector<1x64xf32> to vector<16x64xf32>
    %46 = arith.addf %44, %45 : vector<16x64xf32>
    %47 = arith.truncf %46 : vector<16x64xf32> to vector<16x64xbf16>
    %c256 = arith.constant 256 : index
    %c0_30 = arith.constant 0 : index
    %48 = vector.load %arg4[%c256, %c0_30] : memref<576x64xbf16, #tpu.memory_space<vmem>>, vector<64x64xbf16>
    %cst_31 = arith.constant dense<0.000000e+00> : vector<16x64xf32>
    %49 = tpu.matmul %47, %48, %cst_31 {dimension_numbers = #tpu.dot_dimension_numbers<[1], [0], [0], [1], [0, 0, 1, 1], [], []>} : vector<16x64xbf16>, vector<64x64xbf16>, vector<16x64xf32> -> vector<16x64xf32>
    %50 = arith.addf %41, %49 : vector<16x64xf32>
    %c5 = arith.constant 5 : index
    %c0_32 = arith.constant 0 : index
    %c0_33 = arith.constant 0 : index
    %51 = vector.load %arg1[%c5, %c0_32, %c0_33] : memref<9x16x576xbf16, #tpu.memory_space<vmem>>, vector<1x16x576xbf16>
    %52 = vector.shape_cast %51 : vector<1x16x576xbf16> to vector<16x576xbf16>
    %cst_34 = arith.constant dense<0.000000e+00> : vector<16x64xf32>
    %53 = tpu.matmul %52, %0, %cst_34 {dimension_numbers = #tpu.dot_dimension_numbers<[1], [0], [0], [1], [0, 0, 1, 1], [], []>} : vector<16x576xbf16>, vector<576x64xbf16>, vector<16x64xf32> -> vector<16x64xf32>
    %54 = vector.broadcast %1 : vector<1x64xf32> to vector<16x64xf32>
    %55 = arith.addf %53, %54 : vector<16x64xf32>
    %56 = arith.truncf %55 : vector<16x64xf32> to vector<16x64xbf16>
    %c320 = arith.constant 320 : index
    %c0_35 = arith.constant 0 : index
    %57 = vector.load %arg4[%c320, %c0_35] : memref<576x64xbf16, #tpu.memory_space<vmem>>, vector<64x64xbf16>
    %cst_36 = arith.constant dense<0.000000e+00> : vector<16x64xf32>
    %58 = tpu.matmul %56, %57, %cst_36 {dimension_numbers = #tpu.dot_dimension_numbers<[1], [0], [0], [1], [0, 0, 1, 1], [], []>} : vector<16x64xbf16>, vector<64x64xbf16>, vector<16x64xf32> -> vector<16x64xf32>
    %59 = arith.addf %50, %58 : vector<16x64xf32>
    %c6 = arith.constant 6 : index
    %c0_37 = arith.constant 0 : index
    %c0_38 = arith.constant 0 : index
    %60 = vector.load %arg1[%c6, %c0_37, %c0_38] : memref<9x16x576xbf16, #tpu.memory_space<vmem>>, vector<1x16x576xbf16>
    %61 = vector.shape_cast %60 : vector<1x16x576xbf16> to vector<16x576xbf16>
    %cst_39 = arith.constant dense<0.000000e+00> : vector<16x64xf32>
    %62 = tpu.matmul %61, %0, %cst_39 {dimension_numbers = #tpu.dot_dimension_numbers<[1], [0], [0], [1], [0, 0, 1, 1], [], []>} : vector<16x576xbf16>, vector<576x64xbf16>, vector<16x64xf32> -> vector<16x64xf32>
    %63 = vector.broadcast %1 : vector<1x64xf32> to vector<16x64xf32>
    %64 = arith.addf %62, %63 : vector<16x64xf32>
    %65 = arith.truncf %64 : vector<16x64xf32> to vector<16x64xbf16>
    %c384 = arith.constant 384 : index
    %c0_40 = arith.constant 0 : index
    %66 = vector.load %arg4[%c384, %c0_40] : memref<576x64xbf16, #tpu.memory_space<vmem>>, vector<64x64xbf16>
    %cst_41 = arith.constant dense<0.000000e+00> : vector<16x64xf32>
    %67 = tpu.matmul %65, %66, %cst_41 {dimension_numbers = #tpu.dot_dimension_numbers<[1], [0], [0], [1], [0, 0, 1, 1], [], []>} : vector<16x64xbf16>, vector<64x64xbf16>, vector<16x64xf32> -> vector<16x64xf32>
    %68 = arith.addf %59, %67 : vector<16x64xf32>
    %c7 = arith.constant 7 : index
    %c0_42 = arith.constant 0 : index
    %c0_43 = arith.constant 0 : index
    %69 = vector.load %arg1[%c7, %c0_42, %c0_43] : memref<9x16x576xbf16, #tpu.memory_space<vmem>>, vector<1x16x576xbf16>
    %70 = vector.shape_cast %69 : vector<1x16x576xbf16> to vector<16x576xbf16>
    %cst_44 = arith.constant dense<0.000000e+00> : vector<16x64xf32>
    %71 = tpu.matmul %70, %0, %cst_44 {dimension_numbers = #tpu.dot_dimension_numbers<[1], [0], [0], [1], [0, 0, 1, 1], [], []>} : vector<16x576xbf16>, vector<576x64xbf16>, vector<16x64xf32> -> vector<16x64xf32>
    %72 = vector.broadcast %1 : vector<1x64xf32> to vector<16x64xf32>
    %73 = arith.addf %71, %72 : vector<16x64xf32>
    %74 = arith.truncf %73 : vector<16x64xf32> to vector<16x64xbf16>
    %c448 = arith.constant 448 : index
    %c0_45 = arith.constant 0 : index
    %75 = vector.load %arg4[%c448, %c0_45] : memref<576x64xbf16, #tpu.memory_space<vmem>>, vector<64x64xbf16>
    %cst_46 = arith.constant dense<0.000000e+00> : vector<16x64xf32>
    %76 = tpu.matmul %74, %75, %cst_46 {dimension_numbers = #tpu.dot_dimension_numbers<[1], [0], [0], [1], [0, 0, 1, 1], [], []>} : vector<16x64xbf16>, vector<64x64xbf16>, vector<16x64xf32> -> vector<16x64xf32>
    %77 = arith.addf %68, %76 : vector<16x64xf32>
    %c8 = arith.constant 8 : index
    %c0_47 = arith.constant 0 : index
    %c0_48 = arith.constant 0 : index
    %78 = vector.load %arg1[%c8, %c0_47, %c0_48] : memref<9x16x576xbf16, #tpu.memory_space<vmem>>, vector<1x16x576xbf16>
    %79 = vector.shape_cast %78 : vector<1x16x576xbf16> to vector<16x576xbf16>
    %cst_49 = arith.constant dense<0.000000e+00> : vector<16x64xf32>
    %80 = tpu.matmul %79, %0, %cst_49 {dimension_numbers = #tpu.dot_dimension_numbers<[1], [0], [0], [1], [0, 0, 1, 1], [], []>} : vector<16x576xbf16>, vector<576x64xbf16>, vector<16x64xf32> -> vector<16x64xf32>
    %81 = vector.broadcast %1 : vector<1x64xf32> to vector<16x64xf32>
    %82 = arith.addf %80, %81 : vector<16x64xf32>
    %83 = arith.truncf %82 : vector<16x64xf32> to vector<16x64xbf16>
    %c512 = arith.constant 512 : index
    %c0_50 = arith.constant 0 : index
    %84 = vector.load %arg4[%c512, %c0_50] : memref<576x64xbf16, #tpu.memory_space<vmem>>, vector<64x64xbf16>
    %cst_51 = arith.constant dense<0.000000e+00> : vector<16x64xf32>
    %85 = tpu.matmul %83, %84, %cst_51 {dimension_numbers = #tpu.dot_dimension_numbers<[1], [0], [0], [1], [0, 0, 1, 1], [], []>} : vector<16x64xbf16>, vector<64x64xbf16>, vector<16x64xf32> -> vector<16x64xf32>
    %86 = arith.addf %77, %85 : vector<16x64xf32>
    %cst_52 = arith.constant 0.000000e+00 : f32
    %87 = vector.broadcast %cst_52 : f32 to vector<16x64xf32>
    %88 = arith.maximumf %86, %87 : vector<16x64xf32>
    %c0_53 = arith.constant 0 : index
    %c0_54 = arith.constant 0 : index
    %89 = vector.load %arg6[%c0_53, %c0_54] : memref<1x64xf32, #tpu.memory_space<vmem>>, vector<1x64xf32>
    %90 = vector.broadcast %89 : vector<1x64xf32> to vector<16x64xf32>
    %91 = arith.mulf %88, %90 : vector<16x64xf32>
    %cst_55 = arith.constant dense<0.000000e+00> : vector<16xf32>
    %92 = vector.multi_reduction <add>, %91, %cst_55 [1] : vector<16x64xf32> to vector<16xf32>
    %93 = vector.shape_cast %92 : vector<16xf32> to vector<16x1xf32>
    %c0_56 = arith.constant 0 : index
    %c0_57 = arith.constant 0 : index
    %94 = memref.load %arg7[%c0_56, %c0_57] : memref<1x1xf32, #tpu.memory_space<smem>>
    %95 = vector.broadcast %94 : f32 to vector<16x1xf32>
    %96 = arith.addf %93, %95 : vector<16x1xf32>
    %cst_58 = arith.constant 0.000000e+00 : f32
    %97 = vector.broadcast %cst_58 : f32 to vector<16x1xf32>
    %98 = arith.subf %97, %96 : vector<16x1xf32>
    %99 = math.exp %98 : vector<16x1xf32>
    %cst_59 = arith.constant 1.000000e+00 : f32
    %100 = vector.broadcast %cst_59 : f32 to vector<16x1xf32>
    %101 = arith.addf %100, %99 : vector<16x1xf32>
    %cst_60 = arith.constant 1.000000e+00 : f32
    %102 = vector.broadcast %cst_60 : f32 to vector<16x1xf32>
    %103 = arith.divf %102, %101 : vector<16x1xf32>
    %c0_61 = arith.constant 0 : index
    %c0_62 = arith.constant 0 : index
    %104 = vector.load %arg8[%c0_61, %c0_62] : memref<16x1xf32, #tpu.memory_space<vmem>>, vector<16x1xf32>
    tpu.vector_store %arg8[%c0_61, %c0_62], %103 {strides = array<i32>} : memref<16x1xf32, #tpu.memory_space<vmem>>, vector<16x1xf32>,
    return
  }
  func.func @transform_0(%arg0: i32) -> (i32, i32, i32) {
    %c0_i32 = arith.constant 0 : i32
    %c0_i32_0 = arith.constant 0 : i32
    %c0_i32_1 = arith.constant 0 : i32
    return %c0_i32, %arg0, %c0_i32_0 : i32, i32, i32
  }
  func.func @transform_1(%arg0: i32) -> (i32, i32) {
    %c0_i32 = arith.constant 0 : i32
    %c0_i32_0 = arith.constant 0 : i32
    %c0_i32_1 = arith.constant 0 : i32
    return %c0_i32, %c0_i32_0 : i32, i32
  }
  func.func @transform_2(%arg0: i32) -> (i32, i32) {
    %c0_i32 = arith.constant 0 : i32
    %c0_i32_0 = arith.constant 0 : i32
    %c0_i32_1 = arith.constant 0 : i32
    return %c0_i32, %c0_i32_0 : i32, i32
  }
  func.func @transform_3(%arg0: i32) -> (i32, i32) {
    %c0_i32 = arith.constant 0 : i32
    %c0_i32_0 = arith.constant 0 : i32
    %c0_i32_1 = arith.constant 0 : i32
    return %c0_i32, %c0_i32_0 : i32, i32
  }
  func.func @transform_4(%arg0: i32) -> (i32, i32) {
    %c0_i32 = arith.constant 0 : i32
    %c0_i32_0 = arith.constant 0 : i32
    %c0_i32_1 = arith.constant 0 : i32
    return %c0_i32, %c0_i32_0 : i32, i32
  }
  func.func @transform_5(%arg0: i32) -> (i32, i32) {
    %c0_i32 = arith.constant 0 : i32
    %c0_i32_0 = arith.constant 0 : i32
    %c0_i32_1 = arith.constant 0 : i32
    return %c0_i32, %c0_i32_0 : i32, i32
  }
  func.func @transform_6(%arg0: i32) -> (i32, i32) {
    %c0_i32 = arith.constant 0 : i32
    %c0_i32_0 = arith.constant 0 : i32
    %c0_i32_1 = arith.constant 0 : i32
    return %c0_i32, %c0_i32_0 : i32, i32
  }
  func.func @transform_7(%arg0: i32) -> (i32, i32) {
    %c0_i32 = arith.constant 0 : i32
    %c0_i32_0 = arith.constant 0 : i32
    return %arg0, %c0_i32 : i32, i32
  }
}

</mosaic_0001>

<bundles_post_ra>
// kernel: breast_cancer_net_forward.4
= control target key start
LH: loop header
LB: loop body
LE: loop exit
PB: predicated region body
PF: predicated region fallthrough
CT: control target
= control target key end

     0   :  { %s1694_s12 = smov 0   ;;  %s2014_s0 = inlined_call_operand.vmem [shape: bf16[1088,75], index: 0, kind: input, shape index: {}]   ;;  %s2015_s1 = inlined_call_operand.vmem [shape: bf16[75,16], index: 1, kind: input, shape index: {}]   ;;  %s2016_s2 = inlined_call_operand.vmem [shape: f32[1,16], index: 2, kind: input, shape index: {}]   ;;  %s2017_s3 = inlined_call_operand.vmem [shape: bf16[1088,16], index: 3, kind: output, shape index: {}]  }
   0x1 LB: > { %s1271_s13 = sadd.s32 4294967295, %s1671_s12   ;;  %p1275_p0 = scmp.ge.s32.totalorder %s1671_s12, 1  ;;  %s1671_s12 = sphi %s1694_s12, %s13_s12  }
   0x2   : > { %p138_p1 = scmp.lt.s32.totalorder %s1671_s12, 3 }
   0x4   : > { %p139_p2 = pnand %p1275_p0, %p138_p1 }
   0x5   : > { %v1626_v0 = vld [vmem:[%s2015_s1] sm:$0xff] (!%p139_p2)   ;;  %v1627_v1 = vld [vmem:[%s2015_s1 + $0x8] sm:$0xff] (!%p139_p2)   ;;  %vm562_vm0 = vcmask (!%p139_p2), 1044480   ;;  %v1628_v2 = vld [vmem:[%s2015_s1 + $0x10] sm:$0xff] (!%p139_p2)   ;;  %s162_s20 = smul.u32 (!%p139_p2), 68, %s1271_s13  ;;  %vm563_vm1 = vcmask (!%p139_p2), 1045504  }
   0x6   : > { %142 = sbr.rel (%p139_p2) target bundleno = 310 (0x136), region = 32  ;;  %1529 = vmatprep.subr.bf16.mxu0 (!%p139_p2), %v1626_v0  ;;  %1607 = vmatprep.subr.bf16.mxu1 (!%p139_p2), %v1626_v0  ;;  %v1673_v3 = vmov (!%p139_p2), 65535   ;;  %v1629_v5 = vld [vmem:[%s2015_s1 + $0x18] sm:$0xff] (!%p139_p2)   ;;  %v1630_v6 = vld [vmem:[%s2015_s1 + $0x20] sm:$0x3f] (!%p139_p2)   ;;  %vm459_vm2 = vcmask (!%p139_p2), 613376  }
   0x7   : > { %1530 = vmatpush3.bf16.msra.mxu0 (!%p139_p2), %v1626_v0  ;;  %1612 = vmatpush3.bf16.msra.mxu1 (!%p139_p2), %v1626_v0  ;;  %v564_v4 = vsel (!%p139_p2), %vm562_vm0, 4294967295, %v1673_v3  ;;  %p163_p3 = scmp.lt.s32.totalorder (!%p139_p2), %s162_s20, 135  ;;  %v1798_v43 = vld [vmem:[%s2016_s2] ss:$0 sm:$0xff] (!%p139_p2)  ;;  %vm1146_vm3 = vcmask (!%p139_p2), 125952  }
   0x8   : > { %1531 = vmatprep.subr.bf16.mxu0 (!%p139_p2), %v1627_v1  ;;  %1608 = vmatprep.subr.bf16.mxu1 (!%p139_p2), %v1627_v1  ;;  %v565_v7 = vsel (!%p139_p2), %vm563_vm1, %v564_v4, 0 }
   0x9   : > { %v567_v8 = vand.u32 (!%p139_p2), %v1630_v6, %v565_v7 }
   0xb   : > { %1532 = vmatpush3.bf16.msra.mxu0 (!%p139_p2), %v1627_v1  ;;  %1613 = vmatpush3.bf16.msra.mxu1 (!%p139_p2), %v1627_v1 }
   0xc   : > { %1533 = vmatprep.subr.bf16.mxu0 (!%p139_p2), %v1628_v2  ;;  %1609 = vmatprep.subr.bf16.mxu1 (!%p139_p2), %v1628_v2 }
   0xd   : > { %s2019_s20 = smov (!%p163_p3, %s162_s20), 135 }
   0xe   : > { %s1276_s25 = sshll.u32 %s2019_s20, 2 }
   0xf   : > { %1534 = vmatpush3.bf16.msra.mxu0 %v1628_v2  ;;  %1614 = vmatpush3.bf16.msra.mxu1 %v1628_v2  ;;  %s1725_s28 = scalar_lea.vmem %s2014_s0, %s1276_s25  ;;  %s1807_s6 = scalar_lea.vmem %s2017_s3, %s1276_s25 }
  0x10   : > { %1535 = vmatprep.subr.bf16.mxu0 %v1629_v5  ;;  %1610 = vmatprep.subr.bf16.mxu1 %v1629_v5  ;;  %v1631_v9 = vld [vmem:[%s1725_s28] sm:$0xff]   ;;  %v1633_v10 = vld [vmem:[%s1725_s28 + $0x90] sm:$0xff]   ;;  %v1632_v11 = vld [vmem:[%s1725_s28 + $0x8] sm:$0xff]  }
  0x11   : > { %1539 = vmatprep.mubr.msk.bf16.mxu0 %vm459_vm2, %v1631_v9  ;;  %1575 = vmatprep.mubr.msk.bf16.mxu1 %vm459_vm2, %v1633_v10  ;;  %v1634_v12 = vld [vmem:[%s1725_s28 + $0x98] sm:$0xff]   ;;  %v1635_v13 = vld [vmem:[%s1725_s28 + $0x10] sm:$0xff]   ;;  %v1637_v14 = vld [vmem:[%s1725_s28 + $0xa0] sm:$0xff]  }
  0x12   : > { %v1636_v15 = vld [vmem:[%s1725_s28 + $0x18] sm:$0xff]   ;;  %v1638_v16 = vld [vmem:[%s1725_s28 + $0xa8] sm:$0xff]   ;;  %v1639_v17 = vld [vmem:[%s1725_s28 + $0x20] sm:$0xff]  }
  0x13   : > { %1536 = vmatpush3.bf16.msra.mxu0 %v1629_v5  ;;  %1615 = vmatpush3.bf16.msra.mxu1 %v1629_v5  ;;  %v1641_v18 = vld [vmem:[%s1725_s28 + $0xb0] sm:$0xff]   ;;  %v1640_v19 = vld [vmem:[%s1725_s28 + $0x28] sm:$0xff]   ;;  %v1642_v20 = vld [vmem:[%s1725_s28 + $0xb8] sm:$0xff]  }
  0x14   : > { %1537 = vmatprep.subr.bf16.mxu0 %v567_v8  ;;  %1611 = vmatprep.subr.bf16.mxu1 %v567_v8  ;;  %v1643_v21 = vld [vmem:[%s1725_s28 + $0x30] sm:$0xff]   ;;  %v1645_v22 = vld [vmem:[%s1725_s28 + $0xc0] sm:$0xff]   ;;  %v1644_v23 = vld [vmem:[%s1725_s28 + $0x38] sm:$0xff]  }
  0x15   : > { %v1646_v24 = vld [vmem:[%s1725_s28 + $0xc8] sm:$0xff]   ;;  %v1647_v25 = vld [vmem:[%s1725_s28 + $0x40] sm:$0xff]   ;;  %v1649_v26 = vld [vmem:[%s1725_s28 + $0xd0] sm:$0xff]  }
  0x16   : > { %v1648_v27 = vld [vmem:[%s1725_s28 + $0x48] sm:$0xff]   ;;  %v1650_v28 = vld [vmem:[%s1725_s28 + $0xd8] sm:$0xff]   ;;  %v1651_v29 = vld [vmem:[%s1725_s28 + $0x50] sm:$0xff]  }
  0x17   : > { %1538 = vmatpush3.bf16.msra.mxu0 %v567_v8  ;;  %1616 = vmatpush3.bf16.msra.mxu1 %v567_v8  ;;  %v1653_v30 = vld [vmem:[%s1725_s28 + $0xe0] sm:$0xff]   ;;  %v1652_v31 = vld [vmem:[%s1725_s28 + $0x58] sm:$0xff]   ;;  %v1654_v32 = vld [vmem:[%s1725_s28 + $0xe8] sm:$0xff]  }
  0x18   : > { %v1655_v33 = vld [vmem:[%s1725_s28 + $0x60] sm:$0xff]   ;;  %v1657_v34 = vld [vmem:[%s1725_s28 + $0xf0] sm:$0xff]   ;;  %v1656_v35 = vld [vmem:[%s1725_s28 + $0x68] sm:$0xff]  }
  0x19   : > { %v1658_v36 = vld [vmem:[%s1725_s28 + $0xf8] sm:$0xff]   ;;  %v1659_v37 = vld [vmem:[%s1725_s28 + $0x70] sm:$0xff]   ;;  %v1661_v38 = vld [vmem:[%s1725_s28 + $0x100] sm:$0xff]  }
  0x1a   : > { %1540 = vmatmul.mubr.msk.bf16.vlgmr.msra.gmra.mrb[0].mxu0 %vm459_vm2, %v1632_v11  ;;  %1576 = vmatmul.mubr.msk.bf16.vlgmr.msra.gmra.mrb[0].mxu1 %vm459_vm2, %v1634_v12  ;;  %v1660_v39 = vld [vmem:[%s1725_s28 + $0x78] sm:$0xff]   ;;  %v1662_v40 = vld [vmem:[%s1725_s28 + $0x108] sm:$0xff]   ;;  %v1663_v41 = vld [vmem:[%s1725_s28 + $0x80] sm:$0xff]  }
  0x1b   : > { %1543 = vmatprep.mubr.msk.bf16.mxu0 %vm459_vm2, %v1635_v13  ;;  %1579 = vmatprep.mubr.msk.bf16.mxu1 %vm459_vm2, %v1637_v14  ;;  %v1664_v42 = vld [vmem:[%s1725_s28 + $0x88] sm:$0xff]  }
  0x22   : > { %1544 = vmatmul.mubr.msk.bf16.gmra.mrb[4].mxu0 %vm459_vm2, %v1636_v15  ;;  %1580 = vmatmul.mubr.msk.bf16.gmra.mrb[4].mxu1 %vm459_vm2, %v1638_v16 }
  0x23   : > { %1547 = vmatprep.mubr.msk.bf16.mxu0 %vm459_vm2, %v1639_v17  ;;  %1583 = vmatprep.mubr.msk.bf16.mxu1 %vm459_vm2, %v1641_v18 }
  0x2a   : > { %1548 = vmatmul.mubr.msk.bf16.gmra.mrb[8].mxu0 %vm459_vm2, %v1640_v19  ;;  %1584 = vmatmul.mubr.msk.bf16.gmra.mrb[8].mxu1 %vm459_vm2, %v1642_v20 }
  0x2b   : > { %1551 = vmatprep.mubr.msk.bf16.mxu0 %vm459_vm2, %v1643_v21  ;;  %1587 = vmatprep.mubr.msk.bf16.mxu1 %vm459_vm2, %v1645_v22 }
  0x32   : > { %1552 = vmatmul.mubr.msk.bf16.gmra.mrb[12].mxu0 %vm459_vm2, %v1644_v23  ;;  %1588 = vmatmul.mubr.msk.bf16.gmra.mrb[12].mxu1 %vm459_vm2, %v1646_v24 }
  0x33   : > { %1555 = vmatprep.mubr.msk.bf16.mxu0 %vm459_vm2, %v1647_v25  ;;  %1591 = vmatprep.mubr.msk.bf16.mxu1 %vm459_vm2, %v1649_v26 }
  0x3a   : > { %1556 = vmatmul.mubr.msk.bf16.gmra.mrb[16].mxu0 %vm459_vm2, %v1648_v27  ;;  %1592 = vmatmul.mubr.msk.bf16.gmra.mrb[16].mxu1 %vm459_vm2, %v1650_v28 }
  0x3b   : > { %1559 = vmatprep.mubr.msk.bf16.mxu0 %vm459_vm2, %v1651_v29  ;;  %1595 = vmatprep.mubr.msk.bf16.mxu1 %vm459_vm2, %v1653_v30 }
  0x42   : > { %1560 = vmatmul.mubr.msk.bf16.gmra.mrb[20].mxu0 %vm459_vm2, %v1652_v31  ;;  %1596 = vmatmul.mubr.msk.bf16.gmra.mrb[20].mxu1 %vm459_vm2, %v1654_v32 }
  0x43   : > { %1563 = vmatprep.mubr.msk.bf16.mxu0 %vm459_vm2, %v1655_v33  ;;  %1599 = vmatprep.mubr.msk.bf16.mxu1 %vm459_vm2, %v1657_v34 }
  0x4a   : > { %1564 = vmatmul.mubr.msk.bf16.gmra.mrb[24].mxu0 %vm459_vm2, %v1656_v35  ;;  %1600 = vmatmul.mubr.msk.bf16.gmra.mrb[24].mxu1 %vm459_vm2, %v1658_v36 }
  0x4b   : > { %1567 = vmatprep.mubr.msk.bf16.mxu0 %vm459_vm2, %v1659_v37  ;;  %1603 = vmatprep.mubr.msk.bf16.mxu1 %vm459_vm2, %v1661_v38 }
  0x52   : > { %1568 = vmatmul.mubr.msk.bf16.gmra.mrb[28].mxu0 %vm459_vm2, %v1660_v39  ;;  %1604 = vmatmul.mubr.msk.bf16.gmra.mrb[28].mxu1 %vm459_vm2, %v1662_v40 }
  0x53   : > { %1571 = vmatprep.mubr.msk.bf16.mxu0 %vm459_vm2, %v1663_v41 }
  0x5a   : > { %1572 = vmatmul.mubr.msk.bf16.gmra.mrb[32].mxu0 %vm459_vm2, %v1664_v42 }
  0xed   : > { %v1541_v44 = vpop.f32.mrb[0].mxu0  ;;  %v1577_v45 = vpop.f32.mrb[0].mxu1 }
  0xee   : > { %v612_v46 = vadd.f32 %v1541_v44, %v1798_v43  ;;  %v603_v47 = vpop.f32.mrb[1].mxu0  ;;  %v756_v48 = vadd.f32 %v1577_v45, %v1798_v43  ;;  %v747_v49 = vpop.f32.mrb[1].mxu1 }
  0xef   : > { %v604_v50 = vadd.f32 %v1798_v43, %v603_v47  ;;  %v1542_v51 = vpop.f32.mrb[2].mxu0  ;;  %v748_v52 = vadd.f32 %v1798_v43, %v747_v49  ;;  %v1578_v53 = vpop.f32.mrb[2].mxu1 }
  0xf0   : > { %v1424_v54 = vpack.c.bf16 %v612_v46, %v612_v46  ;;  %v615_v55 = vadd.f32 %v1542_v51, %v1798_v43  ;;  %v606_v56 = vpop.f32.mrb[3].mxu0  ;;  %v1460_v57 = vpack.c.bf16 %v756_v48, %v756_v48  ;;  %v759_v58 = vadd.f32 %v1578_v53, %v1798_v43  ;;  %v750_v59 = vpop.f32.mrb[3].mxu1 }
  0xf1   : > { %v1422_v60 = vpack.c.bf16 %v604_v50, %v604_v50  ;;  %v607_v61 = vadd.f32 %v1798_v43, %v606_v56  ;;  %v1458_v62 = vpack.c.bf16 %v748_v52, %v748_v52  ;;  %v751_v63 = vadd.f32 %v1798_v43, %v750_v59 }
  0xf2   : > { %1149 = vst.msk [vmem:[%s1807_s6 + $0x8] sm:$0xf] %vm1146_vm3, %v1424_v54  ;;  %v1425_v0 = vpack.c.bf16 %v615_v55, %v615_v55  ;;  %1185 = vst.msk [vmem:[%s1807_s6 + $0x98] sm:$0xf] %vm1146_vm3, %v1460_v57  ;;  %v1461_v1 = vpack.c.bf16 %v759_v58, %v759_v58 }
  0xf3   : > { %1147 = vst.msk [vmem:[%s1807_s6] sm:$0xf] %vm1146_vm3, %v1422_v60  ;;  %v1423_v2 = vpack.c.bf16 %v607_v61, %v607_v61  ;;  %1183 = vst.msk [vmem:[%s1807_s6 + $0x90] sm:$0xf] %vm1146_vm3, %v1458_v62  ;;  %v1459_v3 = vpack.c.bf16 %v751_v63, %v751_v63 }
  0xf4   : > { %1150 = vst.msk [vmem:[%s1807_s6 + $0xc] sm:$0xf] %vm1146_vm3, %v1425_v0  ;;  %1186 = vst.msk [vmem:[%s1807_s6 + $0x9c] sm:$0xf] %vm1146_vm3, %v1461_v1 }
  0xf5   : > { %1148 = vst.msk [vmem:[%s1807_s6 + $0x4] sm:$0xf] %vm1146_vm3, %v1423_v2  ;;  %v1545_v4 = vpop.f32.mrb[4].mxu0  ;;  %1184 = vst.msk [vmem:[%s1807_s6 + $0x94] sm:$0xf] %vm1146_vm3, %v1459_v3  ;;  %v1581_v5 = vpop.f32.mrb[4].mxu1 }
  0xf6   : > { %v628_v6 = vadd.f32 %v1545_v4, %v1798_v43  ;;  %v619_v7 = vpop.f32.mrb[5].mxu0  ;;  %v772_v8 = vadd.f32 %v1581_v5, %v1798_v43  ;;  %v763_v9 = vpop.f32.mrb[5].mxu1 }
  0xf7   : > { %v620_v10 = vadd.f32 %v1798_v43, %v619_v7  ;;  %v1546_v11 = vpop.f32.mrb[6].mxu0  ;;  %v764_v12 = vadd.f32 %v1798_v43, %v763_v9  ;;  %v1582_v13 = vpop.f32.mrb[6].mxu1 }
  0xf8   : > { %v1428_v14 = vpack.c.bf16 %v628_v6, %v628_v6  ;;  %v631_v15 = vadd.f32 %v1546_v11, %v1798_v43  ;;  %v622_v16 = vpop.f32.mrb[7].mxu0  ;;  %v1464_v17 = vpack.c.bf16 %v772_v8, %v772_v8  ;;  %v775_v18 = vadd.f32 %v1582_v13, %v1798_v43  ;;  %v766_v19 = vpop.f32.mrb[7].mxu1 }
  0xf9   : > { %v1426_v20 = vpack.c.bf16 %v620_v10, %v620_v10  ;;  %v623_v21 = vadd.f32 %v1798_v43, %v622_v16  ;;  %v1462_v22 = vpack.c.bf16 %v764_v12, %v764_v12  ;;  %v767_v23 = vadd.f32 %v1798_v43, %v766_v19 }
  0xfa   : > { %1153 = vst.msk [vmem:[%s1807_s6 + $0x18] sm:$0xf] %vm1146_vm3, %v1428_v14  ;;  %v1429_v24 = vpack.c.bf16 %v631_v15, %v631_v15  ;;  %1189 = vst.msk [vmem:[%s1807_s6 + $0xa8] sm:$0xf] %vm1146_vm3, %v1464_v17  ;;  %v1465_v25 = vpack.c.bf16 %v775_v18, %v775_v18 }
  0xfb   : > { %1151 = vst.msk [vmem:[%s1807_s6 + $0x10] sm:$0xf] %vm1146_vm3, %v1426_v20  ;;  %v1427_v26 = vpack.c.bf16 %v623_v21, %v623_v21  ;;  %1187 = vst.msk [vmem:[%s1807_s6 + $0xa0] sm:$0xf] %vm1146_vm3, %v1462_v22  ;;  %v1463_v27 = vpack.c.bf16 %v767_v23, %v767_v23 }
  0xfc   : > { %1154 = vst.msk [vmem:[%s1807_s6 + $0x1c] sm:$0xf] %vm1146_vm3, %v1429_v24  ;;  %1190 = vst.msk [vmem:[%s1807_s6 + $0xac] sm:$0xf] %vm1146_vm3, %v1465_v25 }
  0xfd   : > { %1152 = vst.msk [vmem:[%s1807_s6 + $0x14] sm:$0xf] %vm1146_vm3, %v1427_v26  ;;  %v1549_v28 = vpop.f32.mrb[8].mxu0  ;;  %1188 = vst.msk [vmem:[%s1807_s6 + $0xa4] sm:$0xf] %vm1146_vm3, %v1463_v27  ;;  %v1585_v29 = vpop.f32.mrb[8].mxu1 }
  0xfe   : > { %v644_v30 = vadd.f32 %v1549_v28, %v1798_v43  ;;  %v635_v31 = vpop.f32.mrb[9].mxu0  ;;  %v788_v32 = vadd.f32 %v1585_v29, %v1798_v43  ;;  %v779_v33 = vpop.f32.mrb[9].mxu1 }
  0xff   : > { %v636_v34 = vadd.f32 %v1798_v43, %v635_v31  ;;  %v1550_v35 = vpop.f32.mrb[10].mxu0  ;;  %v780_v36 = vadd.f32 %v1798_v43, %v779_v33  ;;  %v1586_v37 = vpop.f32.mrb[10].mxu1 }
 0x100   : > { %v1432_v38 = vpack.c.bf16 %v644_v30, %v644_v30  ;;  %v647_v39 = vadd.f32 %v1550_v35, %v1798_v43  ;;  %v638_v40 = vpop.f32.mrb[11].mxu0  ;;  %v1468_v41 = vpack.c.bf16 %v788_v32, %v788_v32  ;;  %v791_v42 = vadd.f32 %v1586_v37, %v1798_v43  ;;  %v782_v44 = vpop.f32.mrb[11].mxu1 }
 0x101   : > { %v1430_v45 = vpack.c.bf16 %v636_v34, %v636_v34  ;;  %v639_v46 = vadd.f32 %v1798_v43, %v638_v40  ;;  %v1466_v47 = vpack.c.bf16 %v780_v36, %v780_v36  ;;  %v783_v48 = vadd.f32 %v1798_v43, %v782_v44 }
 0x102   : > { %1157 = vst.msk [vmem:[%s1807_s6 + $0x28] sm:$0xf] %vm1146_vm3, %v1432_v38  ;;  %v1433_v49 = vpack.c.bf16 %v647_v39, %v647_v39  ;;  %1193 = vst.msk [vmem:[%s1807_s6 + $0xb8] sm:$0xf] %vm1146_vm3, %v1468_v41  ;;  %v1469_v50 = vpack.c.bf16 %v791_v42, %v791_v42 }
 0x103   : > { %1155 = vst.msk [vmem:[%s1807_s6 + $0x20] sm:$0xf] %vm1146_vm3, %v1430_v45  ;;  %v1431_v51 = vpack.c.bf16 %v639_v46, %v639_v46  ;;  %1191 = vst.msk [vmem:[%s1807_s6 + $0xb0] sm:$0xf] %vm1146_vm3, %v1466_v47  ;;  %v1467_v52 = vpack.c.bf16 %v783_v48, %v783_v48 }
 0x104   : > { %1158 = vst.msk [vmem:[%s1807_s6 + $0x2c] sm:$0xf] %vm1146_vm3, %v1433_v49  ;;  %1194 = vst.msk [vmem:[%s1807_s6 + $0xbc] sm:$0xf] %vm1146_vm3, %v1469_v50 }
 0x105   : > { %1156 = vst.msk [vmem:[%s1807_s6 + $0x24] sm:$0xf] %vm1146_vm3, %v1431_v51  ;;  %v1553_v53 = vpop.f32.mrb[12].mxu0  ;;  %1192 = vst.msk [vmem:[%s1807_s6 + $0xb4] sm:$0xf] %vm1146_vm3, %v1467_v52  ;;  %v1589_v54 = vpop.f32.mrb[12].mxu1 }
 0x106   : > { %v660_v55 = vadd.f32 %v1553_v53, %v1798_v43  ;;  %v651_v56 = vpop.f32.mrb[13].mxu0  ;;  %v804_v57 = vadd.f32 %v1589_v54, %v1798_v43  ;;  %v795_v58 = vpop.f32.mrb[13].mxu1 }
 0x107   : > { %v652_v59 = vadd.f32 %v1798_v43, %v651_v56  ;;  %v1554_v60 = vpop.f32.mrb[14].mxu0  ;;  %v796_v61 = vadd.f32 %v1798_v43, %v795_v58  ;;  %v1590_v62 = vpop.f32.mrb[14].mxu1 }
 0x108   : > { %v1436_v63 = vpack.c.bf16 %v660_v55, %v660_v55  ;;  %v663_v0 = vadd.f32 %v1554_v60, %v1798_v43  ;;  %v654_v1 = vpop.f32.mrb[15].mxu0  ;;  %v1472_v2 = vpack.c.bf16 %v804_v57, %v804_v57  ;;  %v807_v3 = vadd.f32 %v1590_v62, %v1798_v43  ;;  %v798_v4 = vpop.f32.mrb[15].mxu1 }
 0x109   : > { %v1434_v5 = vpack.c.bf16 %v652_v59, %v652_v59  ;;  %v655_v6 = vadd.f32 %v1798_v43, %v654_v1  ;;  %v1470_v7 = vpack.c.bf16 %v796_v61, %v796_v61  ;;  %v799_v8 = vadd.f32 %v1798_v43, %v798_v4 }
 0x10a   : > { %1161 = vst.msk [vmem:[%s1807_s6 + $0x38] sm:$0xf] %vm1146_vm3, %v1436_v63  ;;  %v1437_v9 = vpack.c.bf16 %v663_v0, %v663_v0  ;;  %1197 = vst.msk [vmem:[%s1807_s6 + $0xc8] sm:$0xf] %vm1146_vm3, %v1472_v2  ;;  %v1473_v10 = vpack.c.bf16 %v807_v3, %v807_v3 }
 0x10b   : > { %1159 = vst.msk [vmem:[%s1807_s6 + $0x30] sm:$0xf] %vm1146_vm3, %v1434_v5  ;;  %v1435_v11 = vpack.c.bf16 %v655_v6, %v655_v6  ;;  %1195 = vst.msk [vmem:[%s1807_s6 + $0xc0] sm:$0xf] %vm1146_vm3, %v1470_v7  ;;  %v1471_v12 = vpack.c.bf16 %v799_v8, %v799_v8 }
 0x10c   : > { %1162 = vst.msk [vmem:[%s1807_s6 + $0x3c] sm:$0xf] %vm1146_vm3, %v1437_v9  ;;  %1198 = vst.msk [vmem:[%s1807_s6 + $0xcc] sm:$0xf] %vm1146_vm3, %v1473_v10 }
 0x10d   : > { %1160 = vst.msk [vmem:[%s1807_s6 + $0x34] sm:$0xf] %vm1146_vm3, %v1435_v11  ;;  %v1557_v13 = vpop.f32.mrb[16].mxu0  ;;  %1196 = vst.msk [vmem:[%s1807_s6 + $0xc4] sm:$0xf] %vm1146_vm3, %v1471_v12  ;;  %v1593_v14 = vpop.f32.mrb[16].mxu1 }
 0x10e   : > { %v676_v15 = vadd.f32 %v1557_v13, %v1798_v43  ;;  %v667_v16 = vpop.f32.mrb[17].mxu0  ;;  %v820_v17 = vadd.f32 %v1593_v14, %v1798_v43  ;;  %v811_v18 = vpop.f32.mrb[17].mxu1 }
 0x10f   : > { %v668_v19 = vadd.f32 %v1798_v43, %v667_v16  ;;  %v1558_v20 = vpop.f32.mrb[18].mxu0  ;;  %v812_v21 = vadd.f32 %v1798_v43, %v811_v18  ;;  %v1594_v22 = vpop.f32.mrb[18].mxu1 }
 0x110   : > { %v1440_v23 = vpack.c.bf16 %v676_v15, %v676_v15  ;;  %v679_v24 = vadd.f32 %v1558_v20, %v1798_v43  ;;  %v670_v25 = vpop.f32.mrb[19].mxu0  ;;  %v1476_v26 = vpack.c.bf16 %v820_v17, %v820_v17  ;;  %v823_v27 = vadd.f32 %v1594_v22, %v1798_v43  ;;  %v814_v28 = vpop.f32.mrb[19].mxu1 }
 0x111   : > { %v1438_v29 = vpack.c.bf16 %v668_v19, %v668_v19  ;;  %v671_v30 = vadd.f32 %v1798_v43, %v670_v25  ;;  %v1474_v31 = vpack.c.bf16 %v812_v21, %v812_v21  ;;  %v815_v32 = vadd.f32 %v1798_v43, %v814_v28 }
 0x112   : > { %1165 = vst.msk [vmem:[%s1807_s6 + $0x48] sm:$0xf] %vm1146_vm3, %v1440_v23  ;;  %v1441_v33 = vpack.c.bf16 %v679_v24, %v679_v24  ;;  %1201 = vst.msk [vmem:[%s1807_s6 + $0xd8] sm:$0xf] %vm1146_vm3, %v1476_v26  ;;  %v1477_v34 = vpack.c.bf16 %v823_v27, %v823_v27 }
 0x113   : > { %1163 = vst.msk [vmem:[%s1807_s6 + $0x40] sm:$0xf] %vm1146_vm3, %v1438_v29  ;;  %v1439_v35 = vpack.c.bf16 %v671_v30, %v671_v30  ;;  %1199 = vst.msk [vmem:[%s1807_s6 + $0xd0] sm:$0xf] %vm1146_vm3, %v1474_v31  ;;  %v1475_v36 = vpack.c.bf16 %v815_v32, %v815_v32 }
 0x114   : > { %1166 = vst.msk [vmem:[%s1807_s6 + $0x4c] sm:$0xf] %vm1146_vm3, %v1441_v33  ;;  %1202 = vst.msk [vmem:[%s1807_s6 + $0xdc] sm:$0xf] %vm1146_vm3, %v1477_v34 }
 0x115   : > { %1164 = vst.msk [vmem:[%s1807_s6 + $0x44] sm:$0xf] %vm1146_vm3, %v1439_v35  ;;  %v1561_v37 = vpop.f32.mrb[20].mxu0  ;;  %1200 = vst.msk [vmem:[%s1807_s6 + $0xd4] sm:$0xf] %vm1146_vm3, %v1475_v36  ;;  %v1597_v38 = vpop.f32.mrb[20].mxu1 }
 0x116   : > { %v692_v39 = vadd.f32 %v1561_v37, %v1798_v43  ;;  %v683_v40 = vpop.f32.mrb[21].mxu0  ;;  %v836_v41 = vadd.f32 %v1597_v38, %v1798_v43  ;;  %v827_v42 = vpop.f32.mrb[21].mxu1 }
 0x117   : > { %v684_v44 = vadd.f32 %v1798_v43, %v683_v40  ;;  %v1562_v45 = vpop.f32.mrb[22].mxu0  ;;  %v828_v46 = vadd.f32 %v1798_v43, %v827_v42  ;;  %v1598_v47 = vpop.f32.mrb[22].mxu1 }
 0x118   : > { %v1444_v48 = vpack.c.bf16 %v692_v39, %v692_v39  ;;  %v695_v49 = vadd.f32 %v1562_v45, %v1798_v43  ;;  %v686_v50 = vpop.f32.mrb[23].mxu0  ;;  %v1480_v51 = vpack.c.bf16 %v836_v41, %v836_v41  ;;  %v839_v52 = vadd.f32 %v1598_v47, %v1798_v43  ;;  %v830_v53 = vpop.f32.mrb[23].mxu1 }
 0x119   : > { %v1442_v54 = vpack.c.bf16 %v684_v44, %v684_v44  ;;  %v687_v55 = vadd.f32 %v1798_v43, %v686_v50  ;;  %v1478_v56 = vpack.c.bf16 %v828_v46, %v828_v46  ;;  %v831_v57 = vadd.f32 %v1798_v43, %v830_v53 }
 0x11a   : > { %1169 = vst.msk [vmem:[%s1807_s6 + $0x58] sm:$0xf] %vm1146_vm3, %v1444_v48  ;;  %v1445_v58 = vpack.c.bf16 %v695_v49, %v695_v49  ;;  %1205 = vst.msk [vmem:[%s1807_s6 + $0xe8] sm:$0xf] %vm1146_vm3, %v1480_v51  ;;  %v1481_v59 = vpack.c.bf16 %v839_v52, %v839_v52 }
 0x11b   : > { %1167 = vst.msk [vmem:[%s1807_s6 + $0x50] sm:$0xf] %vm1146_vm3, %v1442_v54  ;;  %v1443_v60 = vpack.c.bf16 %v687_v55, %v687_v55  ;;  %1203 = vst.msk [vmem:[%s1807_s6 + $0xe0] sm:$0xf] %vm1146_vm3, %v1478_v56  ;;  %v1479_v61 = vpack.c.bf16 %v831_v57, %v831_v57 }
 0x11c   : > { %1170 = vst.msk [vmem:[%s1807_s6 + $0x5c] sm:$0xf] %vm1146_vm3, %v1445_v58  ;;  %1206 = vst.msk [vmem:[%s1807_s6 + $0xec] sm:$0xf] %vm1146_vm3, %v1481_v59 }
 0x11d   : > { %1168 = vst.msk [vmem:[%s1807_s6 + $0x54] sm:$0xf] %vm1146_vm3, %v1443_v60  ;;  %v1565_v62 = vpop.f32.mrb[24].mxu0  ;;  %1204 = vst.msk [vmem:[%s1807_s6 + $0xe4] sm:$0xf] %vm1146_vm3, %v1479_v61  ;;  %v1601_v63 = vpop.f32.mrb[24].mxu1 }
 0x11e   : > { %v708_v0 = vadd.f32 %v1565_v62, %v1798_v43  ;;  %v699_v1 = vpop.f32.mrb[25].mxu0  ;;  %v852_v2 = vadd.f32 %v1601_v63, %v1798_v43  ;;  %v843_v3 = vpop.f32.mrb[25].mxu1 }
 0x11f   : > { %v700_v4 = vadd.f32 %v1798_v43, %v699_v1  ;;  %v1566_v5 = vpop.f32.mrb[26].mxu0  ;;  %v844_v6 = vadd.f32 %v1798_v43, %v843_v3  ;;  %v1602_v7 = vpop.f32.mrb[26].mxu1 }
 0x120   : > { %v1448_v8 = vpack.c.bf16 %v708_v0, %v708_v0  ;;  %v711_v9 = vadd.f32 %v1566_v5, %v1798_v43  ;;  %v702_v10 = vpop.f32.mrb[27].mxu0  ;;  %v1484_v11 = vpack.c.bf16 %v852_v2, %v852_v2  ;;  %v855_v12 = vadd.f32 %v1602_v7, %v1798_v43  ;;  %v846_v13 = vpop.f32.mrb[27].mxu1 }
 0x121   : > { %v1446_v14 = vpack.c.bf16 %v700_v4, %v700_v4  ;;  %v703_v15 = vadd.f32 %v1798_v43, %v702_v10  ;;  %v1482_v16 = vpack.c.bf16 %v844_v6, %v844_v6  ;;  %v847_v17 = vadd.f32 %v1798_v43, %v846_v13 }
 0x122   : > { %1173 = vst.msk [vmem:[%s1807_s6 + $0x68] sm:$0xf] %vm1146_vm3, %v1448_v8  ;;  %v1449_v18 = vpack.c.bf16 %v711_v9, %v711_v9  ;;  %1209 = vst.msk [vmem:[%s1807_s6 + $0xf8] sm:$0xf] %vm1146_vm3, %v1484_v11  ;;  %v1485_v19 = vpack.c.bf16 %v855_v12, %v855_v12 }
 0x123   : > { %1171 = vst.msk [vmem:[%s1807_s6 + $0x60] sm:$0xf] %vm1146_vm3, %v1446_v14  ;;  %v1447_v20 = vpack.c.bf16 %v703_v15, %v703_v15  ;;  %1207 = vst.msk [vmem:[%s1807_s6 + $0xf0] sm:$0xf] %vm1146_vm3, %v1482_v16  ;;  %v1483_v21 = vpack.c.bf16 %v847_v17, %v847_v17 }
 0x124   : > { %1174 = vst.msk [vmem:[%s1807_s6 + $0x6c] sm:$0xf] %vm1146_vm3, %v1449_v18  ;;  %1210 = vst.msk [vmem:[%s1807_s6 + $0xfc] sm:$0xf] %vm1146_vm3, %v1485_v19 }
 0x125   : > { %1172 = vst.msk [vmem:[%s1807_s6 + $0x64] sm:$0xf] %vm1146_vm3, %v1447_v20  ;;  %v1569_v22 = vpop.f32.mrb[28].mxu0  ;;  %1208 = vst.msk [vmem:[%s1807_s6 + $0xf4] sm:$0xf] %vm1146_vm3, %v1483_v21  ;;  %v1605_v23 = vpop.f32.mrb[28].mxu1 }
 0x126   : > { %v724_v24 = vadd.f32 %v1569_v22, %v1798_v43  ;;  %v715_v25 = vpop.f32.mrb[29].mxu0  ;;  %v868_v26 = vadd.f32 %v1605_v23, %v1798_v43  ;;  %v859_v27 = vpop.f32.mrb[29].mxu1 }
 0x127   : > { %v716_v28 = vadd.f32 %v1798_v43, %v715_v25  ;;  %v1570_v29 = vpop.f32.mrb[30].mxu0  ;;  %v860_v30 = vadd.f32 %v1798_v43, %v859_v27  ;;  %v1606_v31 = vpop.f32.mrb[30].mxu1 }
 0x128   : > { %v1452_v32 = vpack.c.bf16 %v724_v24, %v724_v24  ;;  %v727_v33 = vadd.f32 %v1570_v29, %v1798_v43  ;;  %v718_v34 = vpop.f32.mrb[31].mxu0  ;;  %v1488_v35 = vpack.c.bf16 %v868_v26, %v868_v26  ;;  %v871_v36 = vadd.f32 %v1606_v31, %v1798_v43  ;;  %v862_v37 = vpop.f32.mrb[31].mxu1 }
 0x129   : > { %v1450_v38 = vpack.c.bf16 %v716_v28, %v716_v28  ;;  %v719_v39 = vadd.f32 %v1798_v43, %v718_v34  ;;  %v1486_v40 = vpack.c.bf16 %v860_v30, %v860_v30  ;;  %v863_v41 = vadd.f32 %v1798_v43, %v862_v37 }
 0x12a   : > { %1177 = vst.msk [vmem:[%s1807_s6 + $0x78] sm:$0xf] %vm1146_vm3, %v1452_v32  ;;  %v1453_v42 = vpack.c.bf16 %v727_v33, %v727_v33  ;;  %1213 = vst.msk [vmem:[%s1807_s6 + $0x108] sm:$0xf] %vm1146_vm3, %v1488_v35  ;;  %v1489_v44 = vpack.c.bf16 %v871_v36, %v871_v36 }
 0x12b   : > { %1175 = vst.msk [vmem:[%s1807_s6 + $0x70] sm:$0xf] %vm1146_vm3, %v1450_v38  ;;  %v1451_v45 = vpack.c.bf16 %v719_v39, %v719_v39  ;;  %1211 = vst.msk [vmem:[%s1807_s6 + $0x100] sm:$0xf] %vm1146_vm3, %v1486_v40  ;;  %v1487_v46 = vpack.c.bf16 %v863_v41, %v863_v41 }
 0x12c   : > { %1178 = vst.msk [vmem:[%s1807_s6 + $0x7c] sm:$0xf] %vm1146_vm3, %v1453_v42  ;;  %1214 = vst.msk [vmem:[%s1807_s6 + $0x10c] sm:$0xf] %vm1146_vm3, %v1489_v44 }
 0x12d   : > { %1176 = vst.msk [vmem:[%s1807_s6 + $0x74] sm:$0xf] %vm1146_vm3, %v1451_v45  ;;  %v1573_v47 = vpop.f32.mrb[32].mxu0  ;;  %1212 = vst.msk [vmem:[%s1807_s6 + $0x104] sm:$0xf] %vm1146_vm3, %v1487_v46 }
 0x12e   : > { %v740_v48 = vadd.f32 %v1573_v47, %v1798_v43  ;;  %v731_v49 = vpop.f32.mrb[33].mxu0 }
 0x12f   : > { %v732_v50 = vadd.f32 %v1798_v43, %v731_v49  ;;  %v1574_v51 = vpop.f32.mrb[34].mxu0 }
 0x130   : > { %v1456_v52 = vpack.c.bf16 %v740_v48, %v740_v48  ;;  %v743_v53 = vadd.f32 %v1574_v51, %v1798_v43  ;;  %v734_v54 = vpop.f32.mrb[35].mxu0 }
 0x131   : > { %v1454_v55 = vpack.c.bf16 %v732_v50, %v732_v50  ;;  %v735_v56 = vadd.f32 %v1798_v43, %v734_v54 }
 0x132   : > { %1181 = vst.msk [vmem:[%s1807_s6 + $0x88] sm:$0xf] %vm1146_vm3, %v1456_v52  ;;  %v1457_v57 = vpack.c.bf16 %v743_v53, %v743_v53 }
 0x133   : > { %1179 = vst.msk [vmem:[%s1807_s6 + $0x80] sm:$0xf] %vm1146_vm3, %v1454_v55  ;;  %v1455_v58 = vpack.c.bf16 %v735_v56, %v735_v56 }
 0x134   : > { %1182 = vst.msk [vmem:[%s1807_s6 + $0x8c] sm:$0xf] %vm1146_vm3, %v1457_v57 }
 0x135   : > { %1180 = vst.msk [vmem:[%s1807_s6 + $0x84] sm:$0xf] %vm1146_vm3, %v1455_v58 }
 0x136 PF: > { %s13_s12 = sadd.s32 1, %s1671_s12  }
 0x137   : > { %p10_p4 = scmp.ge.s32.totalorder %s13_s12, 4  }
 0x139   :  { %12 = sbr.rel (!%p10_p4) target bundleno = 1 (0x1), region = 62 }

// kernel: breast_cancer_net_forward.5
= control target key start
LH: loop header
LB: loop body
LE: loop exit
PB: predicated region body
PF: predicated region fallthrough
CT: control target
= control target key end

     0   :  { %v843_v0 = vmov 0   ;;  %vm270_vm0 = vcmask 130048   ;;  %vm608_vm1 = vcmask 257024   ;;  %s1168_s1 = inlined_call_operand.vmem [shape: bf16[144,32], index: 1, kind: input, shape index: {}]   ;;  %s1169_s0 = inlined_call_operand.vmem [shape: bf16[256,144], index: 0, kind: input, shape index: {}]   ;;  %s1170_s2 = inlined_call_operand.vmem [shape: f32[1,32], index: 2, kind: input, shape index: {}]   ;;  %s1171_s3 = inlined_call_operand.vmem [shape: bf16[256,32], index: 3, kind: output, shape index: {}]  }
   0x1   :  { %319 = vmatprep.subr.bf16.mxu0 %v843_v0  ;;  %767 = vmatprep.subr.bf16.mxu1 %v843_v0  ;;  %v786_v1 = vld [vmem:[%s1168_s1] sm:$0xff]   ;;  %v787_v2 = vld [vmem:[%s1168_s1 + $0x8] sm:$0xff]   ;;  %v788_v3 = vld [vmem:[%s1168_s1 + $0x10] sm:$0xff]  }
   0x2   :  { %320 = vmatpush1.bf16.msra.mxu0 %v786_v1  ;;  %776 = vmatpush1.bf16.msra.mxu1 %v786_v1  ;;  %v789_v4 = vld [vmem:[%s1168_s1 + $0x18] sm:$0xff]   ;;  %v797_v5 = vld [vmem:[%s1169_s0 + $0x4] ss:$8 sps:$4 sm:$0xff]   ;;  %v792_v9 = vld [vmem:[%s1168_s1 + $0x30] sm:$0xff]  }
   0x3   :  { %321 = vmatprep.subr.bf16.mxu0 %v843_v0  ;;  %768 = vmatprep.subr.bf16.mxu1 %v843_v0  ;;  %v800_v6 = vld [vmem:[%s1169_s0 + $0x84] ss:$8 sps:$4 sm:$0xff]   ;;  %v793_v10 = vld [vmem:[%s1168_s1 + $0x38] sm:$0xff]   ;;  %v795_v12 = vld [vmem:[%s1169_s0] ss:$8 sps:$4 sm:$0xff]  }
   0x4   :  { %687 = vmatprep.mubr.msk.bf16.mxu0 %vm270_vm0, %v797_v5  ;;  %695 = vmatprep.mubr.msk.bf16.mxu1 %vm270_vm0, %v800_v6  ;;  %v790_v7 = vld [vmem:[%s1168_s1 + $0x20] sm:$0xff]   ;;  %v791_v8 = vld [vmem:[%s1168_s1 + $0x28] sm:$0xff]   ;;  %v801_v14 = vld [vmem:[%s1169_s0 + $0x14] ss:$8 sps:$4 sm:$0xff]  }
   0x5   :  { %v794_v11 = vld [vmem:[%s1168_s1 + $0x40] sm:$0xff]   ;;  %v803_v15 = vld [vmem:[%s1169_s0 + $0x94] ss:$8 sps:$4 sm:$0xff]   ;;  %v805_v16 = vld [vmem:[%s1169_s0 + $0x10] ss:$8 sps:$4 sm:$0xff]  }
   0x6   :  { %322 = vmatpush1.bf16.msra.mxu0 %v787_v2  ;;  %777 = vmatpush1.bf16.msra.mxu1 %v787_v2  ;;  %v798_v13 = vld [vmem:[%s1169_s0 + $0x80] ss:$8 sps:$4 sm:$0xff]   ;;  %v806_v17 = vld [vmem:[%s1169_s0 + $0x90] ss:$8 sps:$4 sm:$0xff]   ;;  %v807_v18 = vld [vmem:[%s1169_s0 + $0x24] ss:$8 sps:$4 sm:$0xff]  }
   0x7   :  { %323 = vmatprep.subr.bf16.mxu0 %v843_v0  ;;  %769 = vmatprep.subr.bf16.mxu1 %v843_v0  ;;  %v809_v19 = vld [vmem:[%s1169_s0 + $0xa4] ss:$8 sps:$4 sm:$0xff]   ;;  %v811_v20 = vld [vmem:[%s1169_s0 + $0x20] ss:$8 sps:$4 sm:$0xff]   ;;  %v813_v22 = vld [vmem:[%s1169_s0 + $0x34] ss:$8 sps:$4 sm:$0xff]  }
   0x8   :  { %v812_v21 = vld [vmem:[%s1169_s0 + $0xa0] ss:$8 sps:$4 sm:$0xff]   ;;  %v815_v23 = vld [vmem:[%s1169_s0 + $0xb4] ss:$8 sps:$4 sm:$0xff]   ;;  %v817_v24 = vld [vmem:[%s1169_s0 + $0x30] ss:$8 sps:$4 sm:$0xff]  }
   0x9   :  { %v818_v25 = vld [vmem:[%s1169_s0 + $0xb0] ss:$8 sps:$4 sm:$0xff]   ;;  %v819_v26 = vld [vmem:[%s1169_s0 + $0x44] ss:$8 sps:$4 sm:$0xff]   ;;  %v823_v28 = vld [vmem:[%s1169_s0 + $0x40] ss:$8 sps:$4 sm:$0xff]  }
   0xa   :  { %324 = vmatpush1.bf16.msra.mxu0 %v788_v3  ;;  %778 = vmatpush1.bf16.msra.mxu1 %v788_v3  ;;  %v821_v27 = vld [vmem:[%s1169_s0 + $0xc4] ss:$8 sps:$4 sm:$0xff]   ;;  %v824_v29 = vld [vmem:[%s1169_s0 + $0xc0] ss:$8 sps:$4 sm:$0xff]   ;;  %v825_v30 = vld [vmem:[%s1169_s0 + $0x54] ss:$8 sps:$4 sm:$0xff]  }
   0xb   :  { %325 = vmatprep.subr.bf16.mxu0 %v843_v0  ;;  %770 = vmatprep.subr.bf16.mxu1 %v843_v0  ;;  %v827_v31 = vld [vmem:[%s1169_s0 + $0xd4] ss:$8 sps:$4 sm:$0xff]   ;;  %v829_v32 = vld [vmem:[%s1169_s0 + $0x50] ss:$8 sps:$4 sm:$0xff]   ;;  %v831_v34 = vld [vmem:[%s1169_s0 + $0x64] ss:$8 sps:$4 sm:$0xff]  }
   0xc   :  { %v830_v33 = vld [vmem:[%s1169_s0 + $0xd0] ss:$8 sps:$4 sm:$0xff]   ;;  %v833_v35 = vld [vmem:[%s1169_s0 + $0xe4] ss:$8 sps:$4 sm:$0xff]   ;;  %v835_v36 = vld [vmem:[%s1169_s0 + $0x60] ss:$8 sps:$4 sm:$0xff]  }
   0xd   :  { %v836_v37 = vld [vmem:[%s1169_s0 + $0xe0] ss:$8 sps:$4 sm:$0xff]   ;;  %v837_v38 = vld [vmem:[%s1169_s0 + $0x74] ss:$8 sps:$4 sm:$0xff]   ;;  %v841_v40 = vld [vmem:[%s1169_s0 + $0x70] ss:$8 sps:$4 sm:$0xff]  }
   0xe   :  { %326 = vmatpush1.bf16.msra.mxu0 %v789_v4  ;;  %779 = vmatpush1.bf16.msra.mxu1 %v789_v4  ;;  %v839_v39 = vld [vmem:[%s1169_s0 + $0xf4] ss:$8 sps:$4 sm:$0xff]   ;;  %v842_v41 = vld [vmem:[%s1169_s0 + $0xf0] ss:$8 sps:$4 sm:$0xff]   ;;  %v1006_v42 = vld [vmem:[%s1170_s2] ss:$0 sm:$0xff] }
   0xf   :  { %327 = vmatprep.subr.bf16.mxu0 %v843_v0  ;;  %771 = vmatprep.subr.bf16.mxu1 %v843_v0 }
  0x12   :  { %328 = vmatpush1.bf16.msra.mxu0 %v790_v7  ;;  %780 = vmatpush1.bf16.msra.mxu1 %v790_v7 }
  0x13   :  { %329 = vmatprep.subr.bf16.mxu0 %v843_v0  ;;  %772 = vmatprep.subr.bf16.mxu1 %v843_v0 }
  0x16   :  { %330 = vmatpush1.bf16.msra.mxu0 %v791_v8  ;;  %781 = vmatpush1.bf16.msra.mxu1 %v791_v8 }
  0x17   :  { %331 = vmatprep.subr.bf16.mxu0 %v843_v0  ;;  %773 = vmatprep.subr.bf16.mxu1 %v843_v0 }
  0x1a   :  { %332 = vmatpush1.bf16.msra.mxu0 %v792_v9  ;;  %782 = vmatpush1.bf16.msra.mxu1 %v792_v9 }
  0x1b   :  { %333 = vmatprep.subr.bf16.mxu0 %v843_v0  ;;  %774 = vmatprep.subr.bf16.mxu1 %v843_v0 }
  0x1e   :  { %334 = vmatpush1.bf16.msra.mxu0 %v793_v10  ;;  %783 = vmatpush1.bf16.msra.mxu1 %v793_v10 }
  0x1f   :  { %335 = vmatprep.subr.bf16.mxu0 %v843_v0  ;;  %775 = vmatprep.subr.bf16.mxu1 %v843_v0 }
  0x22   :  { %336 = vmatpush1.bf16.msra.mxu0 %v794_v11  ;;  %784 = vmatpush1.bf16.msra.mxu1 %v794_v11 }
  0x25   :  { %352 = vmatmul.mubr.bf16.vlgmr.msra.gmra.mrb[0].mxu0 %v795_v12  ;;  %416 = vmatmul.mubr.bf16.vlgmr.msra.gmra.mrb[0].mxu1 %v798_v13 }
  0x26   :  { %688 = vmatprep.mubr.msk.bf16.mxu0 %vm270_vm0, %v801_v14  ;;  %696 = vmatprep.mubr.msk.bf16.mxu1 %vm270_vm0, %v803_v15 }
  0x2d   :  { %360 = vmatmul.mubr.bf16.gmra.mrb[4].mxu0 %v805_v16  ;;  %424 = vmatmul.mubr.bf16.gmra.mrb[4].mxu1 %v806_v17 }
  0x2e   :  { %689 = vmatprep.mubr.msk.bf16.mxu0 %vm270_vm0, %v807_v18  ;;  %697 = vmatprep.mubr.msk.bf16.mxu1 %vm270_vm0, %v809_v19 }
  0x35   :  { %368 = vmatmul.mubr.bf16.gmra.mrb[8].mxu0 %v811_v20  ;;  %432 = vmatmul.mubr.bf16.gmra.mrb[8].mxu1 %v812_v21 }
  0x36   :  { %690 = vmatprep.mubr.msk.bf16.mxu0 %vm270_vm0, %v813_v22  ;;  %698 = vmatprep.mubr.msk.bf16.mxu1 %vm270_vm0, %v815_v23 }
  0x3d   :  { %376 = vmatmul.mubr.bf16.gmra.mrb[12].mxu0 %v817_v24  ;;  %440 = vmatmul.mubr.bf16.gmra.mrb[12].mxu1 %v818_v25 }
  0x3e   :  { %691 = vmatprep.mubr.msk.bf16.mxu0 %vm270_vm0, %v819_v26  ;;  %699 = vmatprep.mubr.msk.bf16.mxu1 %vm270_vm0, %v821_v27 }
  0x45   :  { %384 = vmatmul.mubr.bf16.gmra.mrb[16].mxu0 %v823_v28  ;;  %448 = vmatmul.mubr.bf16.gmra.mrb[16].mxu1 %v824_v29 }
  0x46   :  { %692 = vmatprep.mubr.msk.bf16.mxu0 %vm270_vm0, %v825_v30  ;;  %700 = vmatprep.mubr.msk.bf16.mxu1 %vm270_vm0, %v827_v31 }
  0x4d   :  { %392 = vmatmul.mubr.bf16.gmra.mrb[20].mxu0 %v829_v32  ;;  %456 = vmatmul.mubr.bf16.gmra.mrb[20].mxu1 %v830_v33 }
  0x4e   :  { %693 = vmatprep.mubr.msk.bf16.mxu0 %vm270_vm0, %v831_v34  ;;  %701 = vmatprep.mubr.msk.bf16.mxu1 %vm270_vm0, %v833_v35 }
  0x55   :  { %400 = vmatmul.mubr.bf16.gmra.mrb[24].mxu0 %v835_v36  ;;  %464 = vmatmul.mubr.bf16.gmra.mrb[24].mxu1 %v836_v37 }
  0x56   :  { %694 = vmatprep.mubr.msk.bf16.mxu0 %vm270_vm0, %v837_v38  ;;  %702 = vmatprep.mubr.msk.bf16.mxu1 %vm270_vm0, %v839_v39 }
  0x5d   :  { %408 = vmatmul.mubr.bf16.gmra.mrb[28].mxu0 %v841_v40  ;;  %472 = vmatmul.mubr.bf16.gmra.mrb[28].mxu1 %v842_v41 }
  0xf8   :  { %v353_v43 = vpop.f32.mrb[0].mxu0  ;;  %v417_v44 = vpop.f32.mrb[0].mxu1 }
  0xf9   :  { %v354_v45 = vadd.f32 %v1006_v42, %v353_v43  ;;  %v418_v46 = vadd.f32 %v1006_v42, %v417_v44  ;;  %v355_v47 = vpop.f32.mrb[1].mxu0  ;;  %v419_v48 = vpop.f32.mrb[1].mxu1 }
  0xfa   :  { %v356_v49 = vpop.f32.mrb[2].mxu0  ;;  %v420_v50 = vpop.f32.mrb[2].mxu1 }
  0xfb   :  { %v735_v51 = vpack.c.bf16 %v354_v45, %v354_v45  ;;  %v751_v52 = vpack.c.bf16 %v418_v46, %v418_v46  ;;  %v357_v53 = vadd.f32 %v1006_v42, %v356_v49  ;;  %v421_v54 = vadd.f32 %v1006_v42, %v420_v50  ;;  %v358_v55 = vpop.f32.mrb[3].mxu0  ;;  %v422_v56 = vpop.f32.mrb[3].mxu1 }
  0xfd   :  { %609 = vst.msk [vmem:[%s1171_s3] sm:$0xf] %vm608_vm1, %v735_v51  ;;  %625 = vst.msk [vmem:[%s1171_s3 + $0x40] sm:$0xf] %vm608_vm1, %v751_v52  ;;  %v736_v57 = vpack.c.bf16 %v357_v53, %v357_v53  ;;  %v752_v58 = vpack.c.bf16 %v421_v54, %v421_v54 }
  0xff   :  { %610 = vst.msk [vmem:[%s1171_s3 + $0x4] sm:$0xf] %vm608_vm1, %v736_v57  ;;  %626 = vst.msk [vmem:[%s1171_s3 + $0x44] sm:$0xf] %vm608_vm1, %v752_v58 }
 0x100   :  { %v361_v59 = vpop.f32.mrb[4].mxu0  ;;  %v425_v60 = vpop.f32.mrb[4].mxu1 }
 0x101   :  { %v362_v61 = vadd.f32 %v1006_v42, %v361_v59  ;;  %v426_v62 = vadd.f32 %v1006_v42, %v425_v60  ;;  %v363_v63 = vpop.f32.mrb[5].mxu0  ;;  %v427_v0 = vpop.f32.mrb[5].mxu1 }
 0x102   :  { %v364_v1 = vpop.f32.mrb[6].mxu0  ;;  %v428_v2 = vpop.f32.mrb[6].mxu1 }
 0x103   :  { %v737_v3 = vpack.c.bf16 %v362_v61, %v362_v61  ;;  %v753_v4 = vpack.c.bf16 %v426_v62, %v426_v62  ;;  %v365_v5 = vadd.f32 %v1006_v42, %v364_v1  ;;  %v429_v6 = vadd.f32 %v1006_v42, %v428_v2  ;;  %v366_v7 = vpop.f32.mrb[7].mxu0  ;;  %v430_v8 = vpop.f32.mrb[7].mxu1 }
 0x105   :  { %611 = vst.msk [vmem:[%s1171_s3 + $0x8] sm:$0xf] %vm608_vm1, %v737_v3  ;;  %627 = vst.msk [vmem:[%s1171_s3 + $0x48] sm:$0xf] %vm608_vm1, %v753_v4  ;;  %v738_v9 = vpack.c.bf16 %v365_v5, %v365_v5  ;;  %v754_v10 = vpack.c.bf16 %v429_v6, %v429_v6 }
 0x107   :  { %612 = vst.msk [vmem:[%s1171_s3 + $0xc] sm:$0xf] %vm608_vm1, %v738_v9  ;;  %628 = vst.msk [vmem:[%s1171_s3 + $0x4c] sm:$0xf] %vm608_vm1, %v754_v10 }
 0x108   :  { %v369_v11 = vpop.f32.mrb[8].mxu0  ;;  %v433_v12 = vpop.f32.mrb[8].mxu1 }
 0x109   :  { %v370_v13 = vadd.f32 %v1006_v42, %v369_v11  ;;  %v434_v14 = vadd.f32 %v1006_v42, %v433_v12  ;;  %v371_v15 = vpop.f32.mrb[9].mxu0  ;;  %v435_v16 = vpop.f32.mrb[9].mxu1 }
 0x10a   :  { %v372_v17 = vpop.f32.mrb[10].mxu0  ;;  %v436_v18 = vpop.f32.mrb[10].mxu1 }
 0x10b   :  { %v739_v19 = vpack.c.bf16 %v370_v13, %v370_v13  ;;  %v755_v20 = vpack.c.bf16 %v434_v14, %v434_v14  ;;  %v373_v21 = vadd.f32 %v1006_v42, %v372_v17  ;;  %v437_v22 = vadd.f32 %v1006_v42, %v436_v18  ;;  %v374_v23 = vpop.f32.mrb[11].mxu0  ;;  %v438_v24 = vpop.f32.mrb[11].mxu1 }
 0x10d   :  { %613 = vst.msk [vmem:[%s1171_s3 + $0x10] sm:$0xf] %vm608_vm1, %v739_v19  ;;  %629 = vst.msk [vmem:[%s1171_s3 + $0x50] sm:$0xf] %vm608_vm1, %v755_v20  ;;  %v740_v25 = vpack.c.bf16 %v373_v21, %v373_v21  ;;  %v756_v26 = vpack.c.bf16 %v437_v22, %v437_v22 }
 0x10f   :  { %614 = vst.msk [vmem:[%s1171_s3 + $0x14] sm:$0xf] %vm608_vm1, %v740_v25  ;;  %630 = vst.msk [vmem:[%s1171_s3 + $0x54] sm:$0xf] %vm608_vm1, %v756_v26 }
 0x110   :  { %v377_v27 = vpop.f32.mrb[12].mxu0  ;;  %v441_v28 = vpop.f32.mrb[12].mxu1 }
 0x111   :  { %v378_v29 = vadd.f32 %v1006_v42, %v377_v27  ;;  %v442_v30 = vadd.f32 %v1006_v42, %v441_v28  ;;  %v379_v31 = vpop.f32.mrb[13].mxu0  ;;  %v443_v32 = vpop.f32.mrb[13].mxu1 }
 0x112   :  { %v380_v33 = vpop.f32.mrb[14].mxu0  ;;  %v444_v34 = vpop.f32.mrb[14].mxu1 }
 0x113   :  { %v741_v35 = vpack.c.bf16 %v378_v29, %v378_v29  ;;  %v757_v36 = vpack.c.bf16 %v442_v30, %v442_v30  ;;  %v381_v37 = vadd.f32 %v1006_v42, %v380_v33  ;;  %v445_v38 = vadd.f32 %v1006_v42, %v444_v34  ;;  %v382_v39 = vpop.f32.mrb[15].mxu0  ;;  %v446_v40 = vpop.f32.mrb[15].mxu1 }
 0x115   :  { %615 = vst.msk [vmem:[%s1171_s3 + $0x18] sm:$0xf] %vm608_vm1, %v741_v35  ;;  %631 = vst.msk [vmem:[%s1171_s3 + $0x58] sm:$0xf] %vm608_vm1, %v757_v36  ;;  %v742_v41 = vpack.c.bf16 %v381_v37, %v381_v37  ;;  %v758_v43 = vpack.c.bf16 %v445_v38, %v445_v38 }
 0x117   :  { %616 = vst.msk [vmem:[%s1171_s3 + $0x1c] sm:$0xf] %vm608_vm1, %v742_v41  ;;  %632 = vst.msk [vmem:[%s1171_s3 + $0x5c] sm:$0xf] %vm608_vm1, %v758_v43 }
 0x118   :  { %v385_v44 = vpop.f32.mrb[16].mxu0  ;;  %v449_v45 = vpop.f32.mrb[16].mxu1 }
 0x119   :  { %v386_v46 = vadd.f32 %v1006_v42, %v385_v44  ;;  %v450_v47 = vadd.f32 %v1006_v42, %v449_v45  ;;  %v387_v48 = vpop.f32.mrb[17].mxu0  ;;  %v451_v49 = vpop.f32.mrb[17].mxu1 }
 0x11a   :  { %v388_v50 = vpop.f32.mrb[18].mxu0  ;;  %v452_v51 = vpop.f32.mrb[18].mxu1 }
 0x11b   :  { %v743_v52 = vpack.c.bf16 %v386_v46, %v386_v46  ;;  %v759_v53 = vpack.c.bf16 %v450_v47, %v450_v47  ;;  %v389_v54 = vadd.f32 %v1006_v42, %v388_v50  ;;  %v453_v55 = vadd.f32 %v1006_v42, %v452_v51  ;;  %v390_v56 = vpop.f32.mrb[19].mxu0  ;;  %v454_v57 = vpop.f32.mrb[19].mxu1 }
 0x11d   :  { %617 = vst.msk [vmem:[%s1171_s3 + $0x20] sm:$0xf] %vm608_vm1, %v743_v52  ;;  %633 = vst.msk [vmem:[%s1171_s3 + $0x60] sm:$0xf] %vm608_vm1, %v759_v53  ;;  %v744_v58 = vpack.c.bf16 %v389_v54, %v389_v54  ;;  %v760_v59 = vpack.c.bf16 %v453_v55, %v453_v55 }
 0x11f   :  { %618 = vst.msk [vmem:[%s1171_s3 + $0x24] sm:$0xf] %vm608_vm1, %v744_v58  ;;  %634 = vst.msk [vmem:[%s1171_s3 + $0x64] sm:$0xf] %vm608_vm1, %v760_v59 }
 0x120   :  { %v393_v60 = vpop.f32.mrb[20].mxu0  ;;  %v457_v61 = vpop.f32.mrb[20].mxu1 }
 0x121   :  { %v394_v62 = vadd.f32 %v1006_v42, %v393_v60  ;;  %v458_v63 = vadd.f32 %v1006_v42, %v457_v61  ;;  %v395_v0 = vpop.f32.mrb[21].mxu0  ;;  %v459_v1 = vpop.f32.mrb[21].mxu1 }
 0x122   :  { %v396_v2 = vpop.f32.mrb[22].mxu0  ;;  %v460_v3 = vpop.f32.mrb[22].mxu1 }
 0x123   :  { %v745_v4 = vpack.c.bf16 %v394_v62, %v394_v62  ;;  %v761_v5 = vpack.c.bf16 %v458_v63, %v458_v63  ;;  %v397_v6 = vadd.f32 %v1006_v42, %v396_v2  ;;  %v461_v7 = vadd.f32 %v1006_v42, %v460_v3  ;;  %v398_v8 = vpop.f32.mrb[23].mxu0  ;;  %v462_v9 = vpop.f32.mrb[23].mxu1 }
 0x125   :  { %619 = vst.msk [vmem:[%s1171_s3 + $0x28] sm:$0xf] %vm608_vm1, %v745_v4  ;;  %635 = vst.msk [vmem:[%s1171_s3 + $0x68] sm:$0xf] %vm608_vm1, %v761_v5  ;;  %v746_v10 = vpack.c.bf16 %v397_v6, %v397_v6  ;;  %v762_v11 = vpack.c.bf16 %v461_v7, %v461_v7 }
 0x127   :  { %620 = vst.msk [vmem:[%s1171_s3 + $0x2c] sm:$0xf] %vm608_vm1, %v746_v10  ;;  %636 = vst.msk [vmem:[%s1171_s3 + $0x6c] sm:$0xf] %vm608_vm1, %v762_v11 }
 0x128   :  { %v401_v12 = vpop.f32.mrb[24].mxu0  ;;  %v465_v13 = vpop.f32.mrb[24].mxu1 }
 0x129   :  { %v402_v14 = vadd.f32 %v1006_v42, %v401_v12  ;;  %v466_v15 = vadd.f32 %v1006_v42, %v465_v13  ;;  %v403_v16 = vpop.f32.mrb[25].mxu0  ;;  %v467_v17 = vpop.f32.mrb[25].mxu1 }
 0x12a   :  { %v404_v18 = vpop.f32.mrb[26].mxu0  ;;  %v468_v19 = vpop.f32.mrb[26].mxu1 }
 0x12b   :  { %v747_v20 = vpack.c.bf16 %v402_v14, %v402_v14  ;;  %v763_v21 = vpack.c.bf16 %v466_v15, %v466_v15  ;;  %v405_v22 = vadd.f32 %v1006_v42, %v404_v18  ;;  %v469_v23 = vadd.f32 %v1006_v42, %v468_v19  ;;  %v406_v24 = vpop.f32.mrb[27].mxu0  ;;  %v470_v25 = vpop.f32.mrb[27].mxu1 }
 0x12d   :  { %621 = vst.msk [vmem:[%s1171_s3 + $0x30] sm:$0xf] %vm608_vm1, %v747_v20  ;;  %637 = vst.msk [vmem:[%s1171_s3 + $0x70] sm:$0xf] %vm608_vm1, %v763_v21  ;;  %v748_v26 = vpack.c.bf16 %v405_v22, %v405_v22  ;;  %v764_v27 = vpack.c.bf16 %v469_v23, %v469_v23 }
 0x12f   :  { %622 = vst.msk [vmem:[%s1171_s3 + $0x34] sm:$0xf] %vm608_vm1, %v748_v26  ;;  %638 = vst.msk [vmem:[%s1171_s3 + $0x74] sm:$0xf] %vm608_vm1, %v764_v27 }
 0x130   :  { %v409_v28 = vpop.f32.mrb[28].mxu0  ;;  %v473_v29 = vpop.f32.mrb[28].mxu1 }
 0x131   :  { %v410_v30 = vadd.f32 %v1006_v42, %v409_v28  ;;  %v474_v31 = vadd.f32 %v1006_v42, %v473_v29  ;;  %v411_v32 = vpop.f32.mrb[29].mxu0  ;;  %v475_v33 = vpop.f32.mrb[29].mxu1 }
 0x132   :  { %v412_v34 = vpop.f32.mrb[30].mxu0  ;;  %v476_v35 = vpop.f32.mrb[30].mxu1 }
 0x133   :  { %v749_v36 = vpack.c.bf16 %v410_v30, %v410_v30  ;;  %v765_v37 = vpack.c.bf16 %v474_v31, %v474_v31  ;;  %v413_v38 = vadd.f32 %v1006_v42, %v412_v34  ;;  %v477_v39 = vadd.f32 %v1006_v42, %v476_v35  ;;  %v414_v40 = vpop.f32.mrb[31].mxu0  ;;  %v478_v41 = vpop.f32.mrb[31].mxu1 }
 0x135   :  { %623 = vst.msk [vmem:[%s1171_s3 + $0x38] sm:$0xf] %vm608_vm1, %v749_v36  ;;  %639 = vst.msk [vmem:[%s1171_s3 + $0x78] sm:$0xf] %vm608_vm1, %v765_v37  ;;  %v750_v43 = vpack.c.bf16 %v413_v38, %v413_v38  ;;  %v766_v44 = vpack.c.bf16 %v477_v39, %v477_v39 }
 0x137   :  { %624 = vst.msk [vmem:[%s1171_s3 + $0x3c] sm:$0xf] %vm608_vm1, %v750_v43  ;;  %640 = vst.msk [vmem:[%s1171_s3 + $0x7c] sm:$0xf] %vm608_vm1, %v766_v44 }

// kernel: breast_cancer_net_forward.6
= control target key start
LH: loop header
LB: loop body
LE: loop exit
PB: predicated region body
PF: predicated region fallthrough
CT: control target
= control target key end

     0   :  { %vm242_vm0 = vcmask 261120   ;;  %vm417_vm1 = vcmask 519168   ;;  %s738_s1 = inlined_call_operand.vmem [shape: bf16[288,64], index: 1, kind: input, shape index: {}]   ;;  %s739_s0 = inlined_call_operand.vmem [shape: bf16[64,288], index: 0, kind: input, shape index: {}]   ;;  %s740_s2 = inlined_call_operand.vmem [shape: f32[1,64], index: 2, kind: input, shape index: {}]   ;;  %s741_s3 = inlined_call_operand.vmem [shape: bf16[64,64], index: 3, kind: output, shape index: {}]  }
   0x1   :  { %v555_v0 = vld [vmem:[%s738_s1 + $0x40] sm:$0xff]   ;;  %v557_v2 = vld [vmem:[%s738_s1 + $0x48] sm:$0xff]   ;;  %v559_v4 = vld [vmem:[%s738_s1 + $0x50] sm:$0xff]  }
   0x2   :  { %v556_v1 = vld [vmem:[%s738_s1] sm:$0xff]   ;;  %481 = vmatprep.subr.bf16.mxu0 %v555_v0  ;;  %539 = vmatprep.subr.bf16.mxu1 %v555_v0  ;;  %v558_v3 = vld [vmem:[%s738_s1 + $0x8] sm:$0xff]   ;;  %v560_v5 = vld [vmem:[%s738_s1 + $0x10] sm:$0xff]  }
   0x3   :  { %482 = vmatpush3.bf16.msra.mxu0 %v556_v1  ;;  %547 = vmatpush3.bf16.msra.mxu1 %v556_v1  ;;  %v561_v6 = vld [vmem:[%s738_s1 + $0x58] sm:$0xff]   ;;  %v563_v8 = vld [vmem:[%s738_s1 + $0x60] sm:$0xff]   ;;  %v565_v10 = vld [vmem:[%s738_s1 + $0x68] sm:$0xff]  }
   0x4   :  { %483 = vmatprep.subr.bf16.mxu0 %v557_v2  ;;  %540 = vmatprep.subr.bf16.mxu1 %v557_v2  ;;  %v562_v7 = vld [vmem:[%s738_s1 + $0x18] sm:$0xff]   ;;  %v564_v9 = vld [vmem:[%s738_s1 + $0x20] sm:$0xff]   ;;  %v566_v13 = vld [vmem:[%s738_s1 + $0x28] sm:$0xff]  }
   0x5   :  { %v573_v11 = vld [vmem:[%s739_s0 + $0x4] ss:$12 sps:$4 sm:$0xff]   ;;  %v576_v12 = vld [vmem:[%s739_s0 + $0x4c] ss:$12 sps:$4 sm:$0xff]   ;;  %v574_v20 = vld [vmem:[%s739_s0 + $0x48] ss:$12 sps:$4 sm:$0xff]  }
   0x6   :  { %v567_v14 = vld [vmem:[%s738_s1 + $0x70] sm:$0xff]   ;;  %287 = vmatprep.mubr.bf16.mxu0 %v573_v11  ;;  %311 = vmatprep.mubr.bf16.mxu1 %v576_v12  ;;  %v569_v16 = vld [vmem:[%s738_s1 + $0x78] sm:$0xff]   ;;  %v577_v18 = vld [vmem:[%s738_s1 + $0x80] sm:$0xff]  }
   0x7   :  { %484 = vmatpush3.bf16.msra.mxu0 %v558_v3  ;;  %548 = vmatpush3.bf16.msra.mxu1 %v558_v3  ;;  %v568_v15 = vld [vmem:[%s738_s1 + $0x30] sm:$0xff]   ;;  %v570_v17 = vld [vmem:[%s738_s1 + $0x38] sm:$0xff]   ;;  %v571_v19 = vld [vmem:[%s739_s0] ss:$12 sps:$4 sm:$0xff]  }
   0x8   :  { %485 = vmatprep.subr.bf16.mxu0 %v559_v4  ;;  %541 = vmatprep.subr.bf16.mxu1 %v559_v4  ;;  %v579_v21 = vld [vmem:[%s739_s0 + $0x1c] ss:$12 sps:$4 sm:$0xff]   ;;  %v582_v24 = vld [vmem:[%s739_s0 + $0x18] ss:$12 sps:$4 sm:$0xff]   ;;  %v583_v25 = vld [vmem:[%s739_s0 + $0x20] ss:$12 sps:$4 sm:$0xff]  }
   0x9   :  { %v578_v22 = vld [vmem:[%s738_s1 + $0x88] sm:$0xff]   ;;  %v584_v26 = vld [vmem:[%s739_s0 + $0x34] ss:$12 sps:$4 sm:$0xff]   ;;  %v586_v27 = vld [vmem:[%s739_s0 + $0x38] ss:$12 sps:$4 sm:$0xff]  }
   0xa   :  { %v581_v23 = vld [vmem:[%s739_s0 + $0x8] ss:$12 sps:$4 sm:$0xff]   ;;  %v587_v28 = vld [vmem:[%s739_s0 + $0x30] ss:$12 sps:$4 sm:$0xff]   ;;  %v430_v42 = vld [vmem:[%s740_s2] ss:$0 sm:$0xff] }
   0xb   :  { %486 = vmatpush3.bf16.msra.mxu0 %v560_v5  ;;  %549 = vmatpush3.bf16.msra.mxu1 %v560_v5  ;;  %v588_v29 = vld [vmem:[%s739_s0 + $0x50] ss:$12 sps:$4 sm:$0xff]  }
   0xc   :  { %487 = vmatprep.subr.bf16.mxu0 %v561_v6  ;;  %542 = vmatprep.subr.bf16.mxu1 %v561_v6 }
   0xf   :  { %488 = vmatpush3.bf16.msra.mxu0 %v562_v7  ;;  %550 = vmatpush3.bf16.msra.mxu1 %v562_v7 }
  0x10   :  { %489 = vmatprep.subr.bf16.mxu0 %v563_v8  ;;  %543 = vmatprep.subr.bf16.mxu1 %v563_v8 }
  0x13   :  { %490 = vmatpush3.bf16.msra.mxu0 %v564_v9  ;;  %551 = vmatpush3.bf16.msra.mxu1 %v564_v9 }
  0x14   :  { %491 = vmatprep.subr.bf16.mxu0 %v565_v10  ;;  %544 = vmatprep.subr.bf16.mxu1 %v565_v10 }
  0x17   :  { %492 = vmatpush3.bf16.msra.mxu0 %v566_v13  ;;  %552 = vmatpush3.bf16.msra.mxu1 %v566_v13 }
  0x18   :  { %493 = vmatprep.subr.bf16.mxu0 %v567_v14  ;;  %545 = vmatprep.subr.bf16.mxu1 %v567_v14 }
  0x1b   :  { %494 = vmatpush3.bf16.msra.mxu0 %v568_v15  ;;  %553 = vmatpush3.bf16.msra.mxu1 %v568_v15 }
  0x1c   :  { %495 = vmatprep.subr.bf16.mxu0 %v569_v16  ;;  %546 = vmatprep.subr.bf16.mxu1 %v569_v16 }
  0x1f   :  { %496 = vmatpush3.bf16.msra.mxu0 %v570_v17  ;;  %554 = vmatpush3.bf16.msra.mxu1 %v570_v17 }
  0x20   :  { %527 = vmatprep.subr.bf16.mxu1 %v577_v18 }
  0x22   :  { %288 = vmatmul.mubr.bf16.vlgmr.msra.gmra.mrb[0].mxu0 %v571_v19  ;;  %312 = vmatmul.mubr.bf16.vlgmr.msra.gmra.mrb[0].mxu1 %v574_v20 }
  0x23   :  { %528 = vmatpush3.bf16.msra.mxu1 %v577_v18  ;;  %295 = vmatprep.mubr.bf16.mxu0 %v579_v21 }
  0x24   :  { %529 = vmatprep.subr.bf16.mxu1 %v578_v22  ;;  %531 = vmatprep.mubr.msk.bf16.mxu1 %vm242_vm0, %v581_v23 }
  0x27   :  { %530 = vmatpush3.bf16.msra.mxu1 %v578_v22 }
  0x2a   :  { %296 = vmatmul.mubr.bf16.gmra.mrb[4].mxu0 %v582_v24  ;;  %532 = vmatmul.mubr.msk.bf16.vlgmr.msra.gmra.mrb[4].mxu1 %vm242_vm0, %v583_v25 }
  0x2b   :  { %303 = vmatprep.mubr.bf16.mxu0 %v584_v26  ;;  %535 = vmatprep.mubr.msk.bf16.mxu1 %vm242_vm0, %v586_v27 }
  0x32   :  { %304 = vmatmul.mubr.bf16.gmra.mrb[8].mxu0 %v587_v28  ;;  %536 = vmatmul.mubr.msk.bf16.gmra.mrb[8].mxu1 %vm242_vm0, %v588_v29 }
  0xf5   :  { %v497_v30 = vpop.f32.mrb[0].mxu0  ;;  %v515_v31 = vpop.f32.mrb[0].mxu1 }
  0xf6   :  { %v498_v32 = vpop.f32.mrb[1].mxu0  ;;  %v516_v33 = vpop.f32.mrb[1].mxu1 }
  0xf7   :  { %v499_v34 = vadd.f32 %v498_v32, %v497_v30  ;;  %v500_v35 = vpop.f32.mrb[2].mxu0  ;;  %v517_v36 = vadd.f32 %v516_v33, %v515_v31  ;;  %v518_v37 = vpop.f32.mrb[2].mxu1 }
  0xf8   :  { %v501_v38 = vpop.f32.mrb[3].mxu0  ;;  %v519_v39 = vpop.f32.mrb[3].mxu1 }
  0xf9   :  { %v502_v40 = vadd.f32 %v501_v38, %v500_v35  ;;  %v520_v41 = vadd.f32 %v519_v39, %v518_v37  ;;  %v290_v45 = vadd.f32 %v499_v34, %v430_v42  ;;  %v314_v62 = vadd.f32 %v517_v36, %v430_v42 }
  0xfb   :  { %v293_v52 = vadd.f32 %v502_v40, %v430_v42  ;;  %v317_v6 = vadd.f32 %v520_v41, %v430_v42 }
  0xfd   :  { %v503_v43 = vpop.f32.mrb[4].mxu0  ;;  %v533_v44 = vpop.f32.mrb[4].mxu1 }
  0xfe   :  { %v504_v46 = vpop.f32.mrb[5].mxu0  ;;  %v354_v47 = vpop.f32.mrb[5].mxu1 }
  0xff   :  { %v505_v48 = vadd.f32 %v504_v46, %v503_v43  ;;  %v355_v49 = vadd.f32 %v354_v47, %v290_v45  ;;  %v506_v50 = vpop.f32.mrb[6].mxu0  ;;  %v534_v51 = vpop.f32.mrb[6].mxu1 }
 0x100   :  { %v507_v53 = vpop.f32.mrb[7].mxu0  ;;  %v357_v54 = vpop.f32.mrb[7].mxu1 }
 0x101   :  { %v298_v55 = vadd.f32 %v505_v48, %v430_v42  ;;  %v473_v56 = vpack.c.bf16 %v355_v49, %v355_v49  ;;  %v508_v57 = vadd.f32 %v507_v53, %v506_v50  ;;  %v358_v58 = vadd.f32 %v357_v54, %v293_v52 }
 0x103   :  { %v363_v59 = vadd.f32 %v533_v44, %v298_v55  ;;  %418 = vst.msk [vmem:[%s741_s3] sm:$0xf] %vm417_vm1, %v473_v56  ;;  %v301_v60 = vadd.f32 %v508_v57, %v430_v42  ;;  %v474_v61 = vpack.c.bf16 %v358_v58, %v358_v58 }
 0x105   :  { %v475_v63 = vpack.c.bf16 %v363_v59, %v363_v59  ;;  %v366_v0 = vadd.f32 %v534_v51, %v301_v60  ;;  %419 = vst.msk [vmem:[%s741_s3 + $0x4] sm:$0xf] %vm417_vm1, %v474_v61  ;;  %v509_v1 = vpop.f32.mrb[8].mxu0  ;;  %v537_v2 = vpop.f32.mrb[8].mxu1 }
 0x106   :  { %v379_v3 = vadd.f32 %v537_v2, %v314_v62  ;;  %v510_v4 = vpop.f32.mrb[9].mxu0  ;;  %v370_v5 = vpop.f32.mrb[9].mxu1 }
 0x107   :  { %420 = vst.msk [vmem:[%s741_s3 + $0x8] sm:$0xf] %vm417_vm1, %v475_v63  ;;  %v476_v7 = vpack.c.bf16 %v366_v0, %v366_v0  ;;  %v511_v8 = vadd.f32 %v510_v4, %v509_v1  ;;  %v512_v9 = vpop.f32.mrb[10].mxu0  ;;  %v538_v10 = vpop.f32.mrb[10].mxu1 }
 0x108   :  { %v479_v11 = vpack.c.bf16 %v379_v3, %v379_v3  ;;  %v382_v12 = vadd.f32 %v538_v10, %v317_v6  ;;  %v513_v13 = vpop.f32.mrb[11].mxu0  ;;  %v373_v14 = vpop.f32.mrb[11].mxu1 }
 0x109   :  { %421 = vst.msk [vmem:[%s741_s3 + $0xc] sm:$0xf] %vm417_vm1, %v476_v7  ;;  %v306_v15 = vadd.f32 %v511_v8, %v430_v42  ;;  %v514_v16 = vadd.f32 %v513_v13, %v512_v9 }
 0x10a   :  { %424 = vst.msk [vmem:[%s741_s3 + $0x18] sm:$0xf] %vm417_vm1, %v479_v11  ;;  %v480_v17 = vpack.c.bf16 %v382_v12, %v382_v12 }
 0x10b   :  { %v371_v18 = vadd.f32 %v370_v5, %v306_v15  ;;  %v309_v19 = vadd.f32 %v514_v16, %v430_v42 }
 0x10c   :  { %425 = vst.msk [vmem:[%s741_s3 + $0x1c] sm:$0xf] %vm417_vm1, %v480_v17 }
 0x10d   :  { %v477_v20 = vpack.c.bf16 %v371_v18, %v371_v18  ;;  %v374_v21 = vadd.f32 %v373_v14, %v309_v19 }
 0x10f   :  { %422 = vst.msk [vmem:[%s741_s3 + $0x10] sm:$0xf] %vm417_vm1, %v477_v20  ;;  %v478_v22 = vpack.c.bf16 %v374_v21, %v374_v21 }
 0x111   :  { %423 = vst.msk [vmem:[%s741_s3 + $0x14] sm:$0xf] %vm417_vm1, %v478_v22 }

// kernel: breast_cancer_net_forward.7
= control target key start
LH: loop header
LB: loop body
LE: loop exit
PB: predicated region body
PF: predicated region fallthrough
CT: control target
= control target key end

     0   :  { %v3608_v33 = vmov 0.0   ;;  %vm3609_vm0 = vmmov 0   ;;  %vm362_vm1 = vcmask 523264   ;;  %vm2497_vm2 = vcmask 7168   ;;  %s4757_s1 = inlined_call_operand.vmem [shape: bf16[576,64], index: 1, kind: input, shape index: {}]   ;;  %s4758_s0 = inlined_call_operand.vmem [shape: bf16[9,16,576], index: 0, kind: input, shape index: {}]   ;;  %s4759_s3 = inlined_call_operand.vmem [shape: bf16[576,64], index: 3, kind: input, shape index: {}]   ;;  %s4760_s2 = inlined_call_operand.vmem [shape: f32[1,64], index: 2, kind: input, shape index: {}]   ;;  %s4761_s4 = inlined_call_operand.vmem [shape: f32[1,64], index: 4, kind: input, shape index: {}]   ;;  %s4762_s5 = inlined_call_operand.vmem [shape: f32[1,64], index: 5, kind: input, shape index: {}]   ;;  %s4763_s6 = inlined_call_operand.<no memory space> [shape: f32[1,1], index: 6, kind: input, shape index: {}]   ;;  %s4764_s7 = inlined_call_operand.vmem [shape: f32[16,1], index: 7, kind: output, shape index: {}]  }
   0x1   :  { %v3653_v0 = vld [vmem:[%s4757_s1 + $0x40] sm:$0xff]   ;;  %v3676_v4 = vld [vmem:[%s4757_s1 + $0x48] sm:$0xff]   ;;  %v3700_v8 = vld [vmem:[%s4757_s1 + $0x50] sm:$0xff]  }
   0x2   :  { %v3658_v1 = vld [vmem:[%s4757_s1] sm:$0xff]   ;;  %2690 = vmatprep.subr.bf16.mxu0 %v3653_v0  ;;  %v3682_v5 = vld [vmem:[%s4757_s1 + $0x8] sm:$0xff]   ;;  %v3706_v9 = vld [vmem:[%s4757_s1 + $0x10] sm:$0xff]  }
   0x3   :  { %v3664_v2 = vld [vmem:[%s4757_s1 + $0xc0] sm:$0xff]   ;;  %2691 = vmatpush3.bf16.msra.mxu0 %v3658_v1  ;;  %v3688_v6 = vld [vmem:[%s4757_s1 + $0xc8] sm:$0xff]   ;;  %v3712_v10 = vld [vmem:[%s4757_s1 + $0xd0] sm:$0xff]  }
   0x4   :  { %v3670_v3 = vld [vmem:[%s4757_s1 + $0x80] sm:$0xff]   ;;  %2712 = vmatprep.subr.bf16.mxu1 %v3664_v2  ;;  %2692 = vmatprep.subr.bf16.mxu0 %v3676_v4  ;;  %v3694_v7 = vld [vmem:[%s4757_s1 + $0x88] sm:$0xff]   ;;  %v3718_v11 = vld [vmem:[%s4757_s1 + $0x90] sm:$0xff]  }
   0x5   :  { %2713 = vmatpush3.bf16.msra.mxu1 %v3670_v3  ;;  %v3724_v12 = vld [vmem:[%s4757_s1 + $0x58] sm:$0xff]   ;;  %v3748_v16 = vld [vmem:[%s4757_s1 + $0x60] sm:$0xff]   ;;  %v3772_v20 = vld [vmem:[%s4757_s1 + $0x68] sm:$0xff]  }
   0x6   :  { %2714 = vmatprep.subr.bf16.mxu1 %v3688_v6  ;;  %v3730_v13 = vld [vmem:[%s4757_s1 + $0x18] sm:$0xff]   ;;  %v3754_v17 = vld [vmem:[%s4757_s1 + $0x20] sm:$0xff]   ;;  %v3778_v21 = vld [vmem:[%s4757_s1 + $0x28] sm:$0xff]  }
   0x7   :  { %2693 = vmatpush3.bf16.msra.mxu0 %v3682_v5  ;;  %v3736_v14 = vld [vmem:[%s4757_s1 + $0xd8] sm:$0xff]   ;;  %v3760_v18 = vld [vmem:[%s4757_s1 + $0xe0] sm:$0xff]   ;;  %v3784_v22 = vld [vmem:[%s4757_s1 + $0xe8] sm:$0xff]  }
   0x8   :  { %2694 = vmatprep.subr.bf16.mxu0 %v3700_v8  ;;  %v3742_v15 = vld [vmem:[%s4757_s1 + $0x98] sm:$0xff]   ;;  %v3766_v19 = vld [vmem:[%s4757_s1 + $0xa0] sm:$0xff]   ;;  %v3790_v23 = vld [vmem:[%s4757_s1 + $0xa8] sm:$0xff]  }
   0x9   :  { %2715 = vmatpush3.bf16.msra.mxu1 %v3694_v7  ;;  %v3796_v24 = vld [vmem:[%s4757_s1 + $0x70] sm:$0xff]   ;;  %v3820_v28 = vld [vmem:[%s4757_s1 + $0x78] sm:$0xff]   ;;  %v3465_v36 = vld [vmem:[%s4758_s0 + $0xc] ss:$20 sps:$4 sm:$0xff]  }
   0xa   :  { %2716 = vmatprep.subr.bf16.mxu1 %v3712_v10  ;;  %v3802_v25 = vld [vmem:[%s4757_s1 + $0x30] sm:$0xff]   ;;  %v3826_v29 = vld [vmem:[%s4757_s1 + $0x38] sm:$0xff]   ;;  %v3858_v37 = vld [vmem:[%s4757_s1 + $0x100] sm:$0xff]   ;;  %439 = vmatprep.mubr.bf16.mxu1 %v3465_v36 }
   0xb   :  { %2695 = vmatpush3.bf16.msra.mxu0 %v3706_v9  ;;  %v3808_v26 = vld [vmem:[%s4757_s1 + $0xf0] sm:$0xff]   ;;  %v3832_v30 = vld [vmem:[%s4757_s1 + $0xf8] sm:$0xff]   ;;  %v3866_v38 = vld [vmem:[%s4757_s1 + $0x108] sm:$0xff]  }
   0xc   :  { %2696 = vmatprep.subr.bf16.mxu0 %v3724_v12  ;;  %v3814_v27 = vld [vmem:[%s4757_s1 + $0xb0] sm:$0xff]   ;;  %v3461_v32 = vld [vmem:[%s4758_s0 + $0x4] ss:$20 sps:$4 sm:$0xff]   ;;  %v3463_v35 = vld [vmem:[%s4758_s0 + $0x8] ss:$20 sps:$4 sm:$0xff]  }
   0xd   :  { %2717 = vmatpush3.bf16.msra.mxu1 %v3718_v11  ;;  %v3459_v31 = vld [vmem:[%s4758_s0] ss:$20 sps:$4 sm:$0xff]   ;;  %v3846_v34 = vld [vmem:[%s4757_s1 + $0xb8] sm:$0xff]   ;;  %398 = vmatprep.mubr.bf16.mxu0 %v3461_v32  ;;  %v3470_v41 = vld [vmem:[%s4758_s0 + $0x10] ss:$20 sps:$4 sm:$0xff]  }
   0xe   :  { %2718 = vmatprep.subr.bf16.mxu1 %v3736_v14  ;;  %v3873_v39 = vld [vmem:[%s4757_s1 + $0x110] sm:$0xff]   ;;  %v3882_v40 = vld [vmem:[%s4757_s1 + $0x118] sm:$0xff]   ;;  %v3471_v42 = vld [vmem:[%s4759_s3] sm:$0xff]  }
   0xf   :  { %2697 = vmatpush3.bf16.msra.mxu0 %v3730_v13  ;;  %v3472_v43 = vld [vmem:[%s4759_s3 + $0x8] sm:$0xff]   ;;  %v3473_v44 = vld [vmem:[%s4759_s3 + $0x10] sm:$0xff]   ;;  %v3474_v45 = vld [vmem:[%s4759_s3 + $0x18] sm:$0xff]  }
  0x10   :  { %2698 = vmatprep.subr.bf16.mxu0 %v3748_v16  ;;  %v3477_v46 = vld [vmem:[%s4758_s0 + $0x2c] ss:$20 sps:$4 sm:$0xff]   ;;  %v3475_v47 = vld [vmem:[%s4758_s0 + $0x28] ss:$20 sps:$4 sm:$0xff]  }
  0x11   :  { %2719 = vmatpush3.bf16.msra.mxu1 %v3742_v15  ;;  %v3481_v48 = vld [vmem:[%s4758_s0 + $0x38] ss:$20 sps:$4 sm:$0xff]   ;;  %v3963_v50 = vld [vmem:[%s4760_s2] ss:$0 sm:$0xff] }
  0x12   :  { %2720 = vmatprep.subr.bf16.mxu1 %v3760_v18 }
  0x13   :  { %2699 = vmatpush3.bf16.msra.mxu0 %v3754_v17 }
  0x14   :  { %2700 = vmatprep.subr.bf16.mxu0 %v3772_v20 }
  0x15   :  { %2721 = vmatpush3.bf16.msra.mxu1 %v3766_v19 }
  0x16   :  { %2722 = vmatprep.subr.bf16.mxu1 %v3784_v22 }
  0x17   :  { %2701 = vmatpush3.bf16.msra.mxu0 %v3778_v21 }
  0x18   :  { %2702 = vmatprep.subr.bf16.mxu0 %v3796_v24 }
  0x19   :  { %2723 = vmatpush3.bf16.msra.mxu1 %v3790_v23 }
  0x1a   :  { %2724 = vmatprep.subr.bf16.mxu1 %v3808_v26 }
  0x1b   :  { %2703 = vmatpush3.bf16.msra.mxu0 %v3802_v25 }
  0x1c   :  { %2704 = vmatprep.subr.bf16.mxu0 %v3820_v28 }
  0x1d   :  { %2725 = vmatpush3.bf16.msra.mxu1 %v3814_v27 }
  0x1e   :  { %2726 = vmatprep.subr.bf16.mxu1 %v3832_v30 }
  0x1f   :  { %2705 = vmatpush3.bf16.msra.mxu0 %v3826_v29 }
  0x20   :  { %3176 = vmatprep.subr.bf16.mxu0 %v3608_v33 }
  0x21   :  { %2727 = vmatpush3.bf16.msra.mxu1 %v3846_v34 }
  0x22   :  { %399 = vmatmul.mubr.bf16.vlgmr.msra.gmra.mrb[0].mxu0 %v3459_v31  ;;  %3188 = vmatprep.subr.bf16.mxu1 %v3608_v33 }
  0x23   :  { %3184 = vmatprep.mubr.msk.bf16.mxu0 %vm3609_vm0, %v3608_v33  ;;  %3177 = vmatpush3.bf16.msra.mxu0 %v3858_v37 }
  0x24   :  { %440 = vmatmul.mubr.bf16.vlgmr.msra.gmra.mrb[0].mxu1 %v3463_v35  ;;  %3178 = vmatprep.subr.bf16.mxu0 %v3608_v33 }
  0x25   :  { %3196 = vmatprep.mubr.msk.bf16.mxu1 %vm3609_vm0, %v3608_v33  ;;  %3189 = vmatpush3.bf16.msra.mxu1 %v3471_v42 }
  0x26   :  { %3190 = vmatprep.subr.bf16.mxu1 %v3608_v33 }
  0x27   :  { %3179 = vmatpush3.bf16.msra.mxu0 %v3866_v38 }
  0x28   :  { %3180 = vmatprep.subr.bf16.mxu0 %v3608_v33 }
  0x29   :  { %3191 = vmatpush3.bf16.msra.mxu1 %v3472_v43 }
  0x2a   :  { %3192 = vmatprep.subr.bf16.mxu1 %v3608_v33 }
  0x2b   :  { %3181 = vmatpush3.bf16.msra.mxu0 %v3873_v39 }
  0x2c   :  { %3182 = vmatprep.subr.bf16.mxu0 %v3608_v33 }
  0x2d   :  { %3193 = vmatpush3.bf16.msra.mxu1 %v3473_v44 }
  0x2e   :  { %3194 = vmatprep.subr.bf16.mxu1 %v3608_v33 }
  0x2f   :  { %3183 = vmatpush3.bf16.msra.mxu0 %v3882_v40 }
  0x30   :  { %2744 = vmatprep.subr.bf16.mxu0 %v3653_v0 }
  0x31   :  { %3195 = vmatpush3.bf16.msra.mxu1 %v3474_v45  ;;  %v3480_v45 = vld [vmem:[%s4758_s0 + $0x34] ss:$20 sps:$4 sm:$0xff]  }
  0x32   :  { %3185 = vmatmul.mubr.msk.bf16.vlgmr.msra.gmra.mrb[4].mxu0 %vm362_vm1, %v3470_v41  ;;  %2766 = vmatprep.subr.bf16.mxu1 %v3664_v2 }
  0x33   :  { %2745 = vmatpush3.bf16.msra.mxu0 %v3658_v1  ;;  %635 = vmatprep.mubr.bf16.mxu0 %v3477_v46 }
  0x34   :  { %2746 = vmatprep.subr.bf16.mxu0 %v3676_v4 }
  0x37   :  { %2747 = vmatpush3.bf16.msra.mxu0 %v3682_v5 }
  0x38   :  { %2748 = vmatprep.subr.bf16.mxu0 %v3700_v8 }
  0x3b   :  { %2749 = vmatpush3.bf16.msra.mxu0 %v3706_v9 }
  0x3c   :  { %2750 = vmatprep.subr.bf16.mxu0 %v3724_v12 }
  0x3f   :  { %2751 = vmatpush3.bf16.msra.mxu0 %v3730_v13 }
  0x40   :  { %2752 = vmatprep.subr.bf16.mxu0 %v3748_v16 }
  0x43   :  { %2753 = vmatpush3.bf16.msra.mxu0 %v3754_v17 }
  0x44   :  { %2754 = vmatprep.subr.bf16.mxu0 %v3772_v20 }
  0x47   :  { %2755 = vmatpush3.bf16.msra.mxu0 %v3778_v21 }
  0x48   :  { %2756 = vmatprep.subr.bf16.mxu0 %v3796_v24 }
  0x4b   :  { %2757 = vmatpush3.bf16.msra.mxu0 %v3802_v25 }
  0x4c   :  { %2758 = vmatprep.subr.bf16.mxu0 %v3820_v28 }
  0x4f   :  { %2759 = vmatpush3.bf16.msra.mxu0 %v3826_v29 }
  0x50   :  { %3200 = vmatprep.subr.bf16.mxu0 %v3608_v33 }
  0x52   :  { %636 = vmatmul.mubr.bf16.vlgmr.msra.gmra.mrb[8].mxu0 %v3475_v47  ;;  %v3478_v47 = vld [vmem:[%s4758_s0 + $0x30] ss:$20 sps:$4 sm:$0xff]  }
  0x53   :  { %3201 = vmatpush3.bf16.msra.mxu0 %v3858_v37  ;;  %3208 = vmatprep.mubr.msk.bf16.mxu0 %vm3609_vm0, %v3608_v33 }
  0x54   :  { %3202 = vmatprep.subr.bf16.mxu0 %v3608_v33 }
  0x57   :  { %3203 = vmatpush3.bf16.msra.mxu0 %v3866_v38 }
  0x58   :  { %3204 = vmatprep.subr.bf16.mxu0 %v3608_v33 }
  0x5b   :  { %3205 = vmatpush3.bf16.msra.mxu0 %v3873_v39 }
  0x5c   :  { %3206 = vmatprep.subr.bf16.mxu0 %v3608_v33 }
  0x5f   :  { %3207 = vmatpush3.bf16.msra.mxu0 %v3882_v40 }
  0x60   :  { %2798 = vmatprep.subr.bf16.mxu0 %v3653_v0 }
  0x62   :  { %3209 = vmatmul.mubr.msk.bf16.vlgmr.msra.gmra.mrb[12].mxu0 %vm362_vm1, %v3481_v48  ;;  %v3482_v48 = vld [vmem:[%s4759_s3 + $0x20] sm:$0xff]  }
  0x63   :  { %2799 = vmatpush3.bf16.msra.mxu0 %v3658_v1 }
  0x64   :  { %2800 = vmatprep.subr.bf16.mxu0 %v3676_v4 }
  0x67   :  { %2801 = vmatpush3.bf16.msra.mxu0 %v3682_v5 }
  0x68   :  { %2802 = vmatprep.subr.bf16.mxu0 %v3700_v8 }
  0x6b   :  { %2803 = vmatpush3.bf16.msra.mxu0 %v3706_v9 }
  0x6c   :  { %2804 = vmatprep.subr.bf16.mxu0 %v3724_v12 }
  0x6f   :  { %2805 = vmatpush3.bf16.msra.mxu0 %v3730_v13 }
  0x70   :  { %2806 = vmatprep.subr.bf16.mxu0 %v3748_v16 }
  0x73   :  { %2807 = vmatpush3.bf16.msra.mxu0 %v3754_v17 }
  0x74   :  { %2808 = vmatprep.subr.bf16.mxu0 %v3772_v20 }
  0x77   :  { %2809 = vmatpush3.bf16.msra.mxu0 %v3778_v21 }
  0x78   :  { %2810 = vmatprep.subr.bf16.mxu0 %v3796_v24 }
  0x7b   :  { %2811 = vmatpush3.bf16.msra.mxu0 %v3802_v25 }
  0x7c   :  { %2812 = vmatprep.subr.bf16.mxu0 %v3820_v28 }
  0x7f   :  { %2813 = vmatpush3.bf16.msra.mxu0 %v3826_v29 }
  0x80   :  { %3224 = vmatprep.subr.bf16.mxu0 %v3608_v33 }
  0xf5   :  { %v2706_v49 = vpop.f32.mrb[0].mxu0 }
  0xf6   :  { %v2707_v51 = vpop.f32.mrb[1].mxu0 }
  0xf7   :  { %v2708_v52 = vadd.f32 %v2707_v51, %v2706_v49  ;;  %v2709_v53 = vpop.f32.mrb[2].mxu0  ;;  %v2728_v54 = vpop.f32.mrb[0].mxu1 }
  0xf8   :  { %v2710_v55 = vpop.f32.mrb[3].mxu0  ;;  %v2729_v58 = vpop.f32.mrb[1].mxu1 }
  0xf9   :  { %v401_v56 = vadd.f32 %v2708_v52, %v3963_v50  ;;  %v2711_v57 = vadd.f32 %v2710_v55, %v2709_v53  ;;  %v2730_v59 = vadd.f32 %v2729_v58, %v2728_v54  ;;  %v2731_v60 = vpop.f32.mrb[2].mxu1 }
  0xfa   :  { %v2732_v62 = vpop.f32.mrb[3].mxu1 }
  0xfb   :  { %v404_v61 = vadd.f32 %v2711_v57, %v3963_v50  ;;  %v2733_v63 = vadd.f32 %v2732_v62, %v2731_v60  ;;  %v442_v31 = vadd.f32 %v2730_v59, %v401_v56  ;;  %v3483_v56 = vld [vmem:[%s4759_s3 + $0x28] sm:$0xff]   ;;  %v3484_v57 = vld [vmem:[%s4759_s3 + $0x30] sm:$0xff]   ;;  %v3485_v62 = vld [vmem:[%s4759_s3 + $0x38] sm:$0xff]  }
  0xfd   :  { %v445_v32 = vadd.f32 %v2733_v63, %v404_v61  ;;  %v3488_v63 = vld [vmem:[%s4758_s0 + $0x54] ss:$20 sps:$4 sm:$0xff]  }
  0xfe   :  { %872 = vmatprep.mubr.bf16.mxu0 %v3488_v63  ;;  %v3497_v63 = vld [vmem:[%s4758_s0 + $0x78] ss:$20 sps:$4 sm:$0xff]  }
 0x105   :  { %v482_v35 = vpop.f32.mrb[4].mxu0 }
 0x106   :  { %v483_v36 = vadd.f32 %v482_v35, %v442_v31  ;;  %v3186_v41 = vpop.f32.mrb[5].mxu0  ;;  %v3486_v31 = vld [vmem:[%s4758_s0 + $0x50] ss:$20 sps:$4 sm:$0xff]  }
 0x107   :  { %v485_v42 = vpop.f32.mrb[6].mxu0  ;;  %873 = vmatmul.mubr.bf16.vlgmr.msra.gmra.mrb[16].mxu0 %v3486_v31  ;;  %v4108_v31 = vld [vmem:[%s4757_s1 + $0x40] sm:$0xff]  }
 0x108   :  { %v486_v43 = vadd.f32 %v485_v42, %v445_v32  ;;  %v3187_v44 = vpop.f32.mrb[7].mxu0  ;;  %3225 = vmatpush3.bf16.msra.mxu0 %v3858_v37  ;;  %3232 = vmatprep.mubr.msk.bf16.mxu0 %vm3609_vm0, %v3608_v33  ;;  %v3492_v32 = vld [vmem:[%s4758_s0 + $0x60] ss:$20 sps:$4 sm:$0xff]  }
 0x109   :  { %3226 = vmatprep.subr.bf16.mxu0 %v3608_v33 }
 0x10a   :  { %v489_v46 = vpack.c.bf16 %v486_v43, %v483_v36 }
 0x10c   :  { %3197 = vmatmul.mubr.msk.bf16.vlgmr.msra.gmra.mrb[4].mxu1 %vm362_vm1, %v489_v46  ;;  %3227 = vmatpush3.bf16.msra.mxu0 %v3866_v38 }
 0x10d   :  { %2767 = vmatpush3.bf16.msra.mxu1 %v3670_v3  ;;  %676 = vmatprep.mubr.bf16.mxu1 %v3480_v45 }
 0x10e   :  { %2768 = vmatprep.subr.bf16.mxu1 %v3688_v6  ;;  %3228 = vmatprep.subr.bf16.mxu0 %v3608_v33 }
 0x110   :  { %3229 = vmatpush3.bf16.msra.mxu0 %v3873_v39 }
 0x111   :  { %2769 = vmatpush3.bf16.msra.mxu1 %v3694_v7  ;;  %3230 = vmatprep.subr.bf16.mxu0 %v3608_v33 }
 0x112   :  { %2770 = vmatprep.subr.bf16.mxu1 %v3712_v10 }
 0x114   :  { %3231 = vmatpush3.bf16.msra.mxu0 %v3882_v40 }
 0x115   :  { %2771 = vmatpush3.bf16.msra.mxu1 %v3718_v11  ;;  %2852 = vmatprep.subr.bf16.mxu0 %v3653_v0 }
 0x116   :  { %2772 = vmatprep.subr.bf16.mxu1 %v3736_v14 }
 0x117   :  { %3233 = vmatmul.mubr.msk.bf16.vlgmr.msra.gmra.mrb[20].mxu0 %vm362_vm1, %v3492_v32  ;;  %v4115_v32 = vld [vmem:[%s4757_s1] sm:$0xff]  }
 0x118   :  { %2853 = vmatpush3.bf16.msra.mxu0 %v3658_v1 }
 0x119   :  { %2773 = vmatpush3.bf16.msra.mxu1 %v3742_v15  ;;  %2854 = vmatprep.subr.bf16.mxu0 %v3676_v4 }
 0x11a   :  { %2774 = vmatprep.subr.bf16.mxu1 %v3760_v18 }
 0x11c   :  { %2855 = vmatpush3.bf16.msra.mxu0 %v3682_v5 }
 0x11d   :  { %2775 = vmatpush3.bf16.msra.mxu1 %v3766_v19  ;;  %2856 = vmatprep.subr.bf16.mxu0 %v3700_v8 }
 0x11e   :  { %2776 = vmatprep.subr.bf16.mxu1 %v3784_v22 }
 0x120   :  { %2857 = vmatpush3.bf16.msra.mxu0 %v3706_v9 }
 0x121   :  { %2777 = vmatpush3.bf16.msra.mxu1 %v3790_v23  ;;  %2858 = vmatprep.subr.bf16.mxu0 %v3724_v12 }
 0x122   :  { %2778 = vmatprep.subr.bf16.mxu1 %v3808_v26 }
 0x124   :  { %2859 = vmatpush3.bf16.msra.mxu0 %v3730_v13 }
 0x125   :  { %2779 = vmatpush3.bf16.msra.mxu1 %v3814_v27  ;;  %v2760_v49 = vpop.f32.mrb[8].mxu0  ;;  %2860 = vmatprep.subr.bf16.mxu0 %v3748_v16 }
 0x126   :  { %2780 = vmatprep.subr.bf16.mxu1 %v3832_v30  ;;  %v2761_v51 = vpop.f32.mrb[9].mxu0 }
 0x127   :  { %v2762_v52 = vadd.f32 %v2761_v51, %v2760_v49  ;;  %v2763_v53 = vpop.f32.mrb[10].mxu0  ;;  %v3491_v49 = vld [vmem:[%s4758_s0 + $0x5c] ss:$20 sps:$4 sm:$0xff]  }
 0x128   :  { %v2764_v54 = vpop.f32.mrb[11].mxu0  ;;  %2861 = vmatpush3.bf16.msra.mxu0 %v3754_v17 }
 0x129   :  { %2781 = vmatpush3.bf16.msra.mxu1 %v3846_v34  ;;  %v2765_v55 = vadd.f32 %v2764_v54, %v2763_v53  ;;  %2862 = vmatprep.subr.bf16.mxu0 %v3772_v20  ;;  %v638_v35 = vadd.f32 %v2762_v52, %v3963_v50 }
 0x12a   :  { %3212 = vmatprep.subr.bf16.mxu1 %v3608_v33 }
 0x12b   :  { %v641_v43 = vadd.f32 %v2765_v55, %v3963_v50  ;;  %v3494_v55 = vld [vmem:[%s4759_s3 + $0x48] sm:$0xff]  }
 0x12c   :  { %677 = vmatmul.mubr.bf16.vlgmr.msra.gmra.mrb[8].mxu1 %v3478_v47  ;;  %2863 = vmatpush3.bf16.msra.mxu0 %v3778_v21 }
 0x12d   :  { %3213 = vmatpush3.bf16.msra.mxu1 %v3482_v48  ;;  %3220 = vmatprep.mubr.msk.bf16.mxu1 %vm3609_vm0, %v3608_v33 }
 0x12e   :  { %3214 = vmatprep.subr.bf16.mxu1 %v3608_v33  ;;  %2864 = vmatprep.subr.bf16.mxu0 %v3796_v24 }
 0x130   :  { %2865 = vmatpush3.bf16.msra.mxu0 %v3802_v25 }
 0x131   :  { %3215 = vmatpush3.bf16.msra.mxu1 %v3483_v56  ;;  %2866 = vmatprep.subr.bf16.mxu0 %v3820_v28  ;;  %v3495_v56 = vld [vmem:[%s4759_s3 + $0x50] sm:$0xff]  }
 0x132   :  { %3216 = vmatprep.subr.bf16.mxu1 %v3608_v33 }
 0x134   :  { %2867 = vmatpush3.bf16.msra.mxu0 %v3826_v29 }
 0x135   :  { %v719_v58 = vpop.f32.mrb[12].mxu0  ;;  %3217 = vmatpush3.bf16.msra.mxu1 %v3484_v57  ;;  %3248 = vmatprep.subr.bf16.mxu0 %v3608_v33 }
 0x136   :  { %v3210_v59 = vpop.f32.mrb[13].mxu0  ;;  %3218 = vmatprep.subr.bf16.mxu1 %v3608_v33 }
 0x137   :  { %v722_v60 = vpop.f32.mrb[14].mxu0 }
 0x138   :  { %v3211_v61 = vpop.f32.mrb[15].mxu0 }
 0x139   :  { %3219 = vmatpush3.bf16.msra.mxu1 %v3485_v62  ;;  %v3496_v61 = vld [vmem:[%s4759_s3 + $0x58] sm:$0xff]  }
 0x13a   :  { %2820 = vmatprep.subr.bf16.mxu1 %v3664_v2  ;;  %v3499_v62 = vld [vmem:[%s4758_s0 + $0x7c] ss:$20 sps:$4 sm:$0xff]  }
 0x13b   :  { %1109 = vmatprep.mubr.bf16.mxu0 %v3499_v62 }
 0x13c   :  { %1110 = vmatmul.mubr.bf16.vlgmr.msra.gmra.mrb[24].mxu0 %v3497_v63 }
 0x13d   :  { %3249 = vmatpush3.bf16.msra.mxu0 %v3858_v37  ;;  %3256 = vmatprep.mubr.msk.bf16.mxu0 %vm3609_vm0, %v3608_v33 }
 0x13e   :  { %3250 = vmatprep.subr.bf16.mxu0 %v3608_v33 }
 0x141   :  { %3251 = vmatpush3.bf16.msra.mxu0 %v3866_v38 }
 0x142   :  { %3252 = vmatprep.subr.bf16.mxu0 %v3608_v33 }
 0x145   :  { %3253 = vmatpush3.bf16.msra.mxu0 %v3873_v39 }
 0x146   :  { %3254 = vmatprep.subr.bf16.mxu0 %v3608_v33 }
 0x149   :  { %3255 = vmatpush3.bf16.msra.mxu0 %v3882_v40 }
 0x14a   :  { %2906 = vmatprep.subr.bf16.mxu0 %v4108_v31 }
 0x1ff   :  { %v2782_v0 = vpop.f32.mrb[8].mxu1 }
 0x200   :  { %v2783_v1 = vpop.f32.mrb[9].mxu1 }
 0x201   :  { %v2784_v36 = vadd.f32 %v2783_v1, %v2782_v0  ;;  %v2785_v41 = vpop.f32.mrb[10].mxu1  ;;  %v4142_v1 = vld [vmem:[%s4757_s1 + $0x80] sm:$0xff]  }
 0x202   :  { %v2786_v42 = vpop.f32.mrb[11].mxu1 }
 0x203   :  { %v679_v44 = vadd.f32 %v2784_v36, %v638_v35  ;;  %v2787_v45 = vadd.f32 %v2786_v42, %v2785_v41  ;;  %v4148_v35 = vld [vmem:[%s4757_s1 + $0xc8] sm:$0xff]   ;;  %v4160_v41 = vld [vmem:[%s4757_s1 + $0xd0] sm:$0xff]  }
 0x204   :  { %v4154_v36 = vld [vmem:[%s4757_s1 + $0x88] sm:$0xff]   ;;  %v4166_v42 = vld [vmem:[%s4757_s1 + $0x90] sm:$0xff]  }
 0x205   :  { %v720_v46 = vadd.f32 %v719_v58, %v679_v44  ;;  %v682_v47 = vadd.f32 %v2787_v45, %v641_v43 }
 0x207   :  { %v723_v48 = vadd.f32 %v722_v60, %v682_v47  ;;  %v3507_v47 = vld [vmem:[%s4759_s3 + $0x78] sm:$0xff]  }
 0x209   :  { %v726_v51 = vpack.c.bf16 %v723_v48, %v720_v46  ;;  %v4209_v48 = vld [vmem:[%s4757_s1 + $0xc0] sm:$0xff]  }
 0x20b   :  { %3221 = vmatmul.mubr.msk.bf16.vlgmr.msra.gmra.mrb[4].mxu1 %vm362_vm1, %v726_v51  ;;  %v3508_v51 = vld [vmem:[%s4758_s0 + $0xa0] ss:$20 sps:$4 sm:$0xff]  }
 0x20c   :  { %2821 = vmatpush3.bf16.msra.mxu1 %v3670_v3  ;;  %913 = vmatprep.mubr.bf16.mxu1 %v3491_v49  ;;  %v3489_v3 = vld [vmem:[%s4758_s0 + $0x58] ss:$20 sps:$4 sm:$0xff]  }
 0x20d   :  { %2822 = vmatprep.subr.bf16.mxu1 %v3688_v6  ;;  %v3493_v6 = vld [vmem:[%s4759_s3 + $0x40] sm:$0xff]  }
 0x20e   :  { %v3510_v49 = vld [vmem:[%s4758_s0 + $0xa4] ss:$20 sps:$4 sm:$0xff]  }
 0x210   :  { %2823 = vmatpush3.bf16.msra.mxu1 %v3694_v7  ;;  %v2814_v7 = vpop.f32.mrb[16].mxu0 }
 0x211   :  { %2824 = vmatprep.subr.bf16.mxu1 %v3712_v10  ;;  %v2815_v10 = vpop.f32.mrb[17].mxu0 }
 0x212   :  { %v2817_v52 = vpop.f32.mrb[18].mxu0 }
 0x213   :  { %v2818_v53 = vpop.f32.mrb[19].mxu0 }
 0x214   :  { %2825 = vmatpush3.bf16.msra.mxu1 %v3718_v11  ;;  %v2816_v11 = vadd.f32 %v2815_v10, %v2814_v7  ;;  %v2819_v54 = vadd.f32 %v2818_v53, %v2817_v52  ;;  %v956_v57 = vpop.f32.mrb[20].mxu0  ;;  %v4266_v7 = vld [vmem:[%s4757_s1 + $0x18] sm:$0xff]   ;;  %v4272_v10 = vld [vmem:[%s4757_s1 + $0x60] sm:$0xff]   ;;  %v4284_v52 = vld [vmem:[%s4757_s1 + $0x68] sm:$0xff]  }
 0x215   :  { %2826 = vmatprep.subr.bf16.mxu1 %v3736_v14  ;;  %v3234_v58 = vpop.f32.mrb[21].mxu0  ;;  %v4290_v53 = vld [vmem:[%s4757_s1 + $0x28] sm:$0xff]  }
 0x216   :  { %v959_v59 = vpop.f32.mrb[22].mxu0 }
 0x217   :  { %v3235_v60 = vpop.f32.mrb[23].mxu0 }
 0x218   :  { %2827 = vmatpush3.bf16.msra.mxu1 %v3742_v15 }
 0x219   :  { %2828 = vmatprep.subr.bf16.mxu1 %v3760_v18 }
 0x21c   :  { %2829 = vmatpush3.bf16.msra.mxu1 %v3766_v19 }
 0x21d   :  { %2830 = vmatprep.subr.bf16.mxu1 %v3784_v22 }
 0x220   :  { %2831 = vmatpush3.bf16.msra.mxu1 %v3790_v23 }
 0x221   :  { %2832 = vmatprep.subr.bf16.mxu1 %v3808_v26 }
 0x224   :  { %2833 = vmatpush3.bf16.msra.mxu1 %v3814_v27 }
 0x225   :  { %2834 = vmatprep.subr.bf16.mxu1 %v3832_v30 }
 0x228   :  { %2835 = vmatpush3.bf16.msra.mxu1 %v3846_v34 }
 0x229   :  { %3236 = vmatprep.subr.bf16.mxu1 %v3608_v33 }
 0x22b   :  { %914 = vmatmul.mubr.bf16.vlgmr.msra.gmra.mrb[12].mxu1 %v3489_v3  ;;  %v3514_v3 = vld [vmem:[%s4758_s0 + $0xb0] ss:$20 sps:$4 sm:$0xff]  }
 0x22c   :  { %3237 = vmatpush3.bf16.msra.mxu1 %v3493_v6  ;;  %3244 = vmatprep.mubr.msk.bf16.mxu1 %vm3609_vm0, %v3608_v33  ;;  %v4260_v6 = vld [vmem:[%s4757_s1 + $0x58] sm:$0xff]  }
 0x22d   :  { %3238 = vmatprep.subr.bf16.mxu1 %v3608_v33 }
 0x230   :  { %3239 = vmatpush3.bf16.msra.mxu1 %v3494_v55  ;;  %v4302_v55 = vld [vmem:[%s4757_s1 + $0x30] sm:$0xff]  }
 0x231   :  { %3240 = vmatprep.subr.bf16.mxu1 %v3608_v33 }
 0x234   :  { %3241 = vmatpush3.bf16.msra.mxu1 %v3495_v56  ;;  %v4308_v56 = vld [vmem:[%s4757_s1 + $0x78] sm:$0xff]  }
 0x235   :  { %3242 = vmatprep.subr.bf16.mxu1 %v3608_v33 }
 0x238   :  { %3243 = vmatpush3.bf16.msra.mxu1 %v3496_v61 }
 0x239   :  { %2874 = vmatprep.subr.bf16.mxu1 %v3664_v2  ;;  %v3503_v2 = vld [vmem:[%s4758_s0 + $0x88] ss:$20 sps:$4 sm:$0xff]  }
 0x23a   :  { %3257 = vmatmul.mubr.msk.bf16.vlgmr.msra.gmra.mrb[28].mxu0 %vm362_vm1, %v3503_v2 }
 0x23b   :  { %2907 = vmatpush3.bf16.msra.mxu0 %v4115_v32  ;;  %1346 = vmatprep.mubr.bf16.mxu0 %v3510_v49  ;;  %v3518_v49 = vld [vmem:[%s4759_s3 + $0x98] sm:$0xff]  }
 0x23c   :  { %2908 = vmatprep.subr.bf16.mxu0 %v3676_v4 }
 0x23f   :  { %2909 = vmatpush3.bf16.msra.mxu0 %v3682_v5 }
 0x240   :  { %2910 = vmatprep.subr.bf16.mxu0 %v3700_v8  ;;  %v875_v8 = vadd.f32 %v2816_v11, %v3963_v50  ;;  %v4278_v11 = vld [vmem:[%s4757_s1 + $0x20] sm:$0xff]  }
 0x243   :  { %2911 = vmatpush3.bf16.msra.mxu0 %v3706_v9 }
 0x244   :  { %2912 = vmatprep.subr.bf16.mxu0 %v3724_v12 }
 0x247   :  { %2913 = vmatpush3.bf16.msra.mxu0 %v3730_v13 }
 0x248   :  { %2914 = vmatprep.subr.bf16.mxu0 %v3748_v16  ;;  %v878_v16 = vadd.f32 %v2819_v54, %v3963_v50  ;;  %v4296_v54 = vld [vmem:[%s4757_s1 + $0x70] sm:$0xff]  }
 0x24b   :  { %2915 = vmatpush3.bf16.msra.mxu0 %v3754_v17 }
 0x24c   :  { %2916 = vmatprep.subr.bf16.mxu0 %v3772_v20 }
 0x24f   :  { %2917 = vmatpush3.bf16.msra.mxu0 %v3778_v21 }
 0x250   :  { %2918 = vmatprep.subr.bf16.mxu0 %v3796_v24 }
 0x253   :  { %2919 = vmatpush3.bf16.msra.mxu0 %v3802_v25 }
 0x254   :  { %2920 = vmatprep.subr.bf16.mxu0 %v3820_v28  ;;  %v3502_v28 = vld [vmem:[%s4758_s0 + $0x84] ss:$20 sps:$4 sm:$0xff]  }
 0x257   :  { %2921 = vmatpush3.bf16.msra.mxu0 %v3826_v29 }
 0x258   :  { %3272 = vmatprep.subr.bf16.mxu0 %v3608_v33 }
 0x25a   :  { %1347 = vmatmul.mubr.bf16.vlgmr.msra.gmra.mrb[32].mxu0 %v3508_v51  ;;  %v3521_v51 = vld [vmem:[%s4758_s0 + $0xcc] ss:$20 sps:$4 sm:$0xff]  }
 0x25b   :  { %3273 = vmatpush3.bf16.msra.mxu0 %v3858_v37  ;;  %3280 = vmatprep.mubr.msk.bf16.mxu0 %vm3609_vm0, %v3608_v33  ;;  %v4236_v37 = vld [vmem:[%s4757_s1 + $0x48] sm:$0xff]  }
 0x25c   :  { %3274 = vmatprep.subr.bf16.mxu0 %v3608_v33 }
 0x25f   :  { %3275 = vmatpush3.bf16.msra.mxu0 %v3866_v38  ;;  %v4242_v38 = vld [vmem:[%s4757_s1 + $0x8] sm:$0xff]  }
 0x260   :  { %3276 = vmatprep.subr.bf16.mxu0 %v3608_v33 }
 0x263   :  { %3277 = vmatpush3.bf16.msra.mxu0 %v3873_v39  ;;  %v4248_v39 = vld [vmem:[%s4757_s1 + $0x50] sm:$0xff]  }
 0x264   :  { %3278 = vmatprep.subr.bf16.mxu0 %v3608_v33 }
 0x267   :  { %3279 = vmatpush3.bf16.msra.mxu0 %v3882_v40  ;;  %v4254_v40 = vld [vmem:[%s4757_s1 + $0x10] sm:$0xff]  }
 0x268   :  { %2960 = vmatprep.subr.bf16.mxu0 %v4108_v31 }
 0x26a   :  { %3281 = vmatmul.mubr.msk.bf16.vlgmr.msra.gmra.mrb[36].mxu0 %vm362_vm1, %v3514_v3  ;;  %v3519_v3 = vld [vmem:[%s4758_s0 + $0xc8] ss:$20 sps:$4 sm:$0xff]  }
 0x26b   :  { %2961 = vmatpush3.bf16.msra.mxu0 %v4115_v32  ;;  %1583 = vmatprep.mubr.bf16.mxu0 %v3521_v51  ;;  %v3528_v51 = vld [vmem:[%s4759_s3 + $0xb0] sm:$0xff]  }
 0x26c   :  { %2962 = vmatprep.subr.bf16.mxu0 %v4236_v37 }
 0x26f   :  { %2963 = vmatpush3.bf16.msra.mxu0 %v4242_v38 }
 0x270   :  { %2964 = vmatprep.subr.bf16.mxu0 %v4248_v39 }
 0x273   :  { %2965 = vmatpush3.bf16.msra.mxu0 %v4254_v40 }
 0x274   :  { %2966 = vmatprep.subr.bf16.mxu0 %v4260_v6 }
 0x277   :  { %2967 = vmatpush3.bf16.msra.mxu0 %v4266_v7 }
 0x278   :  { %2968 = vmatprep.subr.bf16.mxu0 %v4272_v10 }
 0x27b   :  { %2969 = vmatpush3.bf16.msra.mxu0 %v4278_v11 }
 0x27c   :  { %2970 = vmatprep.subr.bf16.mxu0 %v4284_v52 }
 0x27f   :  { %2971 = vmatpush3.bf16.msra.mxu0 %v4290_v53 }
 0x280   :  { %2972 = vmatprep.subr.bf16.mxu0 %v4296_v54 }
 0x283   :  { %2973 = vmatpush3.bf16.msra.mxu0 %v4302_v55 }
 0x284   :  { %2974 = vmatprep.subr.bf16.mxu0 %v4308_v56 }
 0x287   :  { %2975 = vmatpush3.bf16.msra.mxu0 %v3826_v29  ;;  %v3513_v29 = vld [vmem:[%s4758_s0 + $0xac] ss:$20 sps:$4 sm:$0xff]  }
 0x288   :  { %3296 = vmatprep.subr.bf16.mxu0 %v3608_v33 }
 0x28a   :  { %1584 = vmatmul.mubr.bf16.vlgmr.msra.gmra.mrb[40].mxu0 %v3519_v3 }
 0x28b   :  { %3304 = vmatprep.mubr.msk.bf16.mxu0 %vm3609_vm0, %v3608_v33 }
 0x2fe   :  { %v2836_v4 = vpop.f32.mrb[12].mxu1 }
 0x2ff   :  { %v2837_v5 = vpop.f32.mrb[13].mxu1 }
 0x300   :  { %v2838_v9 = vadd.f32 %v2837_v5, %v2836_v4  ;;  %v2839_v12 = vpop.f32.mrb[14].mxu1 }
 0x301   :  { %v2840_v13 = vpop.f32.mrb[15].mxu1 }
 0x302   :  { %v916_v17 = vadd.f32 %v2838_v9, %v875_v8  ;;  %v2841_v20 = vadd.f32 %v2840_v13, %v2839_v12  ;;  %v4330_v13 = vld [vmem:[%s4757_s1 + $0xd8] sm:$0xff]  }
 0x304   :  { %v957_v21 = vadd.f32 %v956_v57, %v916_v17  ;;  %v919_v24 = vadd.f32 %v2841_v20, %v878_v16  ;;  %v4336_v16 = vld [vmem:[%s4757_s1 + $0x98] sm:$0xff]   ;;  %v4342_v17 = vld [vmem:[%s4757_s1 + $0xe0] sm:$0xff]  }
 0x305   :  { %v4348_v20 = vld [vmem:[%s4757_s1 + $0xa0] sm:$0xff]  }
 0x306   :  { %v960_v25 = vadd.f32 %v959_v59, %v919_v24  ;;  %v4360_v24 = vld [vmem:[%s4757_s1 + $0xa8] sm:$0xff]  }
 0x308   :  { %v963_v0 = vpack.c.bf16 %v960_v25, %v957_v21  ;;  %v4354_v21 = vld [vmem:[%s4757_s1 + $0xe8] sm:$0xff]   ;;  %v4366_v25 = vld [vmem:[%s4757_s1 + $0xf0] sm:$0xff]  }
 0x30a   :  { %3245 = vmatmul.mubr.msk.bf16.vlgmr.msra.gmra.mrb[4].mxu1 %vm362_vm1, %v963_v0  ;;  %v4378_v0 = vld [vmem:[%s4757_s1 + $0xf8] sm:$0xff]  }
 0x30b   :  { %2875 = vmatpush3.bf16.msra.mxu1 %v4142_v1  ;;  %1150 = vmatprep.mubr.bf16.mxu1 %v3502_v28  ;;  %v4372_v28 = vld [vmem:[%s4757_s1 + $0xb0] sm:$0xff]  }
 0x30c   :  { %2876 = vmatprep.subr.bf16.mxu1 %v4148_v35 }
 0x30f   :  { %2877 = vmatpush3.bf16.msra.mxu1 %v4154_v36 }
 0x310   :  { %2878 = vmatprep.subr.bf16.mxu1 %v4160_v41 }
 0x313   :  { %2879 = vmatpush3.bf16.msra.mxu1 %v4166_v42 }
 0x314   :  { %2880 = vmatprep.subr.bf16.mxu1 %v3736_v14  ;;  %v3500_v14 = vld [vmem:[%s4758_s0 + $0x80] ss:$20 sps:$4 sm:$0xff]  }
 0x317   :  { %2881 = vmatpush3.bf16.msra.mxu1 %v3742_v15  ;;  %v3504_v15 = vld [vmem:[%s4759_s3 + $0x60] sm:$0xff]  }
 0x318   :  { %2882 = vmatprep.subr.bf16.mxu1 %v3760_v18  ;;  %v2868_v18 = vpop.f32.mrb[24].mxu0 }
 0x31b   :  { %2883 = vmatpush3.bf16.msra.mxu1 %v3766_v19  ;;  %v2869_v19 = vpop.f32.mrb[25].mxu0 }
 0x31c   :  { %2884 = vmatprep.subr.bf16.mxu1 %v3784_v22  ;;  %v4189_v22 = vadd.f32 %v2869_v19, %v2868_v18  ;;  %v3515_v18 = vld [vmem:[%s4759_s3 + $0x80] sm:$0xff]  }
 0x31e   :  { %v1112_v59 = vadd.f32 %v4189_v22, %v3963_v50 }
 0x31f   :  { %2885 = vmatpush3.bf16.msra.mxu1 %v3790_v23  ;;  %v2871_v23 = vpop.f32.mrb[26].mxu0 }
 0x320   :  { %2886 = vmatprep.subr.bf16.mxu1 %v3808_v26  ;;  %v2872_v26 = vpop.f32.mrb[27].mxu0 }
 0x321   :  { %v4200_v43 = vpop.f32.mrb[28].mxu0 }
 0x322   :  { %v3258_v44 = vpop.f32.mrb[29].mxu0 }
 0x323   :  { %2887 = vmatpush3.bf16.msra.mxu1 %v3814_v27  ;;  %v4191_v27 = vadd.f32 %v2872_v26, %v2871_v23  ;;  %v1196_v45 = vpop.f32.mrb[30].mxu0 }
 0x324   :  { %2888 = vmatprep.subr.bf16.mxu1 %v3832_v30  ;;  %v3505_v30 = vld [vmem:[%s4759_s3 + $0x68] sm:$0xff]   ;;  %v3259_v46 = vpop.f32.mrb[31].mxu0 }
 0x325   :  { %v1115_v63 = vadd.f32 %v4191_v27, %v3963_v50 }
 0x327   :  { %2889 = vmatpush3.bf16.msra.mxu1 %v3846_v34  ;;  %v3506_v34 = vld [vmem:[%s4759_s3 + $0x70] sm:$0xff]  }
 0x328   :  { %3260 = vmatprep.subr.bf16.mxu1 %v3608_v33 }
 0x32a   :  { %1151 = vmatmul.mubr.bf16.vlgmr.msra.gmra.mrb[16].mxu1 %v3500_v14  ;;  %v3511_v14 = vld [vmem:[%s4758_s0 + $0xa8] ss:$20 sps:$4 sm:$0xff]  }
 0x32b   :  { %3261 = vmatpush3.bf16.msra.mxu1 %v3504_v15  ;;  %3268 = vmatprep.mubr.msk.bf16.mxu1 %vm3609_vm0, %v3608_v33  ;;  %v4387_v15 = vld [vmem:[%s4757_s1 + $0xb8] sm:$0xff]  }
 0x32c   :  { %3262 = vmatprep.subr.bf16.mxu1 %v3608_v33 }
 0x32d   :  { %v2922_v19 = vpop.f32.mrb[32].mxu0 }
 0x32e   :  { %v2923_v22 = vpop.f32.mrb[33].mxu0 }
 0x32f   :  { %3263 = vmatpush3.bf16.msra.mxu1 %v3505_v30  ;;  %v2924_v23 = vadd.f32 %v2923_v22, %v2922_v19  ;;  %v2925_v26 = vpop.f32.mrb[34].mxu0 }
 0x330   :  { %3264 = vmatprep.subr.bf16.mxu1 %v3608_v33  ;;  %v2926_v27 = vpop.f32.mrb[35].mxu0 }
 0x331   :  { %v2927_v30 = vadd.f32 %v2926_v27, %v2925_v26  ;;  %v3524_v26 = vld [vmem:[%s4758_s0 + $0xd4] ss:$20 sps:$4 sm:$0xff]  }
 0x333   :  { %3265 = vmatpush3.bf16.msra.mxu1 %v3506_v34  ;;  %v3516_v34 = vld [vmem:[%s4759_s3 + $0x88] sm:$0xff]  }
 0x334   :  { %3266 = vmatprep.subr.bf16.mxu1 %v3608_v33 }
 0x337   :  { %3267 = vmatpush3.bf16.msra.mxu1 %v3507_v47 }
 0x338   :  { %2928 = vmatprep.subr.bf16.mxu1 %v4209_v48 }
 0x33d   :  { %v1430_v44 = vpop.f32.mrb[36].mxu0 }
 0x3fd   :  { %v2890_v57 = vpop.f32.mrb[16].mxu1 }
 0x3fe   :  { %v2891_v58 = vpop.f32.mrb[17].mxu1 }
 0x3ff   :  { %v2892_v60 = vadd.f32 %v2891_v58, %v2890_v57  ;;  %v2893_v61 = vpop.f32.mrb[18].mxu1  ;;  %v4418_v57 = vld [vmem:[%s4757_s1 + $0x100] sm:$0xff]   ;;  %v4427_v58 = vld [vmem:[%s4757_s1 + $0x108] sm:$0xff]  }
 0x400   :  { %v2894_v62 = vpop.f32.mrb[19].mxu1  ;;  %3297 = vmatpush3.bf16.msra.mxu0 %v4418_v57 }
 0x401   :  { %v1153_v2 = vadd.f32 %v2892_v60, %v1112_v59  ;;  %v2895_v4 = vadd.f32 %v2894_v62, %v2893_v61  ;;  %3298 = vmatprep.subr.bf16.mxu0 %v3608_v33  ;;  %v4434_v59 = vld [vmem:[%s4757_s1 + $0x110] sm:$0xff]   ;;  %v4441_v60 = vld [vmem:[%s4757_s1 + $0x118] sm:$0xff]  }
 0x402   :  { %v3525_v61 = vld [vmem:[%s4758_s0 + $0xd8] ss:$20 sps:$4 sm:$0xff]  }
 0x403   :  { %v1194_v5 = vadd.f32 %v4200_v43, %v1153_v2  ;;  %v1156_v8 = vadd.f32 %v2895_v4, %v1115_v63  ;;  %v3517_v43 = vld [vmem:[%s4759_s3 + $0x90] sm:$0xff]   ;;  %v4466_v62 = vld [vmem:[%s4757_s1 + $0x38] sm:$0xff]   ;;  %v1349_v4 = vadd.f32 %v2924_v23, %v3963_v50 }
 0x404   :  { %3299 = vmatpush3.bf16.msra.mxu0 %v4427_v58  ;;  %v3522_v23 = vld [vmem:[%s4758_s0 + $0xd0] ss:$20 sps:$4 sm:$0xff]  }
 0x405   :  { %v1197_v9 = vadd.f32 %v1196_v45, %v1156_v8  ;;  %v3282_v45 = vpop.f32.mrb[37].mxu0  ;;  %3300 = vmatprep.subr.bf16.mxu0 %v3608_v33 }
 0x406   :  { %v1433_v46 = vpop.f32.mrb[38].mxu0 }
 0x407   :  { %v1200_v12 = vpack.c.bf16 %v1197_v9, %v1194_v5  ;;  %v3283_v47 = vpop.f32.mrb[39].mxu0 }
 0x408   :  { %3301 = vmatpush3.bf16.msra.mxu0 %v4434_v59 }
 0x409   :  { %3269 = vmatmul.mubr.msk.bf16.vlgmr.msra.gmra.mrb[4].mxu1 %vm362_vm1, %v1200_v12  ;;  %3302 = vmatprep.subr.bf16.mxu0 %v3608_v33 }
 0x40a   :  { %2929 = vmatpush3.bf16.msra.mxu1 %v4142_v1  ;;  %1387 = vmatprep.mubr.bf16.mxu1 %v3513_v29  ;;  %v1352_v29 = vadd.f32 %v2927_v30, %v3963_v50  ;;  %v3526_v30 = vld [vmem:[%s4759_s3 + $0xa0] sm:$0xff]  }
 0x40b   :  { %2930 = vmatprep.subr.bf16.mxu1 %v4148_v35 }
 0x40c   :  { %3303 = vmatpush3.bf16.msra.mxu0 %v4441_v60 }
 0x40d   :  { %3014 = vmatprep.subr.bf16.mxu0 %v4108_v31 }
 0x40e   :  { %2931 = vmatpush3.bf16.msra.mxu1 %v4154_v36 }
 0x40f   :  { %2932 = vmatprep.subr.bf16.mxu1 %v4160_v41  ;;  %3305 = vmatmul.mubr.msk.bf16.vlgmr.msra.gmra.mrb[44].mxu0 %vm362_vm1, %v3525_v61 }
 0x410   :  { %3015 = vmatpush3.bf16.msra.mxu0 %v4115_v32 }
 0x411   :  { %3016 = vmatprep.subr.bf16.mxu0 %v4236_v37 }
 0x412   :  { %2933 = vmatpush3.bf16.msra.mxu1 %v4166_v42 }
 0x413   :  { %2934 = vmatprep.subr.bf16.mxu1 %v4330_v13 }
 0x414   :  { %3017 = vmatpush3.bf16.msra.mxu0 %v4242_v38 }
 0x415   :  { %3018 = vmatprep.subr.bf16.mxu0 %v4248_v39 }
 0x416   :  { %2935 = vmatpush3.bf16.msra.mxu1 %v4336_v16 }
 0x417   :  { %2936 = vmatprep.subr.bf16.mxu1 %v4342_v17 }
 0x418   :  { %3019 = vmatpush3.bf16.msra.mxu0 %v4254_v40 }
 0x419   :  { %3020 = vmatprep.subr.bf16.mxu0 %v4260_v6 }
 0x41a   :  { %2937 = vmatpush3.bf16.msra.mxu1 %v4348_v20 }
 0x41b   :  { %2938 = vmatprep.subr.bf16.mxu1 %v4354_v21 }
 0x41c   :  { %3021 = vmatpush3.bf16.msra.mxu0 %v4266_v7 }
 0x41d   :  { %3022 = vmatprep.subr.bf16.mxu0 %v4272_v10 }
 0x41e   :  { %2939 = vmatpush3.bf16.msra.mxu1 %v4360_v24 }
 0x41f   :  { %2940 = vmatprep.subr.bf16.mxu1 %v4366_v25 }
 0x420   :  { %3023 = vmatpush3.bf16.msra.mxu0 %v4278_v11 }
 0x421   :  { %3024 = vmatprep.subr.bf16.mxu0 %v4284_v52 }
 0x422   :  { %2941 = vmatpush3.bf16.msra.mxu1 %v4372_v28 }
 0x423   :  { %2942 = vmatprep.subr.bf16.mxu1 %v4378_v0 }
 0x424   :  { %3025 = vmatpush3.bf16.msra.mxu0 %v4290_v53 }
 0x425   :  { %3026 = vmatprep.subr.bf16.mxu0 %v4296_v54 }
 0x426   :  { %2943 = vmatpush3.bf16.msra.mxu1 %v4387_v15 }
 0x427   :  { %3284 = vmatprep.subr.bf16.mxu1 %v3608_v33 }
 0x428   :  { %3027 = vmatpush3.bf16.msra.mxu0 %v4302_v55 }
 0x429   :  { %1388 = vmatmul.mubr.bf16.vlgmr.msra.gmra.mrb[20].mxu1 %v3511_v14  ;;  %3028 = vmatprep.subr.bf16.mxu0 %v4308_v56 }
 0x42a   :  { %3285 = vmatpush3.bf16.msra.mxu1 %v3515_v18  ;;  %3292 = vmatprep.mubr.msk.bf16.mxu1 %vm3609_vm0, %v3608_v33 }
 0x42b   :  { %3286 = vmatprep.subr.bf16.mxu1 %v3608_v33 }
 0x42c   :  { %3029 = vmatpush3.bf16.msra.mxu0 %v4466_v62 }
 0x42d   :  { %3320 = vmatprep.subr.bf16.mxu0 %v3608_v33 }
 0x42e   :  { %3287 = vmatpush3.bf16.msra.mxu1 %v3516_v34  ;;  %v2976_v34 = vpop.f32.mrb[40].mxu0 }
 0x42f   :  { %3288 = vmatprep.subr.bf16.mxu1 %v3608_v33 }
 0x432   :  { %3289 = vmatpush3.bf16.msra.mxu1 %v3517_v43  ;;  %v2977_v43 = vpop.f32.mrb[41].mxu0 }
 0x433   :  { %3290 = vmatprep.subr.bf16.mxu1 %v3608_v33  ;;  %v2979_v45 = vpop.f32.mrb[42].mxu0 }
 0x436   :  { %3291 = vmatpush3.bf16.msra.mxu1 %v3518_v49  ;;  %v3527_v49 = vld [vmem:[%s4759_s3 + $0xa8] sm:$0xff]  }
 0x437   :  { %2982 = vmatprep.subr.bf16.mxu1 %v4209_v48 }
 0x4fc   :  { %v2944_v63 = vpop.f32.mrb[20].mxu1 }
 0x4fd   :  { %v2945_v2 = vpop.f32.mrb[21].mxu1 }
 0x4fe   :  { %v2946_v5 = vadd.f32 %v2945_v2, %v2944_v63  ;;  %v2947_v8 = vpop.f32.mrb[22].mxu1 }
 0x4ff   :  { %v2948_v9 = vpop.f32.mrb[23].mxu1 }
 0x500   :  { %v1390_v12 = vadd.f32 %v2946_v5, %v1349_v4  ;;  %v2949_v14 = vadd.f32 %v2948_v9, %v2947_v8  ;;  %v3529_v4 = vld [vmem:[%s4759_s3 + $0xb8] sm:$0xff]   ;;  %v3532_v5 = vld [vmem:[%s4758_s0 + $0xf4] ss:$20 sps:$4 sm:$0xff]   ;;  %v3530_v8 = vld [vmem:[%s4758_s0 + $0xf0] ss:$20 sps:$4 sm:$0xff]  }
 0x501   :  { %1820 = vmatprep.mubr.bf16.mxu0 %v3532_v5  ;;  %v3536_v9 = vld [vmem:[%s4758_s0 + $0x100] ss:$20 sps:$4 sm:$0xff]  }
 0x502   :  { %v1431_v18 = vadd.f32 %v1430_v44, %v1390_v12  ;;  %v1393_v19 = vadd.f32 %v2949_v14, %v1352_v29  ;;  %v2978_v44 = vadd.f32 %v2977_v43, %v2976_v34  ;;  %1821 = vmatmul.mubr.bf16.vlgmr.msra.gmra.mrb[48].mxu0 %v3530_v8 }
 0x503   :  { %3321 = vmatpush3.bf16.msra.mxu0 %v4418_v57  ;;  %3328 = vmatprep.mubr.msk.bf16.mxu0 %vm3609_vm0, %v3608_v33 }
 0x504   :  { %v1434_v22 = vadd.f32 %v1433_v46, %v1393_v19  ;;  %v2980_v46 = vpop.f32.mrb[43].mxu0  ;;  %3322 = vmatprep.subr.bf16.mxu0 %v3608_v33  ;;  %v1586_v14 = vadd.f32 %v2978_v44, %v3963_v50  ;;  %v3537_v44 = vld [vmem:[%s4759_s3 + $0xc0] sm:$0xff]  }
 0x505   :  { %v2981_v47 = vadd.f32 %v2980_v46, %v2979_v45  ;;  %v1667_v3 = vpop.f32.mrb[44].mxu0  ;;  %v3535_v45 = vld [vmem:[%s4758_s0 + $0xfc] ss:$20 sps:$4 sm:$0xff]  }
 0x506   :  { %v1437_v27 = vpack.c.bf16 %v1434_v22, %v1431_v18  ;;  %v3306_v61 = vpop.f32.mrb[45].mxu0 }
 0x507   :  { %v1670_v63 = vpop.f32.mrb[46].mxu0  ;;  %3323 = vmatpush3.bf16.msra.mxu0 %v4427_v58 }
 0x508   :  { %3293 = vmatmul.mubr.msk.bf16.vlgmr.msra.gmra.mrb[4].mxu1 %vm362_vm1, %v1437_v27  ;;  %v3307_v2 = vpop.f32.mrb[47].mxu0  ;;  %3324 = vmatprep.subr.bf16.mxu0 %v3608_v33 }
 0x509   :  { %2983 = vmatpush3.bf16.msra.mxu1 %v4142_v1  ;;  %1624 = vmatprep.mubr.bf16.mxu1 %v3524_v26  ;;  %v1589_v26 = vadd.f32 %v2981_v47, %v3963_v50  ;;  %v3533_v50 = vld [vmem:[%s4758_s0 + $0xf8] ss:$20 sps:$4 sm:$0xff]  }
 0x50a   :  { %2984 = vmatprep.subr.bf16.mxu1 %v4148_v35  ;;  %v3538_v2 = vld [vmem:[%s4759_s3 + $0xc8] sm:$0xff]  }
 0x50b   :  { %3325 = vmatpush3.bf16.msra.mxu0 %v4434_v59 }
 0x50c   :  { %3326 = vmatprep.subr.bf16.mxu0 %v3608_v33 }
 0x50d   :  { %2985 = vmatpush3.bf16.msra.mxu1 %v4154_v36 }
 0x50e   :  { %2986 = vmatprep.subr.bf16.mxu1 %v4160_v41 }
 0x50f   :  { %3327 = vmatpush3.bf16.msra.mxu0 %v4441_v60 }
 0x510   :  { %3068 = vmatprep.subr.bf16.mxu0 %v4108_v31 }
 0x511   :  { %2987 = vmatpush3.bf16.msra.mxu1 %v4166_v42 }
 0x512   :  { %2988 = vmatprep.subr.bf16.mxu1 %v4330_v13  ;;  %3329 = vmatmul.mubr.msk.bf16.vlgmr.msra.gmra.mrb[52].mxu0 %vm362_vm1, %v3536_v9 }
 0x513   :  { %3069 = vmatpush3.bf16.msra.mxu0 %v4115_v32 }
 0x514   :  { %3070 = vmatprep.subr.bf16.mxu0 %v4236_v37 }
 0x515   :  { %2989 = vmatpush3.bf16.msra.mxu1 %v4336_v16 }
 0x516   :  { %2990 = vmatprep.subr.bf16.mxu1 %v4342_v17 }
 0x517   :  { %3071 = vmatpush3.bf16.msra.mxu0 %v4242_v38 }
 0x518   :  { %3072 = vmatprep.subr.bf16.mxu0 %v4248_v39 }
 0x519   :  { %2991 = vmatpush3.bf16.msra.mxu1 %v4348_v20 }
 0x51a   :  { %2992 = vmatprep.subr.bf16.mxu1 %v4354_v21 }
 0x51b   :  { %3073 = vmatpush3.bf16.msra.mxu0 %v4254_v40 }
 0x51c   :  { %3074 = vmatprep.subr.bf16.mxu0 %v4260_v6 }
 0x51d   :  { %2993 = vmatpush3.bf16.msra.mxu1 %v4360_v24 }
 0x51e   :  { %2994 = vmatprep.subr.bf16.mxu1 %v4366_v25 }
 0x51f   :  { %3075 = vmatpush3.bf16.msra.mxu0 %v4266_v7 }
 0x520   :  { %3076 = vmatprep.subr.bf16.mxu0 %v4272_v10 }
 0x521   :  { %2995 = vmatpush3.bf16.msra.mxu1 %v4372_v28 }
 0x522   :  { %2996 = vmatprep.subr.bf16.mxu1 %v4378_v0 }
 0x523   :  { %3077 = vmatpush3.bf16.msra.mxu0 %v4278_v11 }
 0x524   :  { %3078 = vmatprep.subr.bf16.mxu0 %v4284_v52 }
 0x525   :  { %2997 = vmatpush3.bf16.msra.mxu1 %v4387_v15 }
 0x526   :  { %3308 = vmatprep.subr.bf16.mxu1 %v3608_v33 }
 0x527   :  { %3079 = vmatpush3.bf16.msra.mxu0 %v4290_v53 }
 0x528   :  { %1625 = vmatmul.mubr.bf16.vlgmr.msra.gmra.mrb[24].mxu1 %v3522_v23  ;;  %3080 = vmatprep.subr.bf16.mxu0 %v4296_v54 }
 0x529   :  { %3309 = vmatpush3.bf16.msra.mxu1 %v3526_v30  ;;  %3316 = vmatprep.mubr.msk.bf16.mxu1 %vm3609_vm0, %v3608_v33 }
 0x52a   :  { %3310 = vmatprep.subr.bf16.mxu1 %v3608_v33 }
 0x52b   :  { %3081 = vmatpush3.bf16.msra.mxu0 %v4302_v55 }
 0x52c   :  { %3082 = vmatprep.subr.bf16.mxu0 %v4308_v56 }
 0x52d   :  { %3311 = vmatpush3.bf16.msra.mxu1 %v3527_v49 }
 0x52e   :  { %3312 = vmatprep.subr.bf16.mxu1 %v3608_v33 }
 0x52f   :  { %3083 = vmatpush3.bf16.msra.mxu0 %v4466_v62 }
 0x530   :  { %3344 = vmatprep.subr.bf16.mxu0 %v3608_v33 }
 0x531   :  { %3313 = vmatpush3.bf16.msra.mxu1 %v3528_v51 }
 0x532   :  { %3314 = vmatprep.subr.bf16.mxu1 %v3608_v33 }
 0x535   :  { %3315 = vmatpush3.bf16.msra.mxu1 %v3529_v4  ;;  %v3539_v4 = vld [vmem:[%s4759_s3 + $0xd0] sm:$0xff]  }
 0x536   :  { %3036 = vmatprep.subr.bf16.mxu1 %v4209_v48 }
 0x5d5   :  { %v3030_v47 = vpop.f32.mrb[48].mxu0 }
 0x5d6   :  { %v3031_v49 = vpop.f32.mrb[49].mxu0 }
 0x5d7   :  { %v3032_v51 = vadd.f32 %v3031_v49, %v3030_v47 }
 0x5fb   :  { %v2998_v29 = vpop.f32.mrb[24].mxu1 }
 0x5fc   :  { %v2999_v12 = vpop.f32.mrb[25].mxu1 }
 0x5fd   :  { %v3000_v18 = vadd.f32 %v2999_v12, %v2998_v29  ;;  %v3001_v19 = vpop.f32.mrb[26].mxu1  ;;  %v3540_v12 = vld [vmem:[%s4759_s3 + $0xd8] sm:$0xff]  }
 0x5fe   :  { %v3002_v22 = vpop.f32.mrb[27].mxu1 }
 0x5ff   :  { %v1627_v27 = vadd.f32 %v3000_v18, %v1586_v14  ;;  %v3003_v23 = vadd.f32 %v3002_v22, %v3001_v19  ;;  %v3543_v14 = vld [vmem:[%s4758_s0 + $0x11c] ss:$20 sps:$4 sm:$0xff]   ;;  %v3541_v18 = vld [vmem:[%s4758_s0 + $0x118] ss:$20 sps:$4 sm:$0xff]   ;;  %v3548_v22 = vld [vmem:[%s4759_s3 + $0xe0] sm:$0xff]  }
 0x600   :  { %2057 = vmatprep.mubr.bf16.mxu0 %v3543_v14  ;;  %v3547_v19 = vld [vmem:[%s4758_s0 + $0x128] ss:$20 sps:$4 sm:$0xff]   ;;  %v3557_v14 = vld [vmem:[%s4758_s0 + $0x14c] ss:$20 sps:$4 sm:$0xff]  }
 0x601   :  { %v1668_v30 = vadd.f32 %v1667_v3, %v1627_v27  ;;  %v1630_v34 = vadd.f32 %v3003_v23, %v1589_v26  ;;  %v3033_v3 = vpop.f32.mrb[50].mxu0  ;;  %2058 = vmatmul.mubr.bf16.vlgmr.msra.gmra.mrb[56].mxu0 %v3541_v18 }
 0x602   :  { %v3034_v61 = vpop.f32.mrb[51].mxu0  ;;  %3345 = vmatpush3.bf16.msra.mxu0 %v4418_v57  ;;  %3352 = vmatprep.mubr.msk.bf16.mxu0 %vm3609_vm0, %v3608_v33 }
 0x603   :  { %v1671_v43 = vadd.f32 %v1670_v63, %v1630_v34  ;;  %v3035_v63 = vadd.f32 %v3034_v61, %v3033_v3  ;;  %v1904_v5 = vpop.f32.mrb[52].mxu0  ;;  %3346 = vmatprep.subr.bf16.mxu0 %v3608_v33  ;;  %v3554_v3 = vld [vmem:[%s4758_s0 + $0x144] ss:$20 sps:$4 sm:$0xff]   ;;  %v3552_v61 = vld [vmem:[%s4758_s0 + $0x140] ss:$20 sps:$4 sm:$0xff]  }
 0x604   :  { %v3330_v8 = vpop.f32.mrb[53].mxu0 }
 0x605   :  { %v1674_v46 = vpack.c.bf16 %v1671_v43, %v1668_v30  ;;  %v1907_v9 = vpop.f32.mrb[54].mxu0 }
 0x606   :  { %v3331_v29 = vpop.f32.mrb[55].mxu0  ;;  %3347 = vmatpush3.bf16.msra.mxu0 %v4427_v58 }
 0x607   :  { %3317 = vmatmul.mubr.msk.bf16.vlgmr.msra.gmra.mrb[4].mxu1 %vm362_vm1, %v1674_v46  ;;  %3348 = vmatprep.subr.bf16.mxu0 %v3608_v33  ;;  %v3550_v46 = vld [vmem:[%s4759_s3 + $0xf0] sm:$0xff]  }
 0x608   :  { %3037 = vmatpush3.bf16.msra.mxu1 %v4142_v1  ;;  %1861 = vmatprep.mubr.bf16.mxu1 %v3535_v45  ;;  %v3549_v45 = vld [vmem:[%s4759_s3 + $0xe8] sm:$0xff]  }
 0x609   :  { %3038 = vmatprep.subr.bf16.mxu1 %v4148_v35 }
 0x60a   :  { %3349 = vmatpush3.bf16.msra.mxu0 %v4434_v59 }
 0x60b   :  { %3350 = vmatprep.subr.bf16.mxu0 %v3608_v33 }
 0x60c   :  { %3039 = vmatpush3.bf16.msra.mxu1 %v4154_v36 }
 0x60d   :  { %3040 = vmatprep.subr.bf16.mxu1 %v4160_v41 }
 0x60e   :  { %3351 = vmatpush3.bf16.msra.mxu0 %v4441_v60 }
 0x60f   :  { %3122 = vmatprep.subr.bf16.mxu0 %v4108_v31 }
 0x610   :  { %3041 = vmatpush3.bf16.msra.mxu1 %v4166_v42 }
 0x611   :  { %3042 = vmatprep.subr.bf16.mxu1 %v4330_v13  ;;  %3353 = vmatmul.mubr.msk.bf16.vlgmr.msra.gmra.mrb[60].mxu0 %vm362_vm1, %v3547_v19 }
 0x612   :  { %3123 = vmatpush3.bf16.msra.mxu0 %v4115_v32  ;;  %2294 = vmatprep.mubr.bf16.mxu0 %v3554_v3 }
 0x613   :  { %3124 = vmatprep.subr.bf16.mxu0 %v4236_v37  ;;  %v4631_v37 = vld [vmem:[%s4760_s2] ss:$0 sm:$0xff] }
 0x614   :  { %3043 = vmatpush3.bf16.msra.mxu1 %v4336_v16 }
 0x615   :  { %3044 = vmatprep.subr.bf16.mxu1 %v4342_v17 }
 0x616   :  { %3125 = vmatpush3.bf16.msra.mxu0 %v4242_v38  ;;  %v1823_v38 = vadd.f32 %v4631_v37, %v3032_v51  ;;  %v3551_v51 = vld [vmem:[%s4759_s3 + $0xf8] sm:$0xff]  }
 0x617   :  { %3126 = vmatprep.subr.bf16.mxu0 %v4248_v39 }
 0x618   :  { %3045 = vmatpush3.bf16.msra.mxu1 %v4348_v20 }
 0x619   :  { %3046 = vmatprep.subr.bf16.mxu1 %v4354_v21 }
 0x61a   :  { %3127 = vmatpush3.bf16.msra.mxu0 %v4254_v40 }
 0x61b   :  { %3128 = vmatprep.subr.bf16.mxu0 %v4260_v6 }
 0x61c   :  { %3047 = vmatpush3.bf16.msra.mxu1 %v4360_v24 }
 0x61d   :  { %3048 = vmatprep.subr.bf16.mxu1 %v4366_v25 }
 0x61e   :  { %3129 = vmatpush3.bf16.msra.mxu0 %v4266_v7  ;;  %v1826_v7 = vadd.f32 %v4631_v37, %v3035_v63 }
 0x61f   :  { %3130 = vmatprep.subr.bf16.mxu0 %v4272_v10 }
 0x620   :  { %3049 = vmatpush3.bf16.msra.mxu1 %v4372_v28 }
 0x621   :  { %3050 = vmatprep.subr.bf16.mxu1 %v4378_v0 }
 0x622   :  { %3131 = vmatpush3.bf16.msra.mxu0 %v4278_v11 }
 0x623   :  { %3132 = vmatprep.subr.bf16.mxu0 %v4284_v52 }
 0x624   :  { %3051 = vmatpush3.bf16.msra.mxu1 %v4387_v15 }
 0x625   :  { %3332 = vmatprep.subr.bf16.mxu1 %v3608_v33 }
 0x626   :  { %3133 = vmatpush3.bf16.msra.mxu0 %v4290_v53 }
 0x627   :  { %1862 = vmatmul.mubr.bf16.vlgmr.msra.gmra.mrb[28].mxu1 %v3533_v50  ;;  %3134 = vmatprep.subr.bf16.mxu0 %v4296_v54 }
 0x628   :  { %3333 = vmatpush3.bf16.msra.mxu1 %v3537_v44  ;;  %3340 = vmatprep.mubr.msk.bf16.mxu1 %vm3609_vm0, %v3608_v33 }
 0x629   :  { %3334 = vmatprep.subr.bf16.mxu1 %v3608_v33 }
 0x62a   :  { %3135 = vmatpush3.bf16.msra.mxu0 %v4302_v55  ;;  %v3546_v55 = vld [vmem:[%s4758_s0 + $0x124] ss:$20 sps:$4 sm:$0xff]  }
 0x62b   :  { %3136 = vmatprep.subr.bf16.mxu0 %v4308_v56 }
 0x62c   :  { %3335 = vmatpush3.bf16.msra.mxu1 %v3538_v2 }
 0x62d   :  { %3336 = vmatprep.subr.bf16.mxu1 %v3608_v33 }
 0x62e   :  { %3137 = vmatpush3.bf16.msra.mxu0 %v4466_v62  ;;  %v3544_v62 = vld [vmem:[%s4758_s0 + $0x120] ss:$20 sps:$4 sm:$0xff]  }
 0x62f   :  { %3368 = vmatprep.subr.bf16.mxu0 %v3608_v33 }
 0x630   :  { %3337 = vmatpush3.bf16.msra.mxu1 %v3539_v4 }
 0x631   :  { %3338 = vmatprep.subr.bf16.mxu1 %v3608_v33  ;;  %2295 = vmatmul.mubr.bf16.vlgmr.msra.gmra.mrb[64].mxu0 %v3552_v61 }
 0x632   :  { %3369 = vmatpush3.bf16.msra.mxu0 %v4418_v57  ;;  %3376 = vmatprep.mubr.msk.bf16.mxu0 %vm3609_vm0, %v3608_v33 }
 0x633   :  { %3370 = vmatprep.subr.bf16.mxu0 %v3608_v33 }
 0x634   :  { %3339 = vmatpush3.bf16.msra.mxu1 %v3540_v12 }
 0x635   :  { %3090 = vmatprep.subr.bf16.mxu1 %v4209_v48 }
 0x636   :  { %3371 = vmatpush3.bf16.msra.mxu0 %v4427_v58 }
 0x637   :  { %3372 = vmatprep.subr.bf16.mxu0 %v3608_v33 }
 0x63a   :  { %3373 = vmatpush3.bf16.msra.mxu0 %v4434_v59 }
 0x63b   :  { %3374 = vmatprep.subr.bf16.mxu0 %v3608_v33 }
 0x63e   :  { %3375 = vmatpush3.bf16.msra.mxu0 %v4441_v60 }
 0x6d4   :  { %v3084_v26 = vpop.f32.mrb[56].mxu0 }
 0x6d5   :  { %v3085_v27 = vpop.f32.mrb[57].mxu0 }
 0x6d6   :  { %v3086_v23 = vadd.f32 %v3085_v27, %v3084_v26  ;;  %v3087_v30 = vpop.f32.mrb[58].mxu0 }
 0x6d7   :  { %v3088_v34 = vpop.f32.mrb[59].mxu0 }
 0x6d8   :  { %v3089_v43 = vadd.f32 %v3088_v34, %v3087_v30  ;;  %v2060_v2 = vadd.f32 %v4631_v37, %v3086_v23 }
 0x6da   :  { %v2063_v8 = vadd.f32 %v4631_v37, %v3089_v43 }
 0x6e4   :  { %v2141_v50 = vpop.f32.mrb[60].mxu0 }
 0x6e5   :  { %v3354_v44 = vpop.f32.mrb[61].mxu0 }
 0x6e6   :  { %v2144_v47 = vpop.f32.mrb[62].mxu0 }
 0x6e7   :  { %v3355_v49 = vpop.f32.mrb[63].mxu0 }
 0x6fa   :  { %v3052_v31 = vpop.f32.mrb[28].mxu1 }
 0x6fb   :  { %v3053_v32 = vpop.f32.mrb[29].mxu1 }
 0x6fc   :  { %v3054_v39 = vadd.f32 %v3053_v32, %v3052_v31  ;;  %v3055_v40 = vpop.f32.mrb[30].mxu1 }
 0x6fd   :  { %v3056_v6 = vpop.f32.mrb[31].mxu1 }
 0x6fe   :  { %v1864_v10 = vadd.f32 %v3054_v39, %v1823_v38  ;;  %v3057_v11 = vadd.f32 %v3056_v6, %v3055_v40 }
 0x700   :  { %v1905_v52 = vadd.f32 %v1904_v5, %v1864_v10  ;;  %v1867_v53 = vadd.f32 %v3057_v11, %v1826_v7 }
 0x702   :  { %v1908_v54 = vadd.f32 %v1907_v9, %v1867_v53 }
 0x704   :  { %v1911_v56 = vpack.c.bf16 %v1908_v54, %v1905_v52  ;;  %v2504_v54 = vld [vmem:[%s4761_s4] ss:$0 sm:$0xff] }
 0x706   :  { %3341 = vmatmul.mubr.msk.bf16.vlgmr.msra.gmra.mrb[4].mxu1 %vm362_vm1, %v1911_v56 }
 0x707   :  { %3091 = vmatpush3.bf16.msra.mxu1 %v4142_v1  ;;  %2098 = vmatprep.mubr.bf16.mxu1 %v3546_v55 }
 0x708   :  { %3092 = vmatprep.subr.bf16.mxu1 %v4148_v35 }
 0x70b   :  { %3093 = vmatpush3.bf16.msra.mxu1 %v4154_v36 }
 0x70c   :  { %3094 = vmatprep.subr.bf16.mxu1 %v4160_v41 }
 0x70f   :  { %3095 = vmatpush3.bf16.msra.mxu1 %v4166_v42 }
 0x710   :  { %3096 = vmatprep.subr.bf16.mxu1 %v4330_v13 }
 0x713   :  { %3097 = vmatpush3.bf16.msra.mxu1 %v4336_v16 }
 0x714   :  { %3098 = vmatprep.subr.bf16.mxu1 %v4342_v17 }
 0x717   :  { %3099 = vmatpush3.bf16.msra.mxu1 %v4348_v20 }
 0x718   :  { %3100 = vmatprep.subr.bf16.mxu1 %v4354_v21 }
 0x71b   :  { %3101 = vmatpush3.bf16.msra.mxu1 %v4360_v24 }
 0x71c   :  { %3102 = vmatprep.subr.bf16.mxu1 %v4366_v25 }
 0x71f   :  { %3103 = vmatpush3.bf16.msra.mxu1 %v4372_v28 }
 0x720   :  { %3104 = vmatprep.subr.bf16.mxu1 %v4378_v0 }
 0x723   :  { %3105 = vmatpush3.bf16.msra.mxu1 %v4387_v15 }
 0x724   :  { %3356 = vmatprep.subr.bf16.mxu1 %v3608_v33 }
 0x726   :  { %2099 = vmatmul.mubr.bf16.vlgmr.msra.gmra.mrb[32].mxu1 %v3544_v62 }
 0x727   :  { %3357 = vmatpush3.bf16.msra.mxu1 %v3548_v22  ;;  %3364 = vmatprep.mubr.msk.bf16.mxu1 %vm3609_vm0, %v3608_v33 }
 0x728   :  { %3358 = vmatprep.subr.bf16.mxu1 %v3608_v33 }
 0x72b   :  { %3359 = vmatpush3.bf16.msra.mxu1 %v3549_v45 }
 0x72c   :  { %3360 = vmatprep.subr.bf16.mxu1 %v3608_v33 }
 0x72f   :  { %3361 = vmatpush3.bf16.msra.mxu1 %v3550_v46 }
 0x730   :  { %3362 = vmatprep.subr.bf16.mxu1 %v3608_v33 }
 0x733   :  { %3363 = vmatpush3.bf16.msra.mxu1 %v3551_v51 }
 0x734   :  { %3144 = vmatprep.subr.bf16.mxu1 %v4209_v48  ;;  %v3558_v48 = vld [vmem:[%s4758_s0 + $0x150] ss:$20 sps:$4 sm:$0xff]  }
 0x735   :  { %3377 = vmatmul.mubr.msk.bf16.vlgmr.msra.gmra.mrb[68].mxu0 %vm362_vm1, %v3558_v48 }
 0x7f9   :  { %v3106_v57 = vpop.f32.mrb[32].mxu1 }
 0x7fa   :  { %v3107_v63 = vpop.f32.mrb[33].mxu1 }
 0x7fb   :  { %v3108_v4 = vadd.f32 %v3107_v63, %v3106_v57  ;;  %v3109_v58 = vpop.f32.mrb[34].mxu1 }
 0x7fc   :  { %v3110_v5 = vpop.f32.mrb[35].mxu1 }
 0x7fd   :  { %v2101_v59 = vadd.f32 %v3108_v4, %v2060_v2  ;;  %v3111_v9 = vadd.f32 %v3110_v5, %v3109_v58 }
 0x7ff   :  { %v2142_v29 = vadd.f32 %v2141_v50, %v2101_v59  ;;  %v2104_v12 = vadd.f32 %v3111_v9, %v2063_v8  ;;  %v2482_v50 = vstv %s4763_s6 }
 0x801   :  { %v2145_v60 = vadd.f32 %v2144_v47, %v2104_v12 }
 0x803   :  { %v2148_v18 = vpack.c.bf16 %v2145_v60, %v2142_v29 }
 0x805   :  { %3365 = vmatmul.mubr.msk.bf16.vlgmr.msra.gmra.mrb[4].mxu1 %vm362_vm1, %v2148_v18 }
 0x806   :  { %3145 = vmatpush3.bf16.msra.mxu1 %v4142_v1  ;;  %2335 = vmatprep.mubr.bf16.mxu1 %v3557_v14  ;;  %v3555_v1 = vld [vmem:[%s4758_s0 + $0x148] ss:$20 sps:$4 sm:$0xff]  }
 0x807   :  { %3146 = vmatprep.subr.bf16.mxu1 %v4148_v35  ;;  %v3559_v35 = vld [vmem:[%s4759_s3 + $0x100] sm:$0xff]  }
 0x80a   :  { %3147 = vmatpush3.bf16.msra.mxu1 %v4154_v36  ;;  %v3138_v36 = vpop.f32.mrb[64].mxu0 }
 0x80b   :  { %3148 = vmatprep.subr.bf16.mxu1 %v4160_v41  ;;  %v3139_v41 = vpop.f32.mrb[65].mxu0 }
 0x80e   :  { %3149 = vmatpush3.bf16.msra.mxu1 %v4166_v42  ;;  %v3140_v42 = vadd.f32 %v3139_v41, %v3138_v36 }
 0x80f   :  { %3150 = vmatprep.subr.bf16.mxu1 %v4330_v13  ;;  %v3141_v13 = vpop.f32.mrb[66].mxu0 }
 0x810   :  { %v2297_v32 = vadd.f32 %v4631_v37, %v3140_v42 }
 0x812   :  { %3151 = vmatpush3.bf16.msra.mxu1 %v4336_v16  ;;  %v3142_v16 = vpop.f32.mrb[67].mxu0 }
 0x813   :  { %3152 = vmatprep.subr.bf16.mxu1 %v4342_v17  ;;  %v3143_v17 = vadd.f32 %v3142_v16, %v3141_v13 }
 0x815   :  { %v2300_v6 = vadd.f32 %v4631_v37, %v3143_v17  ;;  %v2689_v37 = vld [vmem:[%s4762_s5] ss:$0 sm:$0xff] }
 0x816   :  { %3153 = vmatpush3.bf16.msra.mxu1 %v4348_v20  ;;  %v3560_v20 = vld [vmem:[%s4759_s3 + $0x108] sm:$0xff]  }
 0x817   :  { %3154 = vmatprep.subr.bf16.mxu1 %v4354_v21  ;;  %v2378_v21 = vpop.f32.mrb[68].mxu0 }
 0x81a   :  { %3155 = vmatpush3.bf16.msra.mxu1 %v4360_v24  ;;  %v3561_v24 = vld [vmem:[%s4759_s3 + $0x110] sm:$0xff]  }
 0x81b   :  { %3156 = vmatprep.subr.bf16.mxu1 %v4366_v25  ;;  %v3378_v25 = vpop.f32.mrb[69].mxu0 }
 0x81e   :  { %3157 = vmatpush3.bf16.msra.mxu1 %v4372_v28  ;;  %v2381_v28 = vpop.f32.mrb[70].mxu0 }
 0x81f   :  { %3158 = vmatprep.subr.bf16.mxu1 %v4378_v0  ;;  %v3379_v0 = vpop.f32.mrb[71].mxu0 }
 0x822   :  { %3159 = vmatpush3.bf16.msra.mxu1 %v4387_v15  ;;  %v3562_v15 = vld [vmem:[%s4759_s3 + $0x118] sm:$0xff]  }
 0x823   :  { %3380 = vmatprep.subr.bf16.mxu1 %v3608_v33 }
 0x825   :  { %2336 = vmatmul.mubr.bf16.vlgmr.msra.gmra.mrb[36].mxu1 %v3555_v1 }
 0x826   :  { %3381 = vmatpush3.bf16.msra.mxu1 %v3559_v35  ;;  %3388 = vmatprep.mubr.msk.bf16.mxu1 %vm3609_vm0, %v3608_v33 }
 0x827   :  { %3382 = vmatprep.subr.bf16.mxu1 %v3608_v33 }
 0x82a   :  { %3383 = vmatpush3.bf16.msra.mxu1 %v3560_v20 }
 0x82b   :  { %3384 = vmatprep.subr.bf16.mxu1 %v3608_v33 }
 0x82e   :  { %3385 = vmatpush3.bf16.msra.mxu1 %v3561_v24 }
 0x82f   :  { %3386 = vmatprep.subr.bf16.mxu1 %v3608_v33 }
 0x832   :  { %3387 = vmatpush3.bf16.msra.mxu1 %v3562_v15 }
 0x8f8   :  { %v3160_v19 = vpop.f32.mrb[36].mxu1 }
 0x8f9   :  { %v3161_v31 = vpop.f32.mrb[37].mxu1 }
 0x8fa   :  { %v3162_v38 = vadd.f32 %v3161_v31, %v3160_v19  ;;  %v3163_v39 = vpop.f32.mrb[38].mxu1 }
 0x8fb   :  { %v3164_v40 = vpop.f32.mrb[39].mxu1 }
 0x8fc   :  { %v2338_v7 = vadd.f32 %v3162_v38, %v2297_v32  ;;  %v3165_v10 = vadd.f32 %v3164_v40, %v3163_v39 }
 0x8fe   :  { %v2379_v11 = vadd.f32 %v2378_v21, %v2338_v7  ;;  %v2341_v52 = vadd.f32 %v3165_v10, %v2300_v6 }
 0x900   :  { %v2382_v53 = vadd.f32 %v2381_v28, %v2341_v52 }
 0x902   :  { %v2385_v33 = vpack.c.bf16 %v2382_v53, %v2379_v11 }
 0x904   :  { %3389 = vmatmul.mubr.msk.bf16.vlgmr.msra.gmra.mrb[4].mxu1 %vm362_vm1, %v2385_v33 }
 0x9d7   :  { %v2455_v55 = vpop.f32.mrb[4].mxu1 }
 0x9d8   :  { %v3392_v56 = vadd.f32 %v2504_v54, %v2455_v55  ;;  %v3390_v62 = vpop.f32.mrb[5].mxu1 }
 0x9d9   :  { %v2458_v22 = vpop.f32.mrb[6].mxu1 }
 0x9da   :  { %v2464_v26 = vmax.f32 %v3392_v56, 0.0  ;;  %v3393_v27 = vadd.f32 %v2504_v54, %v2458_v22  ;;  %v3391_v23 = vpop.f32.mrb[7].mxu1 }
 0x9dc   :  { %v2465_v30 = vmax.f32 %v3393_v27, 0.0  ;;  %v2473_v34 = vmul.f32 %v2689_v37, %v2464_v26 }
 0x9de   :  { %v2475_v43 = vsel %vm362_vm1, %v2473_v34, 0.0  ;;  %v2474_v45 = vmul.f32 %v2689_v37, %v2465_v30 }
 0x9df   :  { %2476 = vadd.xlane.f32.xlu0 %v2475_v43 }
 0x9e0   :  { %v2478_v46 = vsel %vm362_vm1, %v2474_v45, 0.0 }
 0x9e3   :  { %2479 = vadd.xlane.f32.xlu0 %v2478_v46 }
 0xa6c   :  { %v2477_v44 = vpop.xlane.xlu0 %2476 }
 0xa6d   :  { %v2483_v47 = vadd.f32 %v2482_v50, %v2477_v44 }
 0xa6f   :  { %v2485_v49 = vsub.f32 0.0, %v2483_v47 }
 0xa70   :  { %v2480_v51 = vpop.xlane.xlu0 %2479 }
 0xa71   :  { %v2487_v3 = vmul.f32 1.442695, %v2485_v49  ;;  %v2484_v61 = vadd.f32 %v2482_v50, %v2480_v51 }
 0xa73   :  { %3563 = vpow2.f32 %v2487_v3  ;;  %v2486_v48 = vsub.f32 0.0, %v2484_v61 }
 0xa75   :  { %v2489_v57 = vmul.f32 1.442695, %v2486_v48 }
 0xa77   :  { %3565 = vpow2.f32 %v2489_v57 }
 0xa7d   :  { %v3564_v63 = vpop.eup %3563 }
 0xa7e   :  { %v2491_v2 = vadd.f32 1.0, %v3564_v63 }
 0xa80   :  { %3567 = vrcp.f32 %v2491_v2 }
 0xa81   :  { %v3566_v4 = vpop.eup %3565 }
 0xa82   :  { %v2492_v58 = vadd.f32 1.0, %v3566_v4 }
 0xa84   :  { %3569 = vrcp.f32 %v2492_v58 }
 0xa8a   :  { %v3568_v5 = vpop.eup %3567 }
 0xa8b   :  { %2498 = vst.msk [vmem:[%s4764_s7] sm:$0xff] %vm2497_vm2, %v3568_v5 }
 0xa8e   :  { %v3570_v8 = vpop.eup %3569 }
 0xa8f   :  { %2499 = vst.msk [vmem:[%s4764_s7 + $0x8] sm:$0xff] %vm2497_vm2, %v3570_v8 }

</bundles_post_ra>
